<compile_context>
chip_gen: v6e
topology: v6e:2x2x1
jax: 0.10.0
libtpu: 0.0.40
codegen_flags: <defaults>
</compile_context>

<pallas_src>
import functools

import numpy as np
import jax
import jax.numpy as jnp
from jax.experimental import pallas as pl
from jax.experimental.pallas import tpu as pltpu


def _round_up(x, m):
    return (x + m - 1) // m * m


# ---------------------------------------------------------------------------
# Init-time weight packing (pure numpy, hoisted out of the forward pass).
# ---------------------------------------------------------------------------
def _dim_contribs(p_in):
    """1-D tap rules of one stride-2 transposed conv (k=3, pad=1) in phase space.

    Activations after l layers are stored per phase u = true_index mod 2**l on
    the original base grid.  For each output phase u' in [0, 2*p_in) return the
    list of (input_phase, base_grid_shift, kernel_tap) contributions.
    """
    contribs = []
    for up in range(2 * p_in):
        if up % 2 == 0:
            contribs.append([(up // 2, 0, 1)])            # even: tap k=1
        else:
            w = up // 2
            if w + 1 < p_in:
                contribs.append([(w, 0, 2), (w + 1, 0, 0)])
            else:                                          # crosses base cell
                contribs.append([(p_in - 1, 0, 2), (0, 1, 0)])
    return contribs


def _pack_layer(w_t, b, p_in, kin_rows_pad):
    """Pack one ConvTranspose2d layer for the phase-stacked kernel.

    w_t: (Cin, Cout, 3, 3) PyTorch ConvTranspose2d layout; b: (Cout,).
    Returns (W_packed bf16 of shape (P_out^2*Cout, 4*kin_rows_pad), bias f32).
    K axis order: shift block (0,0),(0,1),(1,0),(1,1)  x  input phase  x  Cin.
    """
    w_np = np.asarray(w_t, np.float32)
    b_np = np.asarray(b, np.float32)
    cin, cout = w_np.shape[0], w_np.shape[1]
    p_out = 2 * p_in
    rout = p_out * p_out * cout
    wpk = np.zeros((rout, 4 * kin_rows_pad), np.float32)
    contribs = _dim_contribs(p_in)
    for up in range(p_out):
        for (rw, dr, kh) in contribs[up]:
            for vp in range(p_out):
                for (cw, dc, kw) in contribs[vp]:
                    sh = dr * 2 + dc
                    po = up * p_out + vp
                    pi = rw * p_in + cw
                    r0 = po * cout
                    c0 = sh * kin_rows_pad + pi * cin
                    wpk[r0:r0 + cout, c0:c0 + cin] += w_np[:, :, kh, kw].T
    bias = np.tile(b_np, p_out * p_out).reshape(rout, 1)
    return jnp.asarray(wpk, jnp.bfloat16), jnp.asarray(bias, jnp.float32)


def pack_params(raw_params):
    packed = []
    p_in = 1
    kin_pad = 16                      # input activation rows (3 padded to 16)
    for (w_t, b) in raw_params:
        packed.append(_pack_layer(w_t, b, p_in, kin_pad))
        kin_pad = (2 * p_in) ** 2 * w_t.shape[1]   # rows of this layer's output
        p_in = 2 * p_in
    return packed


def init_raw_params(key):
    ks = jax.random.split(key, 6)
    # PyTorch ConvTranspose2d weight layout: (in_ch, out_ch, kH, kW)
    w0 = 0.1 * jax.random.normal(ks[0], (3, 16, 3, 3), jnp.float32)
    b0 = 0.1 * jax.random.normal(ks[1], (16,), jnp.float32)
    w1 = 0.1 * jax.random.normal(ks[2], (16, 32, 3, 3), jnp.float32)
    b1 = 0.1 * jax.random.normal(ks[3], (32,), jnp.float32)
    w2 = 0.1 * jax.random.normal(ks[4], (32, 3, 3, 3), jnp.float32)
    b2 = 0.1 * jax.random.normal(ks[5], (3,), jnp.float32)
    return [(w0, b0), (w1, b1), (w2, b2)]


# ---------------------------------------------------------------------------
# Fused kernel: the whole 3-layer forward in one invocation.
#   x_ref : (16,  n_in)  bf16   input (phase-stacked, 1 phase, padded rows)
#   wN/bN : packed per-layer weight (bf16) / bias (f32)
#   o_ref : (192, n_out) f32    64 phases x 3 channels, base grid on lanes
#   a1/a2 : VMEM scratch, bf16 inter-layer activations (never touch HBM)
# ---------------------------------------------------------------------------
def _fused_kernel(x_ref, w1_ref, b1_ref, w2_ref, b2_ref, w3_ref, b3_ref,
                  o_ref, a1_ref, a2_ref, *, base_w, n_out, n_pad):
    shifts = (0, 1, base_w, base_w + 1)     # base-grid shifts (0,0)(0,1)(1,0)(1,1)

    def layer(src_ref, w_ref, b_ref, split_k):
        kin = src_ref.shape[0]
        if split_k:
            # 4 dots with K = kin (already large); avoids one huge K-stacked value.
            acc = None
            for j, sh in enumerate(shifts):
                part = jnp.dot(w_ref[:, pl.ds(j * kin, kin)],
                               src_ref[:, pl.ds(sh, n_out)],
                               preferred_element_type=jnp.float32)
                acc = part if acc is None else acc + part
        else:
            # One matmul with the 4 shifted views stacked along K.
            xs = jnp.concatenate(
                [src_ref[:, pl.ds(sh, n_out)] for sh in shifts], axis=0)
            acc = jnp.dot(w_ref[...], xs, preferred_element_type=jnp.float32)
        return jnp.maximum(acc + b_ref[...], 0.0)

    # Zero the shift-halo lanes of the VMEM-resident intermediates once so the
    # (discarded) boundary-phase outputs stay finite.
    a1_ref[:, pl.ds(n_out, n_pad)] = jnp.zeros(
        (a1_ref.shape[0], n_pad), a1_ref.dtype)
    a2_ref[:, pl.ds(n_out, n_pad)] = jnp.zeros(
        (a2_ref.shape[0], n_pad), a2_ref.dtype)

    a1_ref[:, pl.ds(0, n_out)] = layer(
        x_ref, w1_ref, b1_ref, split_k=False).astype(a1_ref.dtype)
    a2_ref[:, pl.ds(0, n_out)] = layer(
        a1_ref, w2_ref, b2_ref, split_k=False).astype(a2_ref.dtype)
    o_ref[...] = layer(a2_ref, w3_ref, b3_ref, split_k=True)


def model_forward(x_nchw, packed_params):
    (w1, b1), (w2, b2), (w3, b3) = packed_params
    _, c0, h0, w0 = x_nchw.shape
    s0 = h0 * w0
    n_out = _round_up(s0, 128)                  # lane-dense matmul width
    n_pad = _round_up(w0 + 1, 128)              # halo for the +1 / +W / +W+1 shifts
    n_in = n_out + n_pad
    kin0 = w1.shape[1] // 4                     # padded rows of the input act.
    r1, r2, r3 = w1.shape[0], w2.shape[0], w3.shape[0]
    assert w0 + 1 <= n_pad

    x = x_nchw[0].reshape(c0, s0)
    x = jnp.pad(x, ((0, kin0 - c0), (0, n_in - s0))).astype(jnp.bfloat16)

    y = pl.pallas_call(
        functools.partial(_fused_kernel, base_w=w0, n_out=n_out, n_pad=n_pad),
        out_shape=jax.ShapeDtypeStruct((r3, n_out), jnp.float32),
        grid=(1,),
        in_specs=[
            pl.BlockSpec((kin0, n_in), lambda i: (0, 0)),
            pl.BlockSpec(w1.shape, lambda i: (0, 0)),
            pl.BlockSpec(b1.shape, lambda i: (0, 0)),
            pl.BlockSpec(w2.shape, lambda i: (0, 0)),
            pl.BlockSpec(b2.shape, lambda i: (0, 0)),
            pl.BlockSpec(w3.shape, lambda i: (0, 0)),
            pl.BlockSpec(b3.shape, lambda i: (0, 0)),
        ],
        out_specs=pl.BlockSpec((r3, n_out), lambda i: (0, 0)),
        scratch_shapes=[
            pltpu.VMEM((r1, n_in), jnp.bfloat16),
            pltpu.VMEM((r2, n_in), jnp.bfloat16),
        ],
        compiler_params=pltpu.CompilerParams(
            dimension_semantics=("arbitrary",)),
    )(x, w1, b1, w2, b2, w3, b3)

    # Single final 64-phase (8x8) sub-pixel interleave: pure layout, one XLA op.
    cout = r3 // 64
    ph = y[:, :s0].reshape(8, 8, cout, h0, w0)
    out = jnp.transpose(ph, (2, 3, 0, 4, 1)).reshape(cout, 8 * h0, 8 * w0)
    return out[:, : 8 * h0 - 7, : 8 * w0 - 7]   # CHW, matches squeeze(v3, dim=0)


# ---------------------------------------------------------------------------
# Pure-JAX reference (direct PyTorch ConvTranspose2d semantics), for checking.
# ---------------------------------------------------------------------------
def _conv_transpose_relu_ref(x, w, b):
    cin, h, wd = x.shape
    cout = w.shape[1]
    ho, wo = 2 * h - 1, 2 * wd - 1
    y = jnp.zeros((cout, ho + 2, wo + 2), jnp.float32)
    for kh in range(3):
        for kw in range(3):
            contrib = jnp.einsum("io,ihw->ohw", w[:, :, kh, kw], x)
            y = y.at[:, kh:kh + 2 * h:2, kw:kw + 2 * wd:2].add(contrib)
    y = y[:, 1:1 + ho, 1:1 + wo] + b[:, None, None]
    return jnp.maximum(y, 0.0)


def reference_forward(x_nchw, raw_params):
    a = x_nchw[0]
    for w, b in raw_params:
        a = _conv_transpose_relu_ref(a, w, b)
    return a


if __name__ == "__main__":
    key = jax.random.PRNGKey(0)
    k_x, k_p = jax.random.split(key)

    # Small input consistent with the module's NCHW (1, 3, H, W) structure.
    x = jax.random.normal(k_x, (1, 3, 16, 8), jnp.float32)
    raw_params = init_raw_params(k_p)
    packed_params = pack_params(raw_params)

    out = jax.jit(model_forward)(x, packed_params)
    out = jax.block_until_ready(out)

    # Expected: (3, 2*(2*(2*16-1)-1)-1, 2*(2*(2*8-1)-1)-1) = (3, 121, 57)
    assert out.shape == (3, 121, 57), out.shape
    assert out.dtype == jnp.float32

    ref = reference_forward(x, raw_params)
    np.testing.assert_allclose(np.asarray(out), np.asarray(ref),
                               atol=5e-2, rtol=5e-2)
    print("KERNEL_OK")
</pallas_src>

<mosaic_0001>
module attributes {stable_mosaic.version = 11 : i64} {
  func.func @_fused_kernel(%arg0: i32, %arg1: memref<16x256xbf16, #tpu.memory_space<vmem>>, %arg2: memref<64x64xbf16, #tpu.memory_space<vmem>>, %arg3: memref<64x1xf32, #tpu.memory_space<vmem>>, %arg4: memref<512x256xbf16, #tpu.memory_space<vmem>>, %arg5: memref<512x1xf32, #tpu.memory_space<vmem>>, %arg6: memref<192x2048xbf16, #tpu.memory_space<vmem>>, %arg7: memref<192x1xf32, #tpu.memory_space<vmem>>, %arg8: memref<192x128xf32, #tpu.memory_space<vmem>>, %arg9: memref<64x256xbf16, #tpu.memory_space<vmem>>, %arg10: memref<512x256xbf16, #tpu.memory_space<vmem>>) attributes {dimension_semantics = [#tpu.dimension_semantics<arbitrary>], iteration_bounds = array<i64: 1>, scalar_prefetch = 0 : i64, scratch_operands = 2 : i64, tpu.core_type = #tpu.core_type<tc>, window_params = [{pipeline_mode = #tpu.pipeline_mode<synchronous>, transform_indices = @transform_0, window_bounds = array<i64: 16, 256>}, {pipeline_mode = #tpu.pipeline_mode<synchronous>, transform_indices = @transform_1, window_bounds = array<i64: 64, 64>}, {pipeline_mode = #tpu.pipeline_mode<synchronous>, transform_indices = @transform_2, window_bounds = array<i64: 64, 1>}, {pipeline_mode = #tpu.pipeline_mode<synchronous>, transform_indices = @transform_3, window_bounds = array<i64: 512, 256>}, {pipeline_mode = #tpu.pipeline_mode<synchronous>, transform_indices = @transform_4, window_bounds = array<i64: 512, 1>}, {pipeline_mode = #tpu.pipeline_mode<synchronous>, transform_indices = @transform_5, window_bounds = array<i64: 192, 2048>}, {pipeline_mode = #tpu.pipeline_mode<synchronous>, transform_indices = @transform_6, window_bounds = array<i64: 192, 1>}, {pipeline_mode = #tpu.pipeline_mode<synchronous>, transform_indices = @transform_7, window_bounds = array<i64: 192, 128>}]} {
    %cst = arith.constant 0.000000e+00 : bf16
    %0 = vector.broadcast %cst : bf16 to vector<64x128xbf16>
    %c0 = arith.constant 0 : index
    %c128 = arith.constant 128 : index
    %1 = vector.load %arg9[%c0, %c128] : memref<64x256xbf16, #tpu.memory_space<vmem>>, vector<64x128xbf16>
    tpu.vector_store %arg9[%c0, %c128], %0 {strides = array<i32>} : memref<64x256xbf16, #tpu.memory_space<vmem>>, vector<64x128xbf16>,
    %cst_0 = arith.constant 0.000000e+00 : bf16
    %2 = vector.broadcast %cst_0 : bf16 to vector<512x128xbf16>
    %c0_1 = arith.constant 0 : index
    %c128_2 = arith.constant 128 : index
    %3 = vector.load %arg10[%c0_1, %c128_2] : memref<512x256xbf16, #tpu.memory_space<vmem>>, vector<512x128xbf16>
    tpu.vector_store %arg10[%c0_1, %c128_2], %2 {strides = array<i32>} : memref<512x256xbf16, #tpu.memory_space<vmem>>, vector<512x128xbf16>,
    %c0_3 = arith.constant 0 : index
    %c0_4 = arith.constant 0 : index
    %4 = vector.load %arg1[%c0_3, %c0_4] : memref<16x256xbf16, #tpu.memory_space<vmem>>, vector<16x128xbf16>
    %c0_5 = arith.constant 0 : index
    %c1 = arith.constant 1 : index
    %5 = vector.load %arg1[%c0_5, %c1] : memref<16x256xbf16, #tpu.memory_space<vmem>>, vector<16x128xbf16>
    %c0_6 = arith.constant 0 : index
    %c8 = arith.constant 8 : index
    %6 = vector.load %arg1[%c0_6, %c8] : memref<16x256xbf16, #tpu.memory_space<vmem>>, vector<16x128xbf16>
    %c0_7 = arith.constant 0 : index
    %c9 = arith.constant 9 : index
    %7 = vector.load %arg1[%c0_7, %c9] : memref<16x256xbf16, #tpu.memory_space<vmem>>, vector<16x128xbf16>
    %8 = tpu.concatenate %4, %5, %6, %7 in 0 : vector<16x128xbf16>, vector<16x128xbf16>, vector<16x128xbf16>, vector<16x128xbf16> -> vector<64x128xbf16>
    %c0_8 = arith.constant 0 : index
    %c0_9 = arith.constant 0 : index
    %9 = vector.load %arg2[%c0_8, %c0_9] : memref<64x64xbf16, #tpu.memory_space<vmem>>, vector<64x64xbf16>
    %cst_10 = arith.constant dense<0.000000e+00> : vector<64x128xf32>
    %10 = tpu.matmul %9, %8, %cst_10 {dimension_numbers = #tpu.dot_dimension_numbers<[1], [0], [0], [1], [0, 0, 1, 1], [], []>} : vector<64x64xbf16>, vector<64x128xbf16>, vector<64x128xf32> -> vector<64x128xf32>
    %c0_11 = arith.constant 0 : index
    %c0_12 = arith.constant 0 : index
    %11 = vector.load %arg3[%c0_11, %c0_12] : memref<64x1xf32, #tpu.memory_space<vmem>>, vector<64x1xf32>
    %12 = vector.broadcast %11 : vector<64x1xf32> to vector<64x128xf32>
    %13 = arith.addf %10, %12 : vector<64x128xf32>
    %cst_13 = arith.constant 0.000000e+00 : f32
    %14 = vector.broadcast %cst_13 : f32 to vector<64x128xf32>
    %15 = arith.maximumf %13, %14 : vector<64x128xf32>
    %16 = arith.truncf %15 : vector<64x128xf32> to vector<64x128xbf16>
    %c0_14 = arith.constant 0 : index
    %c0_15 = arith.constant 0 : index
    %17 = vector.load %arg9[%c0_14, %c0_15] : memref<64x256xbf16, #tpu.memory_space<vmem>>, vector<64x128xbf16>
    tpu.vector_store %arg9[%c0_14, %c0_15], %16 {strides = array<i32>} : memref<64x256xbf16, #tpu.memory_space<vmem>>, vector<64x128xbf16>,
    %c0_16 = arith.constant 0 : index
    %c0_17 = arith.constant 0 : index
    %18 = vector.load %arg9[%c0_16, %c0_17] : memref<64x256xbf16, #tpu.memory_space<vmem>>, vector<64x128xbf16>
    %c0_18 = arith.constant 0 : index
    %c1_19 = arith.constant 1 : index
    %19 = vector.load %arg9[%c0_18, %c1_19] : memref<64x256xbf16, #tpu.memory_space<vmem>>, vector<64x128xbf16>
    %c0_20 = arith.constant 0 : index
    %c8_21 = arith.constant 8 : index
    %20 = vector.load %arg9[%c0_20, %c8_21] : memref<64x256xbf16, #tpu.memory_space<vmem>>, vector<64x128xbf16>
    %c0_22 = arith.constant 0 : index
    %c9_23 = arith.constant 9 : index
    %21 = vector.load %arg9[%c0_22, %c9_23] : memref<64x256xbf16, #tpu.memory_space<vmem>>, vector<64x128xbf16>
    %22 = tpu.concatenate %18, %19, %20, %21 in 0 : vector<64x128xbf16>, vector<64x128xbf16>, vector<64x128xbf16>, vector<64x128xbf16> -> vector<256x128xbf16>
    %c0_24 = arith.constant 0 : index
    %c0_25 = arith.constant 0 : index
    %23 = vector.load %arg4[%c0_24, %c0_25] : memref<512x256xbf16, #tpu.memory_space<vmem>>, vector<512x256xbf16>
    %cst_26 = arith.constant dense<0.000000e+00> : vector<512x128xf32>
    %24 = tpu.matmul %23, %22, %cst_26 {dimension_numbers = #tpu.dot_dimension_numbers<[1], [0], [0], [1], [0, 0, 1, 1], [], []>} : vector<512x256xbf16>, vector<256x128xbf16>, vector<512x128xf32> -> vector<512x128xf32>
    %c0_27 = arith.constant 0 : index
    %c0_28 = arith.constant 0 : index
    %25 = vector.load %arg5[%c0_27, %c0_28] : memref<512x1xf32, #tpu.memory_space<vmem>>, vector<512x1xf32>
    %26 = vector.broadcast %25 : vector<512x1xf32> to vector<512x128xf32>
    %27 = arith.addf %24, %26 : vector<512x128xf32>
    %cst_29 = arith.constant 0.000000e+00 : f32
    %28 = vector.broadcast %cst_29 : f32 to vector<512x128xf32>
    %29 = arith.maximumf %27, %28 : vector<512x128xf32>
    %30 = arith.truncf %29 : vector<512x128xf32> to vector<512x128xbf16>
    %c0_30 = arith.constant 0 : index
    %c0_31 = arith.constant 0 : index
    %31 = vector.load %arg10[%c0_30, %c0_31] : memref<512x256xbf16, #tpu.memory_space<vmem>>, vector<512x128xbf16>
    tpu.vector_store %arg10[%c0_30, %c0_31], %30 {strides = array<i32>} : memref<512x256xbf16, #tpu.memory_space<vmem>>, vector<512x128xbf16>,
    %c0_32 = arith.constant 0 : index
    %c0_33 = arith.constant 0 : index
    %32 = vector.load %arg6[%c0_32, %c0_33] : memref<192x2048xbf16, #tpu.memory_space<vmem>>, vector<192x512xbf16>
    %c0_34 = arith.constant 0 : index
    %c0_35 = arith.constant 0 : index
    %33 = vector.load %arg10[%c0_34, %c0_35] : memref<512x256xbf16, #tpu.memory_space<vmem>>, vector<512x128xbf16>
    %cst_36 = arith.constant dense<0.000000e+00> : vector<192x128xf32>
    %34 = tpu.matmul %32, %33, %cst_36 {dimension_numbers = #tpu.dot_dimension_numbers<[1], [0], [0], [1], [0, 0, 1, 1], [], []>} : vector<192x512xbf16>, vector<512x128xbf16>, vector<192x128xf32> -> vector<192x128xf32>
    %c0_37 = arith.constant 0 : index
    %c512 = arith.constant 512 : index
    %35 = vector.load %arg6[%c0_37, %c512] : memref<192x2048xbf16, #tpu.memory_space<vmem>>, vector<192x512xbf16>
    %c0_38 = arith.constant 0 : index
    %c1_39 = arith.constant 1 : index
    %36 = vector.load %arg10[%c0_38, %c1_39] : memref<512x256xbf16, #tpu.memory_space<vmem>>, vector<512x128xbf16>
    %cst_40 = arith.constant dense<0.000000e+00> : vector<192x128xf32>
    %37 = tpu.matmul %35, %36, %cst_40 {dimension_numbers = #tpu.dot_dimension_numbers<[1], [0], [0], [1], [0, 0, 1, 1], [], []>} : vector<192x512xbf16>, vector<512x128xbf16>, vector<192x128xf32> -> vector<192x128xf32>
    %38 = arith.addf %34, %37 : vector<192x128xf32>
    %c0_41 = arith.constant 0 : index
    %c1024 = arith.constant 1024 : index
    %39 = vector.load %arg6[%c0_41, %c1024] : memref<192x2048xbf16, #tpu.memory_space<vmem>>, vector<192x512xbf16>
    %c0_42 = arith.constant 0 : index
    %c8_43 = arith.constant 8 : index
    %40 = vector.load %arg10[%c0_42, %c8_43] : memref<512x256xbf16, #tpu.memory_space<vmem>>, vector<512x128xbf16>
    %cst_44 = arith.constant dense<0.000000e+00> : vector<192x128xf32>
    %41 = tpu.matmul %39, %40, %cst_44 {dimension_numbers = #tpu.dot_dimension_numbers<[1], [0], [0], [1], [0, 0, 1, 1], [], []>} : vector<192x512xbf16>, vector<512x128xbf16>, vector<192x128xf32> -> vector<192x128xf32>
    %42 = arith.addf %38, %41 : vector<192x128xf32>
    %c0_45 = arith.constant 0 : index
    %c1536 = arith.constant 1536 : index
    %43 = vector.load %arg6[%c0_45, %c1536] : memref<192x2048xbf16, #tpu.memory_space<vmem>>, vector<192x512xbf16>
    %c0_46 = arith.constant 0 : index
    %c9_47 = arith.constant 9 : index
    %44 = vector.load %arg10[%c0_46, %c9_47] : memref<512x256xbf16, #tpu.memory_space<vmem>>, vector<512x128xbf16>
    %cst_48 = arith.constant dense<0.000000e+00> : vector<192x128xf32>
    %45 = tpu.matmul %43, %44, %cst_48 {dimension_numbers = #tpu.dot_dimension_numbers<[1], [0], [0], [1], [0, 0, 1, 1], [], []>} : vector<192x512xbf16>, vector<512x128xbf16>, vector<192x128xf32> -> vector<192x128xf32>
    %46 = arith.addf %42, %45 : vector<192x128xf32>
    %c0_49 = arith.constant 0 : index
    %c0_50 = arith.constant 0 : index
    %47 = vector.load %arg7[%c0_49, %c0_50] : memref<192x1xf32, #tpu.memory_space<vmem>>, vector<192x1xf32>
    %48 = vector.broadcast %47 : vector<192x1xf32> to vector<192x128xf32>
    %49 = arith.addf %46, %48 : vector<192x128xf32>
    %cst_51 = arith.constant 0.000000e+00 : f32
    %50 = vector.broadcast %cst_51 : f32 to vector<192x128xf32>
    %51 = arith.maximumf %49, %50 : vector<192x128xf32>
    %c0_52 = arith.constant 0 : index
    %c0_53 = arith.constant 0 : index
    %52 = vector.load %arg8[%c0_52, %c0_53] : memref<192x128xf32, #tpu.memory_space<vmem>>, vector<192x128xf32>
    tpu.vector_store %arg8[%c0_52, %c0_53], %51 {strides = array<i32>} : memref<192x128xf32, #tpu.memory_space<vmem>>, vector<192x128xf32>,
    return
  }
  func.func @transform_0(%arg0: i32) -> (i32, i32) {
    %c0_i32 = arith.constant 0 : i32
    %c0_i32_0 = arith.constant 0 : i32
    %c0_i32_1 = arith.constant 0 : i32
    return %c0_i32, %c0_i32_0 : i32, i32
  }
  func.func @transform_1(%arg0: i32) -> (i32, i32) {
    %c0_i32 = arith.constant 0 : i32
    %c0_i32_0 = arith.constant 0 : i32
    %c0_i32_1 = arith.constant 0 : i32
    return %c0_i32, %c0_i32_0 : i32, i32
  }
  func.func @transform_2(%arg0: i32) -> (i32, i32) {
    %c0_i32 = arith.constant 0 : i32
    %c0_i32_0 = arith.constant 0 : i32
    %c0_i32_1 = arith.constant 0 : i32
    return %c0_i32, %c0_i32_0 : i32, i32
  }
  func.func @transform_3(%arg0: i32) -> (i32, i32) {
    %c0_i32 = arith.constant 0 : i32
    %c0_i32_0 = arith.constant 0 : i32
    %c0_i32_1 = arith.constant 0 : i32
    return %c0_i32, %c0_i32_0 : i32, i32
  }
  func.func @transform_4(%arg0: i32) -> (i32, i32) {
    %c0_i32 = arith.constant 0 : i32
    %c0_i32_0 = arith.constant 0 : i32
    %c0_i32_1 = arith.constant 0 : i32
    return %c0_i32, %c0_i32_0 : i32, i32
  }
  func.func @transform_5(%arg0: i32) -> (i32, i32) {
    %c0_i32 = arith.constant 0 : i32
    %c0_i32_0 = arith.constant 0 : i32
    %c0_i32_1 = arith.constant 0 : i32
    return %c0_i32, %c0_i32_0 : i32, i32
  }
  func.func @transform_6(%arg0: i32) -> (i32, i32) {
    %c0_i32 = arith.constant 0 : i32
    %c0_i32_0 = arith.constant 0 : i32
    %c0_i32_1 = arith.constant 0 : i32
    return %c0_i32, %c0_i32_0 : i32, i32
  }
  func.func @transform_7(%arg0: i32) -> (i32, i32) {
    %c0_i32 = arith.constant 0 : i32
    %c0_i32_0 = arith.constant 0 : i32
    %c0_i32_1 = arith.constant 0 : i32
    return %c0_i32, %c0_i32_0 : i32, i32
  }
}

</mosaic_0001>

<bundles_post_ra>
// kernel: squeeze.0
= control target key start
LH: loop header
LB: loop body
LE: loop exit
PB: predicated region body
PF: predicated region fallthrough
CT: control target
= control target key end

     0   :  { %s129_s12 = smov 3  ;;  %vm102_vm0 = vcmask 1042434   ;;  %s118_s13 = smov 3  ;;  %vm104_vm1 = vcmask 64512   ;;  %vm115_vm2 = vcmask 1048512   ;;  %vm126_vm3 = vcmask 982912   ;;  %s374_s0 = inlined_call_operand.vmem [shape: bf16[1,3,16,8], index: 0, kind: input, shape index: {}]   ;;  %s375_s1 = inlined_call_operand.vmem [shape: bf16[3,128], index: 1, kind: output, shape index: {}]  }
   0x1   :  { %v302_v0 = vld [vmem:[%s374_s0 + $0x10] sm:$0xff]   ;;  %v303_v1 = vld [vmem:[%s374_s0 + $0x8] sm:$0xff]   ;;  %v299_v2 = vld [vmem:[%s374_s0] sm:$0xff]   ;;  %s107_s0 = smov 3  ;;  %s140_s14 = smov 3  ;;  %vm137_vm4 = vcmask 917312  }
   0x2   :  { %v293_v3 = vunpack.c.h.bf16 %v302_v0  ;;  %v297_v4 = vunpack.c.h.bf16 %v303_v1  ;;  %v301_v5 = vunpack.c.h.bf16 %v299_v2  ;;  %v292_v6 = vunpack.c.l.bf16 %v302_v0  ;;  %s151_s15 = smov 3  ;;  %s320_s16 = smov 120  }
   0x3   :  { %v296_v7 = vunpack.c.l.bf16 %v303_v1  ;;  %v300_v8 = vunpack.c.l.bf16 %v299_v2  ;;  %s162_s17 = smov 3  ;;  %s321_s18 = smov 104   ;;  %vm148_vm5 = vcmask 851712   ;;  %vm159_vm6 = vcmask 786112  }
   0x4   :  { %21 = vst [vmem:[#allocation1 + $0x28] sm:$0xff] %v293_v3  ;;  %53 = vst [vmem:[#allocation1 + $0x18] sm:$0xff] %v297_v4  ;;  %s173_s19 = smov 3  ;;  %s322_s20 = smov 112   ;;  %vm170_vm7 = vcmask 720512   ;;  %vm181_vm8 = vcmask 654912  }
   0x5   :  { %84 = vst [vmem:[#allocation1 + $0x8] sm:$0xff] %v301_v5  ;;  %37 = vst [vmem:[#allocation1 + $0x20] sm:$0xff] %v292_v6  ;;  %s184_s21 = smov 3  ;;  %s323_s22 = smov 96   ;;  %vm192_vm9 = vcmask 589312   ;;  %vm203_vm10 = vcmask 523712  }
   0x6   :  { %69 = vst [vmem:[#allocation1 + $0x10] sm:$0xff] %v296_v7  ;;  %97 = vst [vmem:[#allocation1] sm:$0xff] %v300_v8  ;;  %s195_s23 = smov 3  ;;  %s324_s24 = smov 88   ;;  %vm214_vm11 = vcmask 458112   ;;  %vm225_vm12 = vcmask 392512  }
   0x7   :  { %s206_s25 = smov 3  ;;  %s325_s26 = smov 80   ;;  %vm236_vm13 = vcmask 326912   ;;  %vm247_vm14 = vcmask 261312   ;;  %vm258_vm15 = vcmask 195712  }
   0x8   :  { %s98_s27 = smov 3  ;;  %s217_s28 = smov 3 }
   0x9   :  { %s326_s29 = smov 72   ;;  %s228_s30 = smov 3 }
   0xa   :  { %s327_s2 = smov 64   ;;  %s239_s3 = smov 3 }
   0xb   :  { %v110_v10 = vld [vmem:[#allocation1 + $0x2d] sm:$0x4]   ;;  %v132_v13 = vld [vmem:[#allocation1 + $0x2b] sm:$0x4]   ;;  %v121_v15 = vld [vmem:[#allocation1 + $0x2c] sm:$0x4]  }
   0xc   :  { %v108_v9 = vld [vmem:[#allocation1 + $0xf] ss:$16 sm:%s107_s0]   ;;  %v130_v11 = vld [vmem:[#allocation1 + $0xd] ss:$16 sm:%s129_s12]   ;;  %v119_v14 = vld [vmem:[#allocation1 + $0xe] ss:$16 sm:%s118_s13]  }
   0xd   :  { %v112_v12 = vsel %vm102_vm0, %v110_v10, %v108_v9  ;;  %v134_v16 = vsel %vm102_vm0, %v132_v13, %v130_v11  ;;  %v141_v17 = vld [vmem:[#allocation1 + $0xc] ss:$16 sm:%s140_s14]   ;;  %v123_v19 = vsel %vm102_vm0, %v121_v15, %v119_v14  ;;  %v152_v21 = vld [vmem:[#allocation1 + $0xb] ss:$16 sm:%s151_s15]   ;;  %v163_v23 = vld [vmem:[#allocation1 + $0xa] ss:$16 sm:%s162_s17]  }
   0xe   :  { %113 = vrot.lane.b32.xlu0 %v112_v12, %s320_s16  ;;  %v143_v18 = vld [vmem:[#allocation1 + $0x2a] sm:$0x4]   ;;  %135 = vrot.lane.b32.xlu1 %v134_v16, %s321_s18  ;;  %v154_v22 = vld [vmem:[#allocation1 + $0x29] sm:$0x4]   ;;  %v165_v24 = vld [vmem:[#allocation1 + $0x28] sm:$0x4]  }
   0xf   :  { %v145_v20 = vsel %vm102_vm0, %v143_v18, %v141_v17  ;;  %v156_v25 = vsel %vm102_vm0, %v154_v22, %v152_v21  ;;  %v167_v26 = vsel %vm102_vm0, %v165_v24, %v163_v23  ;;  %v174_v27 = vld [vmem:[#allocation1 + $0x9] ss:$16 sm:%s173_s19]   ;;  %v185_v29 = vld [vmem:[#allocation1 + $0x8] ss:$16 sm:%s184_s21]   ;;  %v196_v32 = vld [vmem:[#allocation1 + $0x7] ss:$16 sm:%s195_s23]  }
  0x10   :  { %v176_v28 = vld [vmem:[#allocation1 + $0x27] sm:$0x4]   ;;  %v187_v30 = vld [vmem:[#allocation1 + $0x26] sm:$0x4]   ;;  %v198_v34 = vld [vmem:[#allocation1 + $0x25] sm:$0x4]  }
  0x11   :  { %v178_v31 = vsel %vm102_vm0, %v176_v28, %v174_v27  ;;  %v189_v33 = vsel %vm102_vm0, %v187_v30, %v185_v29  ;;  %v99_v35 = vld [vmem:[#allocation1] ss:$16 sm:%s98_s27]   ;;  %v207_v37 = vld [vmem:[#allocation1 + $0x6] ss:$16 sm:%s206_s25]   ;;  %v200_v40 = vsel %vm102_vm0, %v198_v34, %v196_v32  ;;  %v218_v42 = vld [vmem:[#allocation1 + $0x5] ss:$16 sm:%s217_s28]  }
  0x12   :  { %124 = vrot.lane.b32.xlu0 %v123_v19, %s322_s20  ;;  %146 = vrot.lane.b32.xlu1 %v145_v20, %s323_s22  ;;  %v101_v36 = vld [vmem:[#allocation1 + $0x1e] sm:$0x4]   ;;  %v209_v38 = vld [vmem:[#allocation1 + $0x24] sm:$0x4]   ;;  %v220_v43 = vld [vmem:[#allocation1 + $0x23] sm:$0x4]  }
  0x13   :  { %v103_v39 = vsel %vm102_vm0, %v101_v36, %v99_v35  ;;  %v211_v41 = vsel %vm102_vm0, %v209_v38, %v207_v37  ;;  %v229_v44 = vld [vmem:[#allocation1 + $0x4] ss:$16 sm:%s228_s30]   ;;  %s328_s4 = smov 56   ;;  %s250_s5 = smov 3  ;;  %v222_v46 = vsel %vm102_vm0, %v220_v43, %v218_v42  ;;  %v240_v48 = vld [vmem:[#allocation1 + $0x3] ss:$16 sm:%s239_s3]  }
  0x14   :  { %105 = vst.msk [vmem:[#allocation0] sm:$0x7] %vm104_vm1, %v103_v39   ;;  %v231_v45 = vld [vmem:[#allocation1 + $0x22] sm:$0x4]   ;;  %s329_s6 = smov 48   ;;  %s261_s7 = smov 3 }
  0x15   :  { %v233_v47 = vsel %vm102_vm0, %v231_v45, %v229_v44  ;;  %v242_v49 = vld [vmem:[#allocation1 + $0x21] sm:$0x4]   ;;  %v251_v50 = vld [vmem:[#allocation1 + $0x2] ss:$16 sm:%s250_s5]   ;;  %s330_s8 = smov 40   ;;  %s331_s9 = smov 32  }
  0x16   :  { %157 = vrot.lane.b32.xlu0 %v156_v25, %s324_s24  ;;  %168 = vrot.lane.b32.xlu1 %v167_v26, %s325_s26  ;;  %v253_v51 = vld [vmem:[#allocation1 + $0x20] sm:$0x4]   ;;  %v244_v52 = vsel %vm102_vm0, %v242_v49, %v240_v48  ;;  %v262_v54 = vld [vmem:[#allocation1 + $0x1] ss:$16 sm:%s261_s7]   ;;  %s332_s10 = smov 24   ;;  %s333_s11 = smov 16  }
  0x17   :  { %v255_v53 = vsel %vm102_vm0, %v253_v51, %v251_v50  ;;  %v264_v55 = vld [vmem:[#allocation1 + $0x1f] sm:$0x4]   ;;  %s334_s0 = smov 8   ;;  %v335_v9 = vmov 0.0  }
  0x18   :  { %v266_v56 = vsel %vm102_vm0, %v264_v55, %v262_v54  ;;  %vm269_vm0 = vcmask 130112  }
  0x1a   :  { %179 = vrot.lane.b32.xlu0 %v178_v31, %s326_s29  ;;  %190 = vrot.lane.b32.xlu1 %v189_v33, %s327_s2 }
  0x1e   :  { %201 = vrot.lane.b32.xlu0 %v200_v40, %s328_s4  ;;  %212 = vrot.lane.b32.xlu1 %v211_v41, %s329_s6 }
  0x22   :  { %223 = vrot.lane.b32.xlu0 %v222_v46, %s330_s8  ;;  %234 = vrot.lane.b32.xlu1 %v233_v47, %s331_s9 }
  0x26   :  { %245 = vrot.lane.b32.xlu0 %v244_v52, %s332_s10  ;;  %256 = vrot.lane.b32.xlu1 %v255_v53, %s333_s11 }
  0x2a   :  { %267 = vrot.lane.b32.xlu0 %v266_v56, %s334_s0 }
  0x80   :  { %v114_v57 = vpop.permute.xlu0 %113   ;;  %v136_v58 = vpop.permute.xlu1 %135  }
  0x81   :  { %116 = vst.msk [vmem:[#allocation0] sm:$0x7] %vm115_vm2, %v114_v57  }
  0x84   :  { %v125_v59 = vpop.permute.xlu0 %124   ;;  %v147_v60 = vpop.permute.xlu1 %146  }
  0x85   :  { %127 = vst.msk [vmem:[#allocation0] sm:$0x7] %vm126_vm3, %v125_v59  }
  0x86   :  { %138 = vst.msk [vmem:[#allocation0] sm:$0x7] %vm137_vm4, %v136_v58  }
  0x87   :  { %149 = vst.msk [vmem:[#allocation0] sm:$0x7] %vm148_vm5, %v147_v60  }
  0x88   :  { %v158_v61 = vpop.permute.xlu0 %157   ;;  %v169_v62 = vpop.permute.xlu1 %168  }
  0x89   :  { %160 = vst.msk [vmem:[#allocation0] sm:$0x7] %vm159_vm6, %v158_v61  }
  0x8a   :  { %171 = vst.msk [vmem:[#allocation0] sm:$0x7] %vm170_vm7, %v169_v62  }
  0x8c   :  { %v180_v63 = vpop.permute.xlu0 %179   ;;  %v191_v0 = vpop.permute.xlu1 %190  }
  0x8d   :  { %182 = vst.msk [vmem:[#allocation0] sm:$0x7] %vm181_vm8, %v180_v63  }
  0x8e   :  { %193 = vst.msk [vmem:[#allocation0] sm:$0x7] %vm192_vm9, %v191_v0  }
  0x90   :  { %v202_v1 = vpop.permute.xlu0 %201   ;;  %v213_v2 = vpop.permute.xlu1 %212  }
  0x91   :  { %204 = vst.msk [vmem:[#allocation0] sm:$0x7] %vm203_vm10, %v202_v1  }
  0x92   :  { %215 = vst.msk [vmem:[#allocation0] sm:$0x7] %vm214_vm11, %v213_v2  }
  0x94   :  { %v224_v3 = vpop.permute.xlu0 %223   ;;  %v235_v4 = vpop.permute.xlu1 %234  }
  0x95   :  { %226 = vst.msk [vmem:[#allocation0] sm:$0x7] %vm225_vm12, %v224_v3  }
  0x96   :  { %237 = vst.msk [vmem:[#allocation0] sm:$0x7] %vm236_vm13, %v235_v4  }
  0x98   :  { %v246_v5 = vpop.permute.xlu0 %245   ;;  %v257_v6 = vpop.permute.xlu1 %256  }
  0x99   :  { %248 = vst.msk [vmem:[#allocation0] sm:$0x7] %vm247_vm14, %v246_v5  }
  0x9a   :  { %259 = vst.msk [vmem:[#allocation0] sm:$0x7] %vm258_vm15, %v257_v6  }
  0x9c   :  { %v268_v7 = vpop.permute.xlu0 %267  }
  0x9d   :  { %270 = vst.msk [vmem:[#allocation0] sm:$0x7] %vm269_vm0, %v268_v7  }
  0xa4   :  { %v276_v8 = vld [vmem:[#allocation0] sm:$0xf] }
  0xa5   :  { %v277_v10 = vpack.c.bf16 %v335_v9, %v276_v8 }
  0xa7   :  { %280 = vst [vmem:[%s375_s1] sm:$0x3] %v277_v10 }

// kernel: model_forward.1
= control target key start
LH: loop header
LB: loop body
LE: loop exit
PB: predicated region body
PF: predicated region fallthrough
CT: control target
= control target key end

     0   :  { %12 = vsyncpa [#allocation5], 0  ;;  %s9607_s0 = inlined_call_operand.vmem [shape: bf16[16,256], index: 0, kind: input, shape index: {}]   ;;  %s9608_s1 = inlined_call_operand.hbm [shape: bf16[64,64], index: 1, kind: input, shape index: {}]   ;;  %s9609_s2 = inlined_call_operand.vmem [shape: f32[64,1], index: 2, kind: input, shape index: {}]   ;;  %s9610_s3 = inlined_call_operand.hbm [shape: bf16[512,256], index: 3, kind: input, shape index: {}]   ;;  %s9611_s4 = inlined_call_operand.vmem [shape: f32[512,1], index: 4, kind: input, shape index: {}]   ;;  %s9612_s5 = inlined_call_operand.hbm [shape: bf16[192,2048], index: 5, kind: input, shape index: {}]   ;;  %s9613_s6 = inlined_call_operand.vmem [shape: f32[192,1], index: 6, kind: input, shape index: {}]   ;;  %s9614_s7 = inlined_call_operand.vmem [shape: f32[192,128], index: 7, kind: output, shape index: {}]  }
   0x1   :  { %13 = vsyncpa [#allocation7], 0  ;;  %s7223_s24 = smov [#allocation6]  }
   0x2   :  { %s35_s25 = sshll.u32 %s7223_s24, 4  ;;  %s36_s25 = int_to_ptr.vmem [resolvable:$true] %s35_s25 }
   0x3   :  { %s7167_s26 = scalar_lea.vmem %s36_s25, 8192  ;;  %p7172_p1 = scmp.lt.s32.totalorder %s36_s25, %s36_s25 }
   0x4   :  { %p7168_p0 = scmp.ne.s32.totalorder %s36_s25, %s7167_s26  ;;  %p7173_p2 = scmp.lt.s32.totalorder %s7167_s26, %s7167_s26 }
   0x6   :  { %p7174_p3 = por %p7173_p2, %p7172_p1 }
   0x8   :  { %p7175_p4 = pnand %p7174_p3, %p7168_p0 }
   0xa   :  { %7178 = shalt.err (!%p7175_p4)
}
   0xb   :  { %s7224_s27 = smov 128   ;;  %s7225_s28 = smov 8  }
   0xc   :  { %41 = dma.hbm_to_vmem [thread:$0]  %s9610_s3, 8192, %s36_s25, [#allocation7], %s7224_s27, %s7224_s27, %s7225_s28  }
   0xd   :  { %s7226_s8 = smov [#allocation4]  }
   0xe   :  { %s21_s9 = sshll.u32 %s7226_s8, 4  ;;  %s22_s9 = int_to_ptr.vmem [resolvable:$true] %s21_s9 }
   0xf   :  { %s7187_s10 = scalar_lea.vmem %s22_s9, 512  ;;  %p7192_p6 = scmp.lt.s32.totalorder %s22_s9, %s22_s9 }
  0x10   :  { %p7188_p5 = scmp.ne.s32.totalorder %s22_s9, %s7187_s10  ;;  %p7193_p7 = scmp.lt.s32.totalorder %s7187_s10, %s7187_s10 }
  0x12   :  { %p7194_p8 = por %p7193_p7, %p7192_p6 }
  0x14   :  { %p7195_p9 = pnand %p7194_p8, %p7188_p5 }
  0x16   :  { %7198 = shalt.err (!%p7195_p9)
}
  0x17   :  { %s7227_s11 = smov 64   ;;  %s7228_s12 = smov 4  }
  0x18   :  { %27 = dma.hbm_to_vmem [thread:$0]  %s9608_s1, 512, %s22_s9, [#allocation5], %s7227_s11, %s7227_s11, %s7228_s12  }
  0x19   :  { %s7229_s15 = smov [#allocation8]  }
  0x1a   :  { %s49_s16 = sshll.u32 %s7229_s15, 4  ;;  %s50_s16 = int_to_ptr.vmem [resolvable:$true] %s49_s16 }
  0x1b   :  { %s7207_s3 = scalar_lea.vmem %s50_s16, 24576  ;;  %p7212_p11 = scmp.lt.s32.totalorder %s50_s16, %s50_s16 }
  0x1c   :  { %p7208_p10 = scmp.ne.s32.totalorder %s50_s16, %s7207_s3  ;;  %p7213_p12 = scmp.lt.s32.totalorder %s7207_s3, %s7207_s3 }
  0x1e   :  { %p7214_p13 = por %p7213_p12, %p7212_p11 }
  0x20   :  { %p7215_p0 = pnand %p7214_p13, %p7208_p10 }
  0x22   :  { %7218 = shalt.err (!%p7215_p0)
}
  0x23   :  { %s7230_s17 = smov 1024  }
  0x24   :  { %55 = dma.hbm_to_vmem [thread:$0]  %s9612_s5, 24576, %s50_s16, [#allocation7], %s7230_s17, %s7230_s17, %s7227_s11  }
  0x25   :  { %7219 = dma.done.wait [#allocation5], 512  }
  0x26   :  { %7220 = vsyncadd [#allocation5], 4294966784 }
  0x27   :  { %7221 = dma.done.wait [#allocation7], 32768  }
  0x28   :  { %7222 = vsyncadd [#allocation7], 4294934528  ;;  %v6849_v0 = vld [vmem:[%s9607_s0] ss:$8 sps:$4 sm:$0xff]   ;;  %v6851_v1 = vld [vmem:[%s9607_s0 + $0x4] ss:$8 sps:$4 sm:$0xff]  }
  0x29   :  { %s7231_s23 = smov 120   ;;  %s7232_s24 = smov 119   ;;  %v6853_v2 = vld [vmem:[#allocation4] sm:$0xff]   ;;  %vm255_vm0 = vcmask 523264   ;;  %v7300_v3 = vld [vmem:[%s9609_s2 + $0x38] sm:$0xff]  ;;  %v7305_v4 = vld [vmem:[%s9609_s2 + $0x30] sm:$0xff] }
  0x2a   :  { %165 = vrot.lane.b32.xlu1 %v6849_v0, %s7231_s23  ;;  %172 = vrot.lane.b32.xlu0 %v6849_v0, %s7232_s24  ;;  %s7233_s5 = smov 127   ;;  %v7234_v5 = vmov 0   ;;  %v191_v6 = vld [vmem:[%s9609_s2 + $0x20] sm:$0xff]  ;;  %v192_v7 = vld [vmem:[%s9609_s2 + $0x28] sm:$0xff]  ;;  %vm176_vm1 = vcmask 973824   ;;  %vm169_vm2 = vcmask 982016  }
  0x2b   :  { %6811 = vmatprep.mubr.msk.bf16.mxu0 %vm255_vm0, %v6853_v2  ;;  %6848 = vset.pattern.permute.xlu1 %v7234_v5  ;;  %68 = vst [vmem:[#allocation2 + $0x4] sm:$0xf] %v7234_v5  ;;  %69 = vst [vmem:[#allocation2 + $0xc] sm:$0xf] %v7234_v5  ;;  %v189_v8 = vld [vmem:[%s9609_s2 + $0x10] sm:$0xff]  ;;  %v190_v9 = vld [vmem:[%s9609_s2 + $0x18] sm:$0xff] }
  0x2c   :  { %70 = vst [vmem:[#allocation2 + $0x14] sm:$0xf] %v7234_v5  ;;  %71 = vst [vmem:[#allocation2 + $0x1c] sm:$0xf] %v7234_v5  ;;  %6847 = vset.pattern.permute.xlu0 %v7234_v5  ;;  %1293 = vmatprep.subr.bf16.mxu1 %v7234_v5  ;;  %v187_v10 = vld [vmem:[%s9609_s2] sm:$0xff]  ;;  %v188_v11 = vld [vmem:[%s9609_s2 + $0x8] sm:$0xff] }
  0x2d   :  { %72 = vst [vmem:[#allocation2 + $0x24] sm:$0xf] %v7234_v5  ;;  %73 = vst [vmem:[#allocation2 + $0x2c] sm:$0xf] %v7234_v5  ;;  %vm162_vm3 = vcmask 1039360   ;;  %v6854_v22 = vld [vmem:[#allocation4 + $0x8] sm:$0xff]  }
  0x2e   :  { %167 = vrot.lane.b32.xlu1 %v6851_v1, %s7231_s23  ;;  %174 = vrot.lane.b32.xlu0 %v6851_v1, %s7232_s24  ;;  %74 = vst [vmem:[#allocation2 + $0x34] sm:$0xf] %v7234_v5  ;;  %75 = vst [vmem:[#allocation2 + $0x3c] sm:$0xf] %v7234_v5  ;;  %v6852_v21 = vld [vmem:[%s9607_s0] ss:$8 sps:$4 sm:$0xff]  }
  0x2f   :  { %76 = vst [vmem:[#allocation3 + $0x4] sm:$0xf] %v7234_v5  ;;  %77 = vst [vmem:[#allocation3 + $0xc] sm:$0xf] %v7234_v5  ;;  %v6855_v23 = vld [vmem:[#allocation4 + $0x10] sm:$0xff]   ;;  %v6856_v24 = vld [vmem:[#allocation4 + $0x18] sm:$0xff]  }
  0x30   :  { %78 = vst [vmem:[#allocation3 + $0x14] sm:$0xf] %v7234_v5  ;;  %79 = vst [vmem:[#allocation3 + $0x1c] sm:$0xf] %v7234_v5 }
  0x31   :  { %80 = vst [vmem:[#allocation3 + $0x24] sm:$0xf] %v7234_v5  ;;  %81 = vst [vmem:[#allocation3 + $0x2c] sm:$0xf] %v7234_v5 }
  0x32   :  { %160 = vrot.lane.b32.xlu1 %v6851_v1, %s7233_s5  ;;  %158 = vrot.lane.b32.xlu0 %v6849_v0, %s7233_s5  ;;  %82 = vst [vmem:[#allocation3 + $0x34] sm:$0xf] %v7234_v5  ;;  %83 = vst [vmem:[#allocation3 + $0x3c] sm:$0xf] %v7234_v5 }
  0x33   :  { %84 = vst [vmem:[#allocation3 + $0x44] sm:$0xf] %v7234_v5  ;;  %85 = vst [vmem:[#allocation3 + $0x4c] sm:$0xf] %v7234_v5 }
  0x34   :  { %86 = vst [vmem:[#allocation3 + $0x54] sm:$0xf] %v7234_v5  ;;  %87 = vst [vmem:[#allocation3 + $0x5c] sm:$0xf] %v7234_v5 }
  0x35   :  { %88 = vst [vmem:[#allocation3 + $0x64] sm:$0xf] %v7234_v5  ;;  %89 = vst [vmem:[#allocation3 + $0x6c] sm:$0xf] %v7234_v5  ;;  %v6857_v1 = vld [vmem:[#allocation2 + $0x34] ss:$8 sps:$4 sm:$0xff]  }
  0x36   :  { %90 = vst [vmem:[#allocation3 + $0x74] sm:$0xf] %v7234_v5  ;;  %91 = vst [vmem:[#allocation3 + $0x7c] sm:$0xf] %v7234_v5  ;;  %232 = vperm.xlu1 %6848, %v7300_v3   ;;  %227 = vperm.xlu0 %6847, %v7305_v4   ;;  %v6860_v3 = vld [vmem:[#allocation2 + $0x24] ss:$8 sps:$4 sm:$0xff]  }
  0x37   :  { %92 = vst [vmem:[#allocation3 + $0x84] sm:$0xf] %v7234_v5  ;;  %93 = vst [vmem:[#allocation3 + $0x8c] sm:$0xf] %v7234_v5 }
  0x38   :  { %94 = vst [vmem:[#allocation3 + $0x94] sm:$0xf] %v7234_v5  ;;  %95 = vst [vmem:[#allocation3 + $0x9c] sm:$0xf] %v7234_v5 }
  0x39   :  { %96 = vst [vmem:[#allocation3 + $0xa4] sm:$0xf] %v7234_v5  ;;  %97 = vst [vmem:[#allocation3 + $0xac] sm:$0xf] %v7234_v5 }
  0x3a   :  { %98 = vst [vmem:[#allocation3 + $0xb4] sm:$0xf] %v7234_v5  ;;  %99 = vst [vmem:[#allocation3 + $0xbc] sm:$0xf] %v7234_v5  ;;  %217 = vperm.xlu1 %6848, %v191_v6   ;;  %222 = vperm.xlu0 %6847, %v192_v7   ;;  %v6863_v6 = vld [vmem:[#allocation2 + $0x14] ss:$8 sps:$4 sm:$0xff]  }
  0x3b   :  { %100 = vst [vmem:[#allocation3 + $0xc4] sm:$0xf] %v7234_v5  ;;  %101 = vst [vmem:[#allocation3 + $0xcc] sm:$0xf] %v7234_v5 }
  0x3c   :  { %102 = vst [vmem:[#allocation3 + $0xd4] sm:$0xf] %v7234_v5  ;;  %103 = vst [vmem:[#allocation3 + $0xdc] sm:$0xf] %v7234_v5 }
  0x3d   :  { %104 = vst [vmem:[#allocation3 + $0xe4] sm:$0xf] %v7234_v5  ;;  %105 = vst [vmem:[#allocation3 + $0xec] sm:$0xf] %v7234_v5 }
  0x3e   :  { %106 = vst [vmem:[#allocation3 + $0xf4] sm:$0xf] %v7234_v5  ;;  %107 = vst [vmem:[#allocation3 + $0xfc] sm:$0xf] %v7234_v5  ;;  %207 = vperm.xlu1 %6848, %v189_v8   ;;  %212 = vperm.xlu0 %6847, %v190_v9   ;;  %v6866_v8 = vld [vmem:[#allocation2 + $0x4] ss:$8 sps:$4 sm:$0xff]  }
  0x3f   :  { %108 = vst [vmem:[#allocation3 + $0x104] sm:$0xf] %v7234_v5  ;;  %109 = vst [vmem:[#allocation3 + $0x10c] sm:$0xf] %v7234_v5 }
  0x40   :  { %110 = vst [vmem:[#allocation3 + $0x114] sm:$0xf] %v7234_v5  ;;  %111 = vst [vmem:[#allocation3 + $0x11c] sm:$0xf] %v7234_v5 }
  0x41   :  { %112 = vst [vmem:[#allocation3 + $0x124] sm:$0xf] %v7234_v5  ;;  %113 = vst [vmem:[#allocation3 + $0x12c] sm:$0xf] %v7234_v5 }
  0x42   :  { %114 = vst [vmem:[#allocation3 + $0x134] sm:$0xf] %v7234_v5  ;;  %115 = vst [vmem:[#allocation3 + $0x13c] sm:$0xf] %v7234_v5  ;;  %197 = vperm.xlu1 %6848, %v187_v10   ;;  %202 = vperm.xlu0 %6847, %v188_v11   ;;  %v620_v10 = vld [vmem:[%s9611_s4 + $0xf8] sm:$0xff]  ;;  %v619_v11 = vld [vmem:[%s9611_s4 + $0xf0] sm:$0xff] }
  0x43   :  { %116 = vst [vmem:[#allocation3 + $0x144] sm:$0xf] %v7234_v5  ;;  %117 = vst [vmem:[#allocation3 + $0x14c] sm:$0xf] %v7234_v5 }
  0x44   :  { %118 = vst [vmem:[#allocation3 + $0x154] sm:$0xf] %v7234_v5  ;;  %119 = vst [vmem:[#allocation3 + $0x15c] sm:$0xf] %v7234_v5 }
  0x45   :  { %120 = vst [vmem:[#allocation3 + $0x164] sm:$0xf] %v7234_v5  ;;  %121 = vst [vmem:[#allocation3 + $0x16c] sm:$0xf] %v7234_v5 }
  0x46   :  { %122 = vst [vmem:[#allocation3 + $0x174] sm:$0xf] %v7234_v5  ;;  %123 = vst [vmem:[#allocation3 + $0x17c] sm:$0xf] %v7234_v5  ;;  %467 = vrot.lane.b32.xlu0 %v6857_v1, %s7233_s5 }
  0x47   :  { %124 = vst [vmem:[#allocation3 + $0x184] sm:$0xf] %v7234_v5  ;;  %125 = vst [vmem:[#allocation3 + $0x18c] sm:$0xf] %v7234_v5 }
  0x48   :  { %126 = vst [vmem:[#allocation3 + $0x194] sm:$0xf] %v7234_v5  ;;  %127 = vst [vmem:[#allocation3 + $0x19c] sm:$0xf] %v7234_v5 }
  0x49   :  { %128 = vst [vmem:[#allocation3 + $0x1a4] sm:$0xf] %v7234_v5  ;;  %129 = vst [vmem:[#allocation3 + $0x1ac] sm:$0xf] %v7234_v5 }
  0x4a   :  { %130 = vst [vmem:[#allocation3 + $0x1b4] sm:$0xf] %v7234_v5  ;;  %131 = vst [vmem:[#allocation3 + $0x1bc] sm:$0xf] %v7234_v5  ;;  %463 = vrot.lane.b32.xlu0 %v6860_v3, %s7233_s5 }
  0x4b   :  { %132 = vst [vmem:[#allocation3 + $0x1c4] sm:$0xf] %v7234_v5  ;;  %133 = vst [vmem:[#allocation3 + $0x1cc] sm:$0xf] %v7234_v5 }
  0x4c   :  { %134 = vst [vmem:[#allocation3 + $0x1d4] sm:$0xf] %v7234_v5  ;;  %135 = vst [vmem:[#allocation3 + $0x1dc] sm:$0xf] %v7234_v5 }
  0x4d   :  { %136 = vst [vmem:[#allocation3 + $0x1e4] sm:$0xf] %v7234_v5  ;;  %137 = vst [vmem:[#allocation3 + $0x1ec] sm:$0xf] %v7234_v5 }
  0x4e   :  { %138 = vst [vmem:[#allocation3 + $0x1f4] sm:$0xf] %v7234_v5  ;;  %139 = vst [vmem:[#allocation3 + $0x1fc] sm:$0xf] %v7234_v5  ;;  %459 = vrot.lane.b32.xlu0 %v6863_v6, %s7233_s5 }
  0x52   :  { %455 = vrot.lane.b32.xlu0 %v6866_v8, %s7233_s5 }
  0x56   :  { %515 = vrot.lane.b32.xlu0 %v6857_v1, %s7232_s24 }
  0x5a   :  { %511 = vrot.lane.b32.xlu0 %v6860_v3, %s7232_s24 }
  0x5e   :  { %507 = vrot.lane.b32.xlu0 %v6863_v6, %s7232_s24 }
  0x62   :  { %503 = vrot.lane.b32.xlu0 %v6866_v8, %s7232_s24 }
  0x66   :  { %491 = vrot.lane.b32.xlu0 %v6857_v1, %s7231_s23  ;;  %v632_v1 = vld [vmem:[%s9611_s4 + $0x158] sm:$0xff] }
  0x6a   :  { %487 = vrot.lane.b32.xlu0 %v6860_v3, %s7231_s23 }
  0x6e   :  { %483 = vrot.lane.b32.xlu0 %v6863_v6, %s7231_s23 }
  0x72   :  { %479 = vrot.lane.b32.xlu0 %v6866_v8, %s7231_s23 }
  0x76   :  { %810 = vperm.xlu0 %6847, %v620_v10  }
  0x9c   :  { %v166_v12 = vpop.permute.xlu1 %165  ;;  %v173_v13 = vpop.permute.xlu0 %172 }
  0xa0   :  { %v168_v14 = vpop.permute.xlu1 %167  ;;  %v175_v15 = vpop.permute.xlu0 %174 }
  0xa1   :  { %v177_v16 = vsel %vm176_vm1, %v173_v13, %v175_v15  ;;  %v170_v17 = vsel %vm169_vm2, %v166_v12, %v168_v14  ;;  %v6875_v12 = vld [vmem:[#allocation6 + $0x4] ss:$8 sps:$4 sm:$0xff]   ;;  %v604_v13 = vld [vmem:[%s9611_s4 + $0x78] sm:$0xff]  ;;  %v603_v14 = vld [vmem:[%s9611_s4 + $0x70] sm:$0xff] }
  0xa2   :  { %6803 = vmatprep.subr.bf16.mxu0 %v177_v16  ;;  %1325 = vmatprep.mubr.bf16.mxu1 %v6875_v12  ;;  %v618_v15 = vld [vmem:[%s9611_s4 + $0xe8] sm:$0xff] }
  0xa3   :  { %6804 = vmatpush3.bf16.msra.mxu0 %v177_v16  ;;  %730 = vperm.xlu0 %6847, %v604_v13   ;;  %v617_v16 = vld [vmem:[%s9611_s4 + $0xe0] sm:$0xff] }
  0xa4   :  { %6805 = vmatprep.subr.bf16.mxu0 %v170_v17  ;;  %v161_v18 = vpop.permute.xlu1 %160  ;;  %v159_v19 = vpop.permute.xlu0 %158 }
  0xa5   :  { %v163_v20 = vsel %vm162_vm3, %v159_v19, %v161_v18  ;;  %v601_v18 = vld [vmem:[%s9611_s4 + $0x60] sm:$0xff]  ;;  %v616_v19 = vld [vmem:[%s9611_s4 + $0xd8] sm:$0xff] }
  0xa7   :  { %6806 = vmatpush3.bf16.msra.mxu0 %v170_v17  ;;  %800 = vperm.xlu0 %6847, %v618_v15   ;;  %v602_v17 = vld [vmem:[%s9611_s4 + $0x68] sm:$0xff] }
  0xa8   :  { %6807 = vmatprep.subr.bf16.mxu0 %v163_v20 }
  0xab   :  { %6808 = vmatpush3.bf16.msra.mxu0 %v163_v20  ;;  %720 = vperm.xlu0 %6847, %v602_v17   ;;  %v615_v20 = vld [vmem:[%s9611_s4 + $0xd0] sm:$0xff] }
  0xac   :  { %6809 = vmatprep.subr.bf16.mxu0 %v6852_v21 }
  0xaf   :  { %6810 = vmatpush3.bf16.msra.mxu0 %v6852_v21  ;;  %790 = vperm.xlu0 %6847, %v616_v19   ;;  %v600_v21 = vld [vmem:[%s9611_s4 + $0x58] sm:$0xff] }
  0xb1   :  { %v233_v25 = vpop.permute.xlu1 %232  ;;  %v228_v26 = vpop.permute.xlu0 %227 }
  0xb2   :  { %6812 = vmatmul.mubr.msk.bf16.vlgmr.msra.gmra.mxu0 %vm255_vm0, %v6854_v22  ;;  %v599_v22 = vld [vmem:[%s9611_s4 + $0x50] sm:$0xff] }
  0xb3   :  { %6815 = vmatprep.mubr.msk.bf16.mxu0 %vm255_vm0, %v6855_v23  ;;  %710 = vperm.xlu0 %6847, %v600_v21   ;;  %v614_v23 = vld [vmem:[%s9611_s4 + $0xc8] sm:$0xff] }
  0xb5   :  { %v218_v27 = vpop.permute.xlu1 %217  ;;  %v223_v28 = vpop.permute.xlu0 %222 }
  0xb7   :  { %780 = vperm.xlu0 %6847, %v614_v23  }
  0xb9   :  { %v208_v29 = vpop.permute.xlu1 %207  ;;  %v213_v30 = vpop.permute.xlu0 %212 }
  0xba   :  { %6816 = vmatmul.mubr.msk.bf16.gmra.mxu0 %vm255_vm0, %v6856_v24  ;;  %v613_v24 = vld [vmem:[%s9611_s4 + $0xc0] sm:$0xff] }
  0xbd   :  { %v198_v32 = vpop.permute.xlu1 %197  ;;  %v203_v38 = vpop.permute.xlu0 %202 }
 0x172   :  { %v6813_v31 = vpop.f32.mrf.mxu0 }
 0x173   :  { %v311_v33 = vadd.f32 %v6813_v31, %v208_v29  ;;  %v596_v29 = vld [vmem:[%s9611_s4 + $0x38] sm:$0xff]  ;;  %v610_v31 = vld [vmem:[%s9611_s4 + $0xa8] sm:$0xff] }
 0x174   :  { %v302_v34 = vpop.f32.mrf.mxu0 }
 0x175   :  { %v335_v35 = vmax.f32 %v311_v33, 0.0  ;;  %v303_v36 = vadd.f32 %v302_v34, %v198_v32  ;;  %v609_v32 = vld [vmem:[%s9611_s4 + $0xa0] sm:$0xff]  ;;  %v594_v33 = vld [vmem:[%s9611_s4 + $0x28] sm:$0xff] }
 0x176   :  { %v6814_v37 = vpop.f32.mrf.mxu0  ;;  %v593_v34 = vld [vmem:[%s9611_s4 + $0x20] sm:$0xff] }
 0x177   :  { %v6021_v39 = vpack.c.bf16 %v335_v35, %v335_v35  ;;  %v333_v40 = vmax.f32 %v303_v36, 0.0  ;;  %v314_v41 = vadd.f32 %v6814_v37, %v213_v30  ;;  %v595_v30 = vld [vmem:[%s9611_s4 + $0x30] sm:$0xff]  ;;  %v608_v35 = vld [vmem:[%s9611_s4 + $0x98] sm:$0xff] }
 0x178   :  { %v305_v42 = vpop.f32.mrf.mxu0  ;;  %v607_v36 = vld [vmem:[%s9611_s4 + $0x90] sm:$0xff]  ;;  %v592_v37 = vld [vmem:[%s9611_s4 + $0x18] sm:$0xff] }
 0x179   :  { %375 = vst [vmem:[#allocation2 + $0x10] sm:$0xf] %v6021_v39  ;;  %v6019_v43 = vpack.c.bf16 %v333_v40, %v333_v40  ;;  %v336_v44 = vmax.f32 %v314_v41, 0.0  ;;  %v306_v45 = vadd.f32 %v305_v42, %v203_v38  ;;  %v591_v38 = vld [vmem:[%s9611_s4 + $0x10] sm:$0xff]  ;;  %v606_v39 = vld [vmem:[%s9611_s4 + $0x88] sm:$0xff]  ;;  %v605_v40 = vld [vmem:[%s9611_s4 + $0x80] sm:$0xff] }
 0x17a   :  { %v6817_v46 = vpop.f32.mrf.mxu0  ;;  %v590_v41 = vld [vmem:[%s9611_s4 + $0x8] sm:$0xff]  ;;  %v589_v42 = vld [vmem:[%s9611_s4] sm:$0xff] }
 0x17b   :  { %373 = vst [vmem:[#allocation2] sm:$0xf] %v6019_v43  ;;  %v6022_v47 = vpack.c.bf16 %v336_v44, %v336_v44  ;;  %v334_v48 = vmax.f32 %v306_v45, 0.0  ;;  %v327_v49 = vadd.f32 %v6817_v46, %v228_v26  ;;  %v597_v26 = vld [vmem:[%s9611_s4 + $0x40] sm:$0xff]  ;;  %v652_v43 = vld [vmem:[%s9611_s4 + $0x1f8] sm:$0xff]  ;;  %v651_v44 = vld [vmem:[%s9611_s4 + $0x1f0] sm:$0xff]  ;;  %v468_v46 = vpop.permute.xlu0 %467 }
 0x17c   :  { %v318_v50 = vpop.f32.mrf.mxu0  ;;  %v636_v45 = vld [vmem:[%s9611_s4 + $0x178] sm:$0xff] }
 0x17d   :  { %376 = vst [vmem:[#allocation2 + $0x18] sm:$0xf] %v6022_v47  ;;  %v6020_v51 = vpack.c.bf16 %v334_v48, %v334_v48  ;;  %v339_v52 = vmax.f32 %v327_v49, 0.0  ;;  %v319_v53 = vadd.f32 %v318_v50, %v218_v27  ;;  %v612_v27 = vld [vmem:[%s9611_s4 + $0xb8] sm:$0xff]  ;;  %v635_v48 = vld [vmem:[%s9611_s4 + $0x170] sm:$0xff]  ;;  %v650_v50 = vld [vmem:[%s9611_s4 + $0x1e8] sm:$0xff] }
 0x17e   :  { %v6818_v54 = vpop.f32.mrf.mxu0 }
 0x17f   :  { %374 = vst [vmem:[#allocation2 + $0x8] sm:$0xf] %v6020_v51  ;;  %v6025_v55 = vpack.c.bf16 %v339_v52, %v339_v52  ;;  %v337_v56 = vmax.f32 %v319_v53, 0.0  ;;  %v330_v57 = vadd.f32 %v6818_v54, %v233_v25  ;;  %v598_v25 = vld [vmem:[%s9611_s4 + $0x48] sm:$0xff]  ;;  %v464_v51 = vpop.permute.xlu0 %463  ;;  %v649_v53 = vld [vmem:[%s9611_s4 + $0x1e0] sm:$0xff] }
 0x180   :  { %v321_v58 = vpop.f32.mrf.mxu0  ;;  %700 = vperm.xlu0 %6847, %v598_v25  }
 0x181   :  { %379 = vst [vmem:[#allocation2 + $0x30] sm:$0xf] %v6025_v55  ;;  %v6023_v59 = vpack.c.bf16 %v337_v56, %v337_v56  ;;  %v340_v60 = vmax.f32 %v330_v57, 0.0  ;;  %v322_v61 = vadd.f32 %v321_v58, %v223_v28  ;;  %v611_v28 = vld [vmem:[%s9611_s4 + $0xb0] sm:$0xff]  ;;  %v634_v55 = vld [vmem:[%s9611_s4 + $0x168] sm:$0xff]  ;;  %v633_v58 = vld [vmem:[%s9611_s4 + $0x160] sm:$0xff] }
 0x183   :  { %377 = vst [vmem:[#allocation2 + $0x20] sm:$0xf] %v6023_v59  ;;  %v6026_v62 = vpack.c.bf16 %v340_v60, %v340_v60  ;;  %v338_v63 = vmax.f32 %v322_v61, 0.0  ;;  %v460_v56 = vpop.permute.xlu0 %459  ;;  %v648_v60 = vld [vmem:[%s9611_s4 + $0x1d8] sm:$0xff] }
 0x184   :  { %v6865_v7 = vld [vmem:[#allocation2 + $0x10] ss:$8 sps:$4 sm:$0xff]   ;;  %770 = vperm.xlu0 %6847, %v612_v27  }
 0x185   :  { %380 = vst [vmem:[#allocation2 + $0x38] sm:$0xf] %v6026_v62  ;;  %v6024_v0 = vpack.c.bf16 %v338_v63, %v338_v63  ;;  %v647_v63 = vld [vmem:[%s9611_s4 + $0x1d0] sm:$0xff] }
 0x186   :  { %v6868_v9 = vld [vmem:[#allocation2] ss:$8 sps:$4 sm:$0xff]   ;;  %v6871_v10 = vld [vmem:[#allocation2 + $0x10] ss:$8 sps:$4 sm:$0xff]  }
 0x187   :  { %378 = vst [vmem:[#allocation2 + $0x28] sm:$0xf] %v6024_v0  ;;  %v456_v61 = vpop.permute.xlu0 %455  ;;  %v6872_v13 = vld [vmem:[#allocation2] ss:$8 sps:$4 sm:$0xff]  }
 0x188   :  { %690 = vperm.xlu0 %6847, %v596_v29  }
 0x18c   :  { %v6859_v2 = vld [vmem:[#allocation2 + $0x30] ss:$8 sps:$4 sm:$0xff]   ;;  %760 = vperm.xlu0 %6847, %v610_v31  }
 0x18d   :  { %465 = vrot.lane.b32.xlu1 %v6859_v2, %s7233_s5  ;;  %v6869_v6 = vld [vmem:[#allocation2 + $0x30] ss:$8 sps:$4 sm:$0xff]  }
 0x18e   :  { %v6862_v4 = vld [vmem:[#allocation2 + $0x20] ss:$8 sps:$4 sm:$0xff]  }
 0x190   :  { %680 = vperm.xlu0 %6847, %v594_v33   ;;  %v6876_v33 = vld [vmem:[#allocation6 + $0x14] ss:$8 sps:$4 sm:$0xff]  }
 0x191   :  { %461 = vrot.lane.b32.xlu1 %v6862_v4, %s7233_s5 }
 0x194   :  { %750 = vperm.xlu0 %6847, %v608_v35   ;;  %v6879_v35 = vld [vmem:[#allocation6 + $0x24] ss:$8 sps:$4 sm:$0xff]  }
 0x195   :  { %457 = vrot.lane.b32.xlu1 %v6865_v7, %s7233_s5 }
 0x198   :  { %670 = vperm.xlu0 %6847, %v592_v37   ;;  %v6882_v37 = vld [vmem:[#allocation6 + $0x34] ss:$8 sps:$4 sm:$0xff]  }
 0x199   :  { %453 = vrot.lane.b32.xlu1 %v6868_v9, %s7233_s5 }
 0x19c   :  { %740 = vperm.xlu0 %6847, %v606_v39   ;;  %v6885_v39 = vld [vmem:[#allocation6 + $0x44] ss:$8 sps:$4 sm:$0xff]  }
 0x19d   :  { %513 = vrot.lane.b32.xlu1 %v6859_v2, %s7232_s24 }
 0x1a0   :  { %660 = vperm.xlu0 %6847, %v590_v41   ;;  %v6890_v41 = vld [vmem:[#allocation6 + $0x50] ss:$8 sps:$4 sm:$0xff]  }
 0x1a1   :  { %509 = vrot.lane.b32.xlu1 %v6862_v4, %s7232_s24 }
 0x1a4   :  { %970 = vperm.xlu0 %6847, %v652_v43   ;;  %v6893_v43 = vld [vmem:[#allocation6 + $0x60] ss:$8 sps:$4 sm:$0xff]  }
 0x1a5   :  { %505 = vrot.lane.b32.xlu1 %v6865_v7, %s7232_s24 }
 0x1a8   :  { %890 = vperm.xlu0 %6847, %v636_v45   ;;  %v6896_v45 = vld [vmem:[#allocation6 + $0x70] ss:$8 sps:$4 sm:$0xff]  }
 0x1a9   :  { %501 = vrot.lane.b32.xlu1 %v6868_v9, %s7232_s24 }
 0x1ac   :  { %960 = vperm.xlu0 %6847, %v650_v50   ;;  %v6903_v50 = vld [vmem:[#allocation6 + $0xa4] ss:$8 sps:$4 sm:$0xff]  }
 0x1ad   :  { %489 = vrot.lane.b32.xlu1 %v6859_v2, %s7231_s23  ;;  %v516_v2 = vpop.permute.xlu0 %515 }
 0x1b0   :  { %880 = vperm.xlu0 %6847, %v634_v55   ;;  %v6911_v55 = vld [vmem:[#allocation6 + $0xc0] ss:$8 sps:$4 sm:$0xff]  }
 0x1b1   :  { %485 = vrot.lane.b32.xlu1 %v6862_v4, %s7231_s23  ;;  %v631_v4 = vld [vmem:[%s9611_s4 + $0x150] sm:$0xff]  ;;  %v512_v8 = vpop.permute.xlu0 %511 }
 0x1b4   :  { %950 = vperm.xlu0 %6847, %v648_v60  }
 0x1b5   :  { %481 = vrot.lane.b32.xlu1 %v6865_v7, %s7231_s23  ;;  %v6870_v7 = vld [vmem:[#allocation2 + $0x20] ss:$8 sps:$4 sm:$0xff]  }
 0x1b8   :  { %870 = vperm.xlu0 %6847, %v632_v1  }
 0x1b9   :  { %477 = vrot.lane.b32.xlu1 %v6868_v9, %s7231_s23 }
 0x1bd   :  { %805 = vperm.xlu1 %6848, %v619_v11   ;;  %v508_v11 = vpop.permute.xlu0 %507 }
 0x1c1   :  { %725 = vperm.xlu1 %6848, %v603_v14   ;;  %v504_v15 = vpop.permute.xlu0 %503 }
 0x1c5   :  { %795 = vperm.xlu1 %6848, %v617_v16  }
 0x1c9   :  { %715 = vperm.xlu1 %6848, %v601_v18   ;;  %v492_v18 = vpop.permute.xlu0 %491 }
 0x1cd   :  { %785 = vperm.xlu1 %6848, %v615_v20  }
 0x1d1   :  { %705 = vperm.xlu1 %6848, %v599_v22   ;;  %v488_v22 = vpop.permute.xlu0 %487 }
 0x1d5   :  { %775 = vperm.xlu1 %6848, %v613_v24   ;;  %v484_v25 = vpop.permute.xlu0 %483 }
 0x1d9   :  { %695 = vperm.xlu1 %6848, %v597_v26   ;;  %v480_v29 = vpop.permute.xlu0 %479 }
 0x1dd   :  { %765 = vperm.xlu1 %6848, %v611_v28   ;;  %v7596_v60 = vpop.permute.xlu0 %810 }
 0x1e1   :  { %685 = vperm.xlu1 %6848, %v595_v30  }
 0x1e5   :  { %755 = vperm.xlu1 %6848, %v609_v32   ;;  %v6873_v32 = vld [vmem:[#allocation6] ss:$8 sps:$4 sm:$0xff]  }
 0x1e9   :  { %675 = vperm.xlu1 %6848, %v593_v34   ;;  %v6878_v34 = vld [vmem:[#allocation6 + $0x10] ss:$8 sps:$4 sm:$0xff]  }
 0x1ed   :  { %745 = vperm.xlu1 %6848, %v607_v36   ;;  %v6881_v36 = vld [vmem:[#allocation6 + $0x20] ss:$8 sps:$4 sm:$0xff]  }
 0x1f1   :  { %665 = vperm.xlu1 %6848, %v591_v38   ;;  %v6884_v38 = vld [vmem:[#allocation6 + $0x30] ss:$8 sps:$4 sm:$0xff]  }
 0x1f5   :  { %735 = vperm.xlu1 %6848, %v605_v40   ;;  %v6888_v40 = vld [vmem:[#allocation6 + $0x54] ss:$8 sps:$4 sm:$0xff]  }
 0x1f9   :  { %655 = vperm.xlu1 %6848, %v589_v42   ;;  %v6891_v42 = vld [vmem:[#allocation6 + $0x64] ss:$8 sps:$4 sm:$0xff]  }
 0x1fd   :  { %965 = vperm.xlu1 %6848, %v651_v44   ;;  %v6894_v44 = vld [vmem:[#allocation6 + $0x74] ss:$8 sps:$4 sm:$0xff]  }
 0x1ff   :  { %v466_v47 = vpop.permute.xlu1 %465 }
 0x200   :  { %v472_v49 = vsel %vm162_vm3, %v466_v47, %v468_v46  ;;  %v6897_v46 = vld [vmem:[#allocation6 + $0x84] ss:$8 sps:$4 sm:$0xff]   ;;  %v6899_v47 = vld [vmem:[#allocation6 + $0x80] ss:$8 sps:$4 sm:$0xff]  }
 0x201   :  { %1294 = vmatpush1.bf16.msra.mxu1 %v472_v49  ;;  %885 = vperm.xlu1 %6848, %v635_v48   ;;  %v6900_v48 = vld [vmem:[#allocation6 + $0x94] ss:$8 sps:$4 sm:$0xff]   ;;  %v6902_v49 = vld [vmem:[#allocation6 + $0x90] ss:$8 sps:$4 sm:$0xff]  }
 0x202   :  { %1295 = vmatprep.subr.bf16.mxu1 %v7234_v5 }
 0x203   :  { %v462_v52 = vpop.permute.xlu1 %461 }
 0x204   :  { %v471_v54 = vsel %vm162_vm3, %v462_v52, %v464_v51  ;;  %v6905_v51 = vld [vmem:[#allocation6 + $0xa0] ss:$8 sps:$4 sm:$0xff]   ;;  %v6906_v52 = vld [vmem:[#allocation6 + $0xb4] ss:$8 sps:$4 sm:$0xff]  }
 0x205   :  { %1296 = vmatpush1.bf16.msra.mxu1 %v471_v54  ;;  %955 = vperm.xlu1 %6848, %v649_v53   ;;  %v6908_v53 = vld [vmem:[#allocation6 + $0xb0] ss:$8 sps:$4 sm:$0xff]   ;;  %v6909_v54 = vld [vmem:[#allocation6 + $0xc4] ss:$8 sps:$4 sm:$0xff]  }
 0x206   :  { %1297 = vmatprep.subr.bf16.mxu1 %v7234_v5 }
 0x207   :  { %v458_v57 = vpop.permute.xlu1 %457 }
 0x208   :  { %v470_v59 = vsel %vm162_vm3, %v458_v57, %v460_v56  ;;  %v6912_v56 = vld [vmem:[#allocation6 + $0xd4] ss:$8 sps:$4 sm:$0xff]   ;;  %v6914_v57 = vld [vmem:[#allocation6 + $0xd0] ss:$8 sps:$4 sm:$0xff]  }
 0x209   :  { %1298 = vmatpush1.bf16.msra.mxu1 %v470_v59  ;;  %875 = vperm.xlu1 %6848, %v633_v58   ;;  %v6915_v58 = vld [vmem:[#allocation6 + $0xe4] ss:$8 sps:$4 sm:$0xff]  }
 0x20a   :  { %1299 = vmatprep.subr.bf16.mxu1 %v7234_v5 }
 0x20b   :  { %v454_v62 = vpop.permute.xlu1 %453 }
 0x20c   :  { %v469_v0 = vsel %vm162_vm3, %v454_v62, %v456_v61  ;;  %v6917_v62 = vld [vmem:[#allocation6 + $0xe0] ss:$8 sps:$4 sm:$0xff]  }
 0x20d   :  { %1300 = vmatpush1.bf16.msra.mxu1 %v469_v0  ;;  %945 = vperm.xlu1 %6848, %v647_v63   ;;  %v6918_v63 = vld [vmem:[#allocation6 + $0xf4] ss:$8 sps:$4 sm:$0xff]   ;;  %v7600_v0 = vpop.permute.xlu0 %730 }
 0x20e   :  { %1301 = vmatprep.subr.bf16.mxu1 %v7234_v5 }
 0x20f   :  { %v514_v3 = vpop.permute.xlu1 %513 }
 0x210   :  { %v520_v14 = vsel %vm176_vm1, %v514_v3, %v516_v2  ;;  %v6920_v2 = vld [vmem:[#allocation6 + $0xf0] ss:$8 sps:$4 sm:$0xff]   ;;  %v6921_v3 = vld [vmem:[#allocation6 + $0x104] ss:$8 sps:$4 sm:$0xff]  }
 0x211   :  { %1302 = vmatpush1.bf16.msra.mxu1 %v6869_v6  ;;  %865 = vperm.xlu1 %6848, %v631_v4   ;;  %v7604_v4 = vpop.permute.xlu0 %800 }
 0x212   :  { %1303 = vmatprep.subr.bf16.mxu1 %v7234_v5 }
 0x213   :  { %v510_v9 = vpop.permute.xlu1 %509 }
 0x214   :  { %v519_v17 = vsel %vm176_vm1, %v510_v9, %v512_v8  ;;  %v6923_v8 = vld [vmem:[#allocation6 + $0x100] ss:$8 sps:$4 sm:$0xff]   ;;  %v6924_v9 = vld [vmem:[#allocation6 + $0x114] ss:$8 sps:$4 sm:$0xff]  }
 0x215   :  { %1304 = vmatpush1.bf16.msra.mxu1 %v6870_v7  ;;  %v7608_v7 = vpop.permute.xlu0 %720 }
 0x216   :  { %1305 = vmatprep.subr.bf16.mxu1 %v7234_v5 }
 0x217   :  { %v506_v12 = vpop.permute.xlu1 %505 }
 0x218   :  { %v518_v20 = vsel %vm176_vm1, %v506_v12, %v508_v11 }
 0x219   :  { %1306 = vmatpush1.bf16.msra.mxu1 %v6871_v10  ;;  %v7612_v11 = vpop.permute.xlu0 %790 }
 0x21a   :  { %1307 = vmatprep.subr.bf16.mxu1 %v7234_v5 }
 0x21b   :  { %v502_v16 = vpop.permute.xlu1 %501 }
 0x21c   :  { %v517_v21 = vsel %vm176_vm1, %v502_v16, %v504_v15 }
 0x21d   :  { %1308 = vmatpush1.bf16.msra.mxu1 %v6872_v13  ;;  %v6926_v13 = vld [vmem:[#allocation6 + $0x110] ss:$8 sps:$4 sm:$0xff]   ;;  %v7616_v15 = vpop.permute.xlu0 %710 }
 0x21e   :  { %1309 = vmatprep.subr.bf16.mxu1 %v7234_v5 }
 0x21f   :  { %v490_v19 = vpop.permute.xlu1 %489 }
 0x220   :  { %v496_v24 = vsel %vm169_vm2, %v490_v19, %v492_v18  ;;  %v6930_v18 = vld [vmem:[#allocation6 + $0x134] ss:$8 sps:$4 sm:$0xff]  }
 0x221   :  { %1310 = vmatpush2.bf16.msra.mxu1 %v520_v14  ;;  %v6927_v14 = vld [vmem:[#allocation6 + $0x124] ss:$8 sps:$4 sm:$0xff]   ;;  %v7620_v19 = vpop.permute.xlu0 %780 }
 0x222   :  { %1311 = vmatprep.subr.bf16.mxu1 %v7234_v5 }
 0x223   :  { %v486_v23 = vpop.permute.xlu1 %485 }
 0x224   :  { %v495_v27 = vsel %vm169_vm2, %v486_v23, %v488_v22  ;;  %v6932_v22 = vld [vmem:[#allocation6 + $0x130] ss:$8 sps:$4 sm:$0xff]   ;;  %v6933_v23 = vld [vmem:[#allocation6 + $0x144] ss:$8 sps:$4 sm:$0xff]  }
 0x225   :  { %1312 = vmatpush2.bf16.msra.mxu1 %v519_v17  ;;  %v6929_v17 = vld [vmem:[#allocation6 + $0x120] ss:$8 sps:$4 sm:$0xff]  }
 0x226   :  { %1313 = vmatprep.subr.bf16.mxu1 %v7234_v5 }
 0x227   :  { %v482_v26 = vpop.permute.xlu1 %481 }
 0x228   :  { %v494_v28 = vsel %vm169_vm2, %v482_v26, %v484_v25 }
 0x229   :  { %1314 = vmatpush2.bf16.msra.mxu1 %v518_v20 }
 0x22a   :  { %1315 = vmatprep.subr.bf16.mxu1 %v7234_v5 }
 0x22b   :  { %v478_v30 = vpop.permute.xlu1 %477 }
 0x22c   :  { %v493_v31 = vsel %vm169_vm2, %v478_v30, %v480_v29 }
 0x22d   :  { %1316 = vmatpush2.bf16.msra.mxu1 %v517_v21  ;;  %v7624_v21 = vpop.permute.xlu0 %700 }
 0x22e   :  { %1317 = vmatprep.subr.bf16.mxu1 %v7234_v5 }
 0x231   :  { %1318 = vmatpush2.bf16.msra.mxu1 %v496_v24  ;;  %v7628_v25 = vpop.permute.xlu0 %770 }
 0x232   :  { %1319 = vmatprep.subr.bf16.mxu1 %v7234_v5 }
 0x235   :  { %1320 = vmatpush2.bf16.msra.mxu1 %v495_v27  ;;  %v6935_v27 = vld [vmem:[#allocation6 + $0x140] ss:$8 sps:$4 sm:$0xff]   ;;  %v7632_v29 = vpop.permute.xlu0 %690 }
 0x236   :  { %1321 = vmatprep.subr.bf16.mxu1 %v7234_v5 }
 0x238   :  { %v7594_v59 = vpop.permute.xlu1 %805 }
 0x239   :  { %1322 = vmatpush2.bf16.msra.mxu1 %v494_v28  ;;  %v6936_v28 = vld [vmem:[#allocation6 + $0x154] ss:$8 sps:$4 sm:$0xff]  }
 0x23a   :  { %1323 = vmatprep.subr.bf16.mxu1 %v7234_v5  ;;  %v6887_v5 = vld [vmem:[#allocation6 + $0x40] ss:$8 sps:$4 sm:$0xff]  }
 0x23c   :  { %v7598_v61 = vpop.permute.xlu1 %725 }
 0x23d   :  { %1324 = vmatpush2.bf16.msra.mxu1 %v493_v31  ;;  %v6938_v31 = vld [vmem:[#allocation6 + $0x150] ss:$8 sps:$4 sm:$0xff]  }
 0x240   :  { %1326 = vmatmul.mubr.bf16.vlgmr.msra.gmra.mxu1 %v6873_v32  ;;  %v7602_v1 = vpop.permute.xlu1 %795  ;;  %v6939_v32 = vld [vmem:[#allocation6 + $0x164] ss:$8 sps:$4 sm:$0xff]  }
 0x241   :  { %1333 = vmatprep.mubr.bf16.mxu1 %v6876_v33  ;;  %v7636_v33 = vpop.permute.xlu0 %760 }
 0x244   :  { %v7606_v6 = vpop.permute.xlu1 %715 }
 0x248   :  { %1334 = vmatmul.mubr.bf16.gmra.mxu1 %v6878_v34  ;;  %v7610_v10 = vpop.permute.xlu1 %785 }
 0x249   :  { %1341 = vmatprep.mubr.bf16.mxu1 %v6879_v35  ;;  %v681_v35 = vpop.permute.xlu0 %680 }
 0x24c   :  { %v7614_v12 = vpop.permute.xlu1 %705 }
 0x250   :  { %1342 = vmatmul.mubr.bf16.gmra.mxu1 %v6881_v36  ;;  %v7618_v16 = vpop.permute.xlu1 %775  ;;  %v6941_v36 = vld [vmem:[#allocation6 + $0x160] ss:$8 sps:$4 sm:$0xff]  }
 0x251   :  { %1349 = vmatprep.mubr.bf16.mxu1 %v6882_v37  ;;  %v6942_v37 = vld [vmem:[#allocation6 + $0x174] ss:$8 sps:$4 sm:$0xff]  }
 0x254   :  { %v7622_v20 = vpop.permute.xlu1 %695 }
 0x258   :  { %1350 = vmatmul.mubr.bf16.gmra.mxu1 %v6884_v38  ;;  %v7626_v24 = vpop.permute.xlu1 %765 }
 0x259   :  { %1357 = vmatprep.mubr.bf16.mxu1 %v6885_v39  ;;  %v7640_v39 = vpop.permute.xlu0 %750 }
 0x25c   :  { %v7630_v26 = vpop.permute.xlu1 %685 }
 0x260   :  { %1358 = vmatmul.mubr.bf16.gmra.mxu1 %v6887_v5  ;;  %v7634_v30 = vpop.permute.xlu1 %755 }
 0x261   :  { %1365 = vmatprep.mubr.bf16.mxu1 %v6888_v40  ;;  %v6944_v40 = vld [vmem:[#allocation6 + $0x170] ss:$8 sps:$4 sm:$0xff]  }
 0x264   :  { %v676_v34 = vpop.permute.xlu1 %675 }
 0x268   :  { %1366 = vmatmul.mubr.bf16.gmra.mxu1 %v6890_v41  ;;  %v7638_v38 = vpop.permute.xlu1 %745  ;;  %v6945_v41 = vld [vmem:[#allocation6 + $0x184] ss:$8 sps:$4 sm:$0xff]  }
 0x269   :  { %1373 = vmatprep.mubr.bf16.mxu1 %v6891_v42  ;;  %v671_v42 = vpop.permute.xlu0 %670 }
 0x26c   :  { %v666_v5 = vpop.permute.xlu1 %665 }
 0x270   :  { %1374 = vmatmul.mubr.bf16.gmra.mxu1 %v6893_v43  ;;  %v7642_v43 = vpop.permute.xlu1 %735 }
 0x271   :  { %1381 = vmatprep.mubr.bf16.mxu1 %v6894_v44  ;;  %v6947_v44 = vld [vmem:[#allocation6 + $0x180] ss:$8 sps:$4 sm:$0xff]  }
 0x278   :  { %1382 = vmatmul.mubr.bf16.gmra.mxu1 %v6896_v45  ;;  %v6948_v45 = vld [vmem:[#allocation6 + $0x194] ss:$8 sps:$4 sm:$0xff]  }
 0x279   :  { %1389 = vmatprep.mubr.bf16.mxu1 %v6897_v46  ;;  %v7644_v46 = vpop.permute.xlu0 %740 }
 0x280   :  { %1390 = vmatmul.mubr.bf16.gmra.mxu1 %v6899_v47  ;;  %v656_v47 = vpop.permute.xlu1 %655 }
 0x281   :  { %1397 = vmatprep.mubr.bf16.mxu1 %v6900_v48 }
 0x288   :  { %1398 = vmatmul.mubr.bf16.gmra.mxu1 %v6902_v49 }
 0x289   :  { %1405 = vmatprep.mubr.bf16.mxu1 %v6903_v50 }
 0x290   :  { %1406 = vmatmul.mubr.bf16.gmra.mxu1 %v6905_v51 }
 0x291   :  { %1413 = vmatprep.mubr.bf16.mxu1 %v6906_v52  ;;  %v661_v52 = vpop.permute.xlu0 %660 }
 0x298   :  { %1414 = vmatmul.mubr.bf16.gmra.mxu1 %v6908_v53 }
 0x299   :  { %1421 = vmatprep.mubr.bf16.mxu1 %v6909_v54  ;;  %v6950_v54 = vld [vmem:[#allocation6 + $0x190] ss:$8 sps:$4 sm:$0xff]  }
 0x2a0   :  { %1422 = vmatmul.mubr.bf16.gmra.mxu1 %v6911_v55 }
 0x2a1   :  { %1429 = vmatprep.mubr.bf16.mxu1 %v6912_v56 }
 0x2a8   :  { %1430 = vmatmul.mubr.bf16.gmra.mxu1 %v6914_v57  ;;  %v6951_v57 = vld [vmem:[#allocation6 + $0x1a4] ss:$8 sps:$4 sm:$0xff]  }
 0x2a9   :  { %1437 = vmatprep.mubr.bf16.mxu1 %v6915_v58 }
 0x2b0   :  { %1438 = vmatmul.mubr.bf16.gmra.mxu1 %v6917_v62 }
 0x2b1   :  { %1445 = vmatprep.mubr.bf16.mxu1 %v6918_v63 }
 0x2b8   :  { %1446 = vmatmul.mubr.bf16.gmra.mxu1 %v6920_v2 }
 0x2b9   :  { %1453 = vmatprep.mubr.bf16.mxu1 %v6921_v3 }
 0x2c0   :  { %1454 = vmatmul.mubr.bf16.gmra.mxu1 %v6923_v8 }
 0x2c1   :  { %1461 = vmatprep.mubr.bf16.mxu1 %v6924_v9 }
 0x2c8   :  { %1462 = vmatmul.mubr.bf16.gmra.mxu1 %v6926_v13 }
 0x2c9   :  { %1469 = vmatprep.mubr.bf16.mxu1 %v6927_v14  ;;  %v6953_v14 = vld [vmem:[#allocation6 + $0x1a0] ss:$8 sps:$4 sm:$0xff]  }
 0x2d0   :  { %1470 = vmatmul.mubr.bf16.gmra.mxu1 %v6929_v17 }
 0x2d1   :  { %1477 = vmatprep.mubr.bf16.mxu1 %v6930_v18 }
 0x2d8   :  { %1478 = vmatmul.mubr.bf16.gmra.mxu1 %v6932_v22  ;;  %v6954_v22 = vld [vmem:[#allocation6 + $0x1b4] ss:$8 sps:$4 sm:$0xff]  }
 0x2d9   :  { %1485 = vmatprep.mubr.bf16.mxu1 %v6933_v23 }
 0x2e0   :  { %1486 = vmatmul.mubr.bf16.gmra.mxu1 %v6935_v27 }
 0x2e1   :  { %1493 = vmatprep.mubr.bf16.mxu1 %v6936_v28 }
 0x2e8   :  { %1494 = vmatmul.mubr.bf16.gmra.mxu1 %v6938_v31 }
 0x2e9   :  { %1501 = vmatprep.mubr.bf16.mxu1 %v6939_v32 }
 0x2f0   :  { %1502 = vmatmul.mubr.bf16.gmra.mxu1 %v6941_v36 }
 0x2f1   :  { %1509 = vmatprep.mubr.bf16.mxu1 %v6942_v37 }
 0x2f8   :  { %1510 = vmatmul.mubr.bf16.gmra.mxu1 %v6944_v40  ;;  %v6956_v40 = vld [vmem:[#allocation6 + $0x1b0] ss:$8 sps:$4 sm:$0xff]  }
 0x2f9   :  { %1517 = vmatprep.mubr.bf16.mxu1 %v6945_v41 }
 0x300   :  { %v1327_v48 = vpop.f32.mrf.mxu1  ;;  %1518 = vmatmul.mubr.bf16.gmra.mxu1 %v6947_v44 }
 0x301   :  { %v1328_v49 = vadd.f32 %v1327_v48, %v656_v47  ;;  %1525 = vmatprep.mubr.bf16.mxu1 %v6948_v45  ;;  %v6962_v45 = vld [vmem:[#allocation6 + $0x1c4] ss:$8 sps:$4 sm:$0xff]  }
 0x302   :  { %v1329_v50 = vpop.f32.mrf.mxu1 }
 0x303   :  { %v1582_v51 = vmax.f32 %v1328_v49, 0.0 }
 0x304   :  { %v1330_v53 = vpop.f32.mrf.mxu1 }
 0x305   :  { %v6027_v55 = vpack.c.bf16 %v1582_v51, %v1582_v51  ;;  %v1331_v56 = vadd.f32 %v1330_v53, %v661_v52 }
 0x306   :  { %v1332_v58 = vpop.f32.mrf.mxu1 }
 0x307   :  { %1902 = vst [vmem:[#allocation3] sm:$0xf] %v6027_v55  ;;  %v1583_v62 = vmax.f32 %v1331_v56, 0.0 }
 0x308   :  { %v1335_v63 = vpop.f32.mrf.mxu1  ;;  %1526 = vmatmul.mubr.bf16.gmra.mxu1 %v6950_v54 }
 0x309   :  { %v6028_v2 = vpack.c.bf16 %v1583_v62, %v1583_v62  ;;  %v1336_v3 = vadd.f32 %v1335_v63, %v666_v5  ;;  %1533 = vmatprep.mubr.bf16.mxu1 %v6951_v57  ;;  %v6968_v57 = vld [vmem:[#allocation6 + $0x1d4] ss:$8 sps:$4 sm:$0xff]  }
 0x30a   :  { %v1337_v8 = vpop.f32.mrf.mxu1 }
 0x30b   :  { %1903 = vst [vmem:[#allocation3 + $0x8] sm:$0xf] %v6028_v2  ;;  %v1584_v9 = vmax.f32 %v1336_v3, 0.0  ;;  %v6963_v8 = vld [vmem:[#allocation3 + $0x24] ss:$8 sps:$4 sm:$0xff]  }
 0x30c   :  { %v1338_v13 = vpop.f32.mrf.mxu1 }
 0x30d   :  { %v6029_v17 = vpack.c.bf16 %v1584_v9, %v1584_v9  ;;  %v1339_v18 = vadd.f32 %v1338_v13, %v671_v42 }
 0x30e   :  { %v1340_v23 = vpop.f32.mrf.mxu1 }
 0x30f   :  { %1904 = vst [vmem:[#allocation3 + $0x10] sm:$0xf] %v6029_v17  ;;  %v1585_v27 = vmax.f32 %v1339_v18, 0.0 }
 0x310   :  { %v1343_v28 = vpop.f32.mrf.mxu1  ;;  %1534 = vmatmul.mubr.bf16.gmra.mxu1 %v6953_v14 }
 0x311   :  { %v6030_v31 = vpack.c.bf16 %v1585_v27, %v1585_v27  ;;  %v1344_v32 = vadd.f32 %v1343_v28, %v676_v34  ;;  %1541 = vmatprep.mubr.bf16.mxu1 %v6954_v22  ;;  %v6957_v34 = vld [vmem:[#allocation3 + $0x14] ss:$8 sps:$4 sm:$0xff]   ;;  %v6974_v22 = vld [vmem:[#allocation6 + $0x1e4] ss:$8 sps:$4 sm:$0xff]  }
 0x312   :  { %v1345_v36 = vpop.f32.mrf.mxu1  ;;  %2692 = vrot.lane.b32.xlu0 %v6957_v34, %s7233_s5 }
 0x313   :  { %1905 = vst [vmem:[#allocation3 + $0x18] sm:$0xf] %v6030_v31  ;;  %v1586_v37 = vmax.f32 %v1344_v32, 0.0  ;;  %v6969_v36 = vld [vmem:[#allocation3 + $0x34] ss:$8 sps:$4 sm:$0xff]  }
 0x314   :  { %v1346_v5 = vpop.f32.mrf.mxu1 }
 0x315   :  { %v6031_v41 = vpack.c.bf16 %v1586_v37, %v1586_v37  ;;  %v1347_v44 = vadd.f32 %v1346_v5, %v681_v35  ;;  %v6960_v35 = vld [vmem:[#allocation6 + $0x1c0] ss:$8 sps:$4 sm:$0xff]  }
 0x316   :  { %v1348_v47 = vpop.f32.mrf.mxu1  ;;  %2696 = vrot.lane.b32.xlu0 %v6963_v8, %s7233_s5 }
 0x317   :  { %1906 = vst [vmem:[#allocation3 + $0x20] sm:$0xf] %v6031_v41  ;;  %v1587_v42 = vmax.f32 %v1347_v44, 0.0 }
 0x318   :  { %v1351_v48 = vpop.f32.mrf.mxu1  ;;  %1542 = vmatmul.mubr.bf16.gmra.mxu1 %v6956_v40 }
 0x319   :  { %v6032_v49 = vpack.c.bf16 %v1587_v42, %v1587_v42  ;;  %v1352_v50 = vadd.f32 %v1351_v48, %v7630_v26  ;;  %1549 = vmatprep.mubr.bf16.mxu1 %v6962_v45  ;;  %v6980_v45 = vld [vmem:[#allocation6 + $0x1f4] ss:$8 sps:$4 sm:$0xff]  }
 0x31a   :  { %v1353_v51 = vpop.f32.mrf.mxu1  ;;  %v6959_v52 = vld [vmem:[#allocation3 + $0x10] ss:$8 sps:$4 sm:$0xff]   ;;  %2700 = vrot.lane.b32.xlu0 %v6969_v36, %s7233_s5 }
 0x31b   :  { %1907 = vst [vmem:[#allocation3 + $0x28] sm:$0xf] %v6032_v49  ;;  %v1588_v53 = vmax.f32 %v1352_v50, 0.0  ;;  %2690 = vrot.lane.b32.xlu1 %v6959_v52, %s7233_s5  ;;  %v6975_v51 = vld [vmem:[#allocation3 + $0x44] ss:$8 sps:$4 sm:$0xff]  }
 0x31c   :  { %v1354_v54 = vpop.f32.mrf.mxu1 }
 0x31d   :  { %v6033_v55 = vpack.c.bf16 %v1588_v53, %v1588_v53  ;;  %v1355_v56 = vadd.f32 %v1354_v54, %v7632_v29  ;;  %v6966_v29 = vld [vmem:[#allocation6 + $0x1d0] ss:$8 sps:$4 sm:$0xff]  }
 0x31e   :  { %v1356_v58 = vpop.f32.mrf.mxu1  ;;  %2704 = vrot.lane.b32.xlu0 %v6975_v51, %s7233_s5 }
 0x31f   :  { %1908 = vst [vmem:[#allocation3 + $0x30] sm:$0xf] %v6033_v55  ;;  %v1589_v62 = vmax.f32 %v1355_v56, 0.0 }
 0x320   :  { %v1359_v26 = vpop.f32.mrf.mxu1  ;;  %1550 = vmatmul.mubr.bf16.gmra.mxu1 %v6960_v35 }
 0x321   :  { %v6034_v63 = vpack.c.bf16 %v1589_v62, %v1589_v62  ;;  %v1360_v2 = vadd.f32 %v1359_v26, %v7622_v20  ;;  %1557 = vmatprep.mubr.bf16.mxu1 %v6968_v57  ;;  %v6981_v26 = vld [vmem:[#allocation3 + $0x54] ss:$8 sps:$4 sm:$0xff]  }
 0x322   :  { %v1361_v3 = vpop.f32.mrf.mxu1  ;;  %v6965_v9 = vld [vmem:[#allocation3 + $0x20] ss:$8 sps:$4 sm:$0xff]   ;;  %2708 = vrot.lane.b32.xlu0 %v6981_v26, %s7233_s5 }
 0x323   :  { %1909 = vst [vmem:[#allocation3 + $0x38] sm:$0xf] %v6034_v63  ;;  %v1590_v13 = vmax.f32 %v1360_v2, 0.0  ;;  %2694 = vrot.lane.b32.xlu1 %v6965_v9, %s7233_s5 }
 0x324   :  { %v1362_v14 = vpop.f32.mrf.mxu1 }
 0x325   :  { %v6035_v17 = vpack.c.bf16 %v1590_v13, %v1590_v13  ;;  %v1363_v18 = vadd.f32 %v1362_v14, %v7624_v21  ;;  %v6972_v21 = vld [vmem:[#allocation6 + $0x1e0] ss:$8 sps:$4 sm:$0xff]  }
 0x326   :  { %v1364_v23 = vpop.f32.mrf.mxu1 }
 0x327   :  { %1910 = vst [vmem:[#allocation3 + $0x40] sm:$0xf] %v6035_v17  ;;  %v1591_v27 = vmax.f32 %v1363_v18, 0.0  ;;  %v6984_v18 = vld [vmem:[#allocation3 + $0x64] ss:$8 sps:$4 sm:$0xff]  }
 0x328   :  { %v1367_v20 = vpop.f32.mrf.mxu1  ;;  %1558 = vmatmul.mubr.bf16.gmra.mxu1 %v6966_v29  ;;  %2712 = vrot.lane.b32.xlu0 %v6984_v18, %s7233_s5 }
 0x329   :  { %v6036_v28 = vpack.c.bf16 %v1591_v27, %v1591_v27  ;;  %v1368_v31 = vadd.f32 %v1367_v20, %v7614_v12  ;;  %1565 = vmatprep.mubr.bf16.mxu1 %v6974_v22 }
 0x32a   :  { %v1369_v32 = vpop.f32.mrf.mxu1  ;;  %v6971_v37 = vld [vmem:[#allocation3 + $0x30] ss:$8 sps:$4 sm:$0xff]  }
 0x32b   :  { %1911 = vst [vmem:[#allocation3 + $0x48] sm:$0xf] %v6036_v28  ;;  %v1592_v5 = vmax.f32 %v1368_v31, 0.0  ;;  %2698 = vrot.lane.b32.xlu1 %v6971_v37, %s7233_s5 }
 0x32c   :  { %v1370_v40 = vpop.f32.mrf.mxu1 }
 0x32d   :  { %v6037_v41 = vpack.c.bf16 %v1592_v5, %v1592_v5  ;;  %v1371_v44 = vadd.f32 %v1370_v40, %v7616_v15  ;;  %v6978_v15 = vld [vmem:[#allocation6 + $0x1f0] ss:$8 sps:$4 sm:$0xff]   ;;  %v6987_v5 = vld [vmem:[#allocation3 + $0x74] ss:$8 sps:$4 sm:$0xff]  }
 0x32e   :  { %v1372_v47 = vpop.f32.mrf.mxu1  ;;  %2716 = vrot.lane.b32.xlu0 %v6987_v5, %s7233_s5 }
 0x32f   :  { %1912 = vst [vmem:[#allocation3 + $0x50] sm:$0xf] %v6037_v41  ;;  %v1593_v42 = vmax.f32 %v1371_v44, 0.0 }
 0x330   :  { %v1375_v12 = vpop.f32.mrf.mxu1  ;;  %1566 = vmatmul.mubr.bf16.gmra.mxu1 %v6972_v21 }
 0x331   :  { %v6038_v48 = vpack.c.bf16 %v1593_v42, %v1593_v42  ;;  %v1376_v49 = vadd.f32 %v1375_v12, %v7606_v6  ;;  %1573 = vmatprep.mubr.bf16.mxu1 %v6980_v45 }
 0x332   :  { %v1377_v50 = vpop.f32.mrf.mxu1  ;;  %v6977_v34 = vld [vmem:[#allocation3 + $0x40] ss:$8 sps:$4 sm:$0xff]  }
 0x333   :  { %1913 = vst [vmem:[#allocation3 + $0x58] sm:$0xf] %v6038_v48  ;;  %v1594_v52 = vmax.f32 %v1376_v49, 0.0  ;;  %2702 = vrot.lane.b32.xlu1 %v6977_v34, %s7233_s5 }
 0x334   :  { %v1378_v53 = vpop.f32.mrf.mxu1 }
 0x335   :  { %v6039_v54 = vpack.c.bf16 %v1594_v52, %v1594_v52  ;;  %v1379_v35 = vadd.f32 %v1378_v53, %v7608_v7 }
 0x336   :  { %v1380_v55 = vpop.f32.mrf.mxu1 }
 0x337   :  { %1914 = vst [vmem:[#allocation3 + $0x60] sm:$0xf] %v6039_v54  ;;  %v1595_v56 = vmax.f32 %v1379_v35, 0.0  ;;  %v6990_v55 = vld [vmem:[#allocation3 + $0x94] ss:$8 sps:$4 sm:$0xff]  }
 0x338   :  { %v1383_v57 = vpop.f32.mrf.mxu1  ;;  %1574 = vmatmul.mubr.bf16.gmra.mxu1 %v6978_v15  ;;  %2724 = vrot.lane.b32.xlu0 %v6990_v55, %s7233_s5 }
 0x339   :  { %v6040_v6 = vpack.c.bf16 %v1595_v56, %v1595_v56  ;;  %v1384_v58 = vadd.f32 %v1383_v57, %v7598_v61 }
 0x33a   :  { %v1385_v62 = vpop.f32.mrf.mxu1  ;;  %v6983_v63 = vld [vmem:[#allocation3 + $0x50] ss:$8 sps:$4 sm:$0xff]  }
 0x33b   :  { %1915 = vst [vmem:[#allocation3 + $0x68] sm:$0xf] %v6040_v6  ;;  %v1596_v2 = vmax.f32 %v1384_v58, 0.0  ;;  %2706 = vrot.lane.b32.xlu1 %v6983_v63, %s7233_s5 }
 0x33c   :  { %v1386_v3 = vpop.f32.mrf.mxu1 }
 0x33d   :  { %v6041_v8 = vpack.c.bf16 %v1596_v2, %v1596_v2  ;;  %v1387_v7 = vadd.f32 %v1386_v3, %v7600_v0  ;;  %v6993_v3 = vld [vmem:[#allocation3 + $0xa4] ss:$8 sps:$4 sm:$0xff]  }
 0x33e   :  { %v1388_v9 = vpop.f32.mrf.mxu1  ;;  %2728 = vrot.lane.b32.xlu0 %v6993_v3, %s7233_s5  ;;  %v645_v3 = vld [vmem:[%s9611_s4 + $0x1c0] sm:$0xff] }
 0x33f   :  { %1916 = vst [vmem:[#allocation3 + $0x70] sm:$0xf] %v6041_v8  ;;  %v1597_v13 = vmax.f32 %v1387_v7, 0.0 }
 0x340   :  { %v1391_v14 = vpop.f32.mrf.mxu1 }
 0x341   :  { %v6042_v29 = vpack.c.bf16 %v1597_v13, %v1597_v13  ;;  %v1392_v61 = vadd.f32 %v1391_v14, %v7642_v43 }
 0x342   :  { %v1393_v17 = vpop.f32.mrf.mxu1  ;;  %v6986_v22 = vld [vmem:[#allocation3 + $0x60] ss:$8 sps:$4 sm:$0xff]  }
 0x343   :  { %1917 = vst [vmem:[#allocation3 + $0x78] sm:$0xf] %v6042_v29  ;;  %v1598_v23 = vmax.f32 %v1392_v61, 0.0  ;;  %2710 = vrot.lane.b32.xlu1 %v6986_v22, %s7233_s5  ;;  %v6996_v22 = vld [vmem:[#allocation3 + $0xb4] ss:$8 sps:$4 sm:$0xff]  }
 0x344   :  { %v1394_v27 = vpop.f32.mrf.mxu1  ;;  %2732 = vrot.lane.b32.xlu0 %v6996_v22, %s7233_s5 }
 0x345   :  { %v6043_v20 = vpack.c.bf16 %v1598_v23, %v1598_v23  ;;  %v1395_v0 = vadd.f32 %v1394_v27, %v7644_v46 }
 0x346   :  { %v1396_v28 = vpop.f32.mrf.mxu1 }
 0x347   :  { %1918 = vst [vmem:[#allocation3 + $0x80] sm:$0xf] %v6043_v20  ;;  %v1599_v31 = vmax.f32 %v1395_v0, 0.0 }
 0x348   :  { %v1399_v32 = vpop.f32.mrf.mxu1 }
 0x349   :  { %v6044_v36 = vpack.c.bf16 %v1599_v31, %v1599_v31  ;;  %v1400_v43 = vadd.f32 %v1399_v32, %v7638_v38 }
 0x34a   :  { %v1401_v37 = vpop.f32.mrf.mxu1  ;;  %v6989_v40 = vld [vmem:[#allocation3 + $0x70] ss:$8 sps:$4 sm:$0xff]  }
 0x34b   :  { %1919 = vst [vmem:[#allocation3 + $0x88] sm:$0xf] %v6044_v36  ;;  %v1600_v21 = vmax.f32 %v1400_v43, 0.0  ;;  %2714 = vrot.lane.b32.xlu1 %v6989_v40, %s7233_s5  ;;  %v6999_v37 = vld [vmem:[#allocation3 + $0xc4] ss:$8 sps:$4 sm:$0xff]  }
 0x34c   :  { %v1402_v41 = vpop.f32.mrf.mxu1  ;;  %2736 = vrot.lane.b32.xlu0 %v6999_v37, %s7233_s5 }
 0x34d   :  { %v6045_v44 = vpack.c.bf16 %v1600_v21, %v1600_v21  ;;  %v1403_v46 = vadd.f32 %v1402_v41, %v7640_v39 }
 0x34e   :  { %v1404_v45 = vpop.f32.mrf.mxu1 }
 0x34f   :  { %1920 = vst [vmem:[#allocation3 + $0x90] sm:$0xf] %v6045_v44  ;;  %v1601_v47 = vmax.f32 %v1403_v46, 0.0 }
 0x350   :  { %v1407_v42 = vpop.f32.mrf.mxu1 }
 0x351   :  { %v6046_v12 = vpack.c.bf16 %v1601_v47, %v1601_v47  ;;  %v1408_v38 = vadd.f32 %v1407_v42, %v7634_v30 }
 0x352   :  { %v1409_v48 = vpop.f32.mrf.mxu1 }
 0x353   :  { %1921 = vst [vmem:[#allocation3 + $0x98] sm:$0xf] %v6046_v12  ;;  %v1602_v49 = vmax.f32 %v1408_v38, 0.0  ;;  %v7002_v12 = vld [vmem:[#allocation3 + $0xd4] ss:$8 sps:$4 sm:$0xff]  }
 0x354   :  { %v1410_v50 = vpop.f32.mrf.mxu1  ;;  %2740 = vrot.lane.b32.xlu0 %v7002_v12, %s7233_s5 }
 0x355   :  { %v6047_v51 = vpack.c.bf16 %v1602_v49, %v1602_v49  ;;  %v1411_v34 = vadd.f32 %v1410_v50, %v7636_v33 }
 0x356   :  { %v1412_v52 = vpop.f32.mrf.mxu1 }
 0x357   :  { %1922 = vst [vmem:[#allocation3 + $0xa0] sm:$0xf] %v6047_v51  ;;  %v1603_v53 = vmax.f32 %v1411_v34, 0.0 }
 0x358   :  { %v1415_v15 = vpop.f32.mrf.mxu1 }
 0x359   :  { %v6048_v54 = vpack.c.bf16 %v1603_v53, %v1603_v53  ;;  %v1416_v39 = vadd.f32 %v1415_v15, %v7626_v24  ;;  %v7005_v15 = vld [vmem:[#allocation3 + $0xe4] ss:$8 sps:$4 sm:$0xff]  }
 0x35a   :  { %v1417_v35 = vpop.f32.mrf.mxu1  ;;  %v6992_v56 = vld [vmem:[#allocation3 + $0x90] ss:$8 sps:$4 sm:$0xff]   ;;  %2744 = vrot.lane.b32.xlu0 %v7005_v15, %s7233_s5 }
 0x35b   :  { %1923 = vst [vmem:[#allocation3 + $0xa8] sm:$0xf] %v6048_v54  ;;  %v1604_v57 = vmax.f32 %v1416_v39, 0.0  ;;  %2722 = vrot.lane.b32.xlu1 %v6992_v56, %s7233_s5 }
 0x35c   :  { %v1418_v30 = vpop.f32.mrf.mxu1 }
 0x35d   :  { %v6049_v6 = vpack.c.bf16 %v1604_v57, %v1604_v57  ;;  %v1419_v33 = vadd.f32 %v1418_v30, %v7628_v25  ;;  %v7008_v57 = vld [vmem:[#allocation3 + $0xf4] ss:$8 sps:$4 sm:$0xff]  }
 0x35e   :  { %v1420_v58 = vpop.f32.mrf.mxu1  ;;  %2748 = vrot.lane.b32.xlu0 %v7008_v57, %s7233_s5 }
 0x35f   :  { %1924 = vst [vmem:[#allocation3 + $0xb0] sm:$0xf] %v6049_v6  ;;  %v1605_v62 = vmax.f32 %v1419_v33, 0.0  ;;  %v7710_v33 = vpop.permute.xlu0 %970 }
 0x360   :  { %v1423_v26 = vpop.f32.mrf.mxu1 }
 0x361   :  { %v6050_v63 = vpack.c.bf16 %v1605_v62, %v1605_v62  ;;  %v1424_v24 = vadd.f32 %v1423_v26, %v7618_v16  ;;  %v7011_v62 = vld [vmem:[#allocation3 + $0x84] ss:$8 sps:$4 sm:$0xff]   ;;  %v7013_v26 = vld [vmem:[#allocation3 + $0x80] ss:$8 sps:$4 sm:$0xff]  }
 0x362   :  { %v1425_v2 = vpop.f32.mrf.mxu1  ;;  %v6995_v8 = vld [vmem:[#allocation3 + $0xa0] ss:$8 sps:$4 sm:$0xff]   ;;  %2720 = vrot.lane.b32.xlu0 %v7011_v62, %s7233_s5 }
 0x363   :  { %1925 = vst [vmem:[#allocation3 + $0xb8] sm:$0xf] %v6050_v63  ;;  %v1606_v7 = vmax.f32 %v1424_v24, 0.0  ;;  %2726 = vrot.lane.b32.xlu1 %v6995_v8, %s7233_s5  ;;  %v646_v2 = vld [vmem:[%s9611_s4 + $0x1c8] sm:$0xff] }
 0x364   :  { %v1426_v9 = vpop.f32.mrf.mxu1 }
 0x365   :  { %v6051_v13 = vpack.c.bf16 %v1606_v7, %v1606_v7  ;;  %v1427_v25 = vadd.f32 %v1426_v9, %v7620_v19  ;;  %v7724_v7 = vpop.permute.xlu0 %890 }
 0x366   :  { %v1428_v14 = vpop.f32.mrf.mxu1  ;;  %940 = vperm.xlu0 %6847, %v646_v2   ;;  %v637_v2 = vld [vmem:[%s9611_s4 + $0x180] sm:$0xff] }
 0x367   :  { %1926 = vst [vmem:[#allocation3 + $0xc0] sm:$0xf] %v6051_v13  ;;  %v1607_v29 = vmax.f32 %v1427_v25, 0.0  ;;  %v7014_v14 = vld [vmem:[#allocation3 + $0x4] ss:$8 sps:$4 sm:$0xff]  }
 0x368   :  { %v1431_v61 = vpop.f32.mrf.mxu1 }
 0x369   :  { %v6052_v17 = vpack.c.bf16 %v1607_v29, %v1607_v29  ;;  %v1432_v16 = vadd.f32 %v1431_v61, %v7610_v10  ;;  %v7016_v29 = vld [vmem:[#allocation3] ss:$8 sps:$4 sm:$0xff]  }
 0x36a   :  { %v1433_v18 = vpop.f32.mrf.mxu1  ;;  %v6998_v23 = vld [vmem:[#allocation3 + $0xb0] ss:$8 sps:$4 sm:$0xff]   ;;  %2688 = vrot.lane.b32.xlu0 %v7014_v14, %s7233_s5 }
 0x36b   :  { %1927 = vst [vmem:[#allocation3 + $0xc8] sm:$0xf] %v6052_v17  ;;  %v1608_v27 = vmax.f32 %v1432_v16, 0.0  ;;  %2730 = vrot.lane.b32.xlu1 %v6998_v23, %s7233_s5  ;;  %v630_v17 = vld [vmem:[%s9611_s4 + $0x148] sm:$0xff]  ;;  %v629_v16 = vld [vmem:[%s9611_s4 + $0x140] sm:$0xff]  ;;  %v7740_v18 = vpop.permute.xlu0 %960 }
 0x36c   :  { %v1434_v20 = vpop.f32.mrf.mxu1 }
 0x36d   :  { %v6053_v0 = vpack.c.bf16 %v1608_v27, %v1608_v27  ;;  %v1435_v19 = vadd.f32 %v1434_v20, %v7612_v11  ;;  %v644_v20 = vld [vmem:[%s9611_s4 + $0x1b8] sm:$0xff] }
 0x36e   :  { %v1436_v28 = vpop.f32.mrf.mxu1  ;;  %860 = vperm.xlu0 %6847, %v630_v17   ;;  %v622_v17 = vld [vmem:[%s9611_s4 + $0x108] sm:$0xff] }
 0x36f   :  { %1928 = vst [vmem:[#allocation3 + $0xd0] sm:$0xf] %v6053_v0  ;;  %v1609_v31 = vmax.f32 %v1435_v19, 0.0  ;;  %v643_v0 = vld [vmem:[%s9611_s4 + $0x1b0] sm:$0xff]  ;;  %v881_v28 = vpop.permute.xlu0 %880 }
 0x370   :  { %v1439_v32 = vpop.f32.mrf.mxu1 }
 0x371   :  { %v6054_v36 = vpack.c.bf16 %v1609_v31, %v1609_v31  ;;  %v1440_v10 = vadd.f32 %v1439_v32, %v7602_v1  ;;  %v628_v32 = vld [vmem:[%s9611_s4 + $0x138] sm:$0xff] }
 0x372   :  { %v1441_v43 = vpop.f32.mrf.mxu1  ;;  %v7001_v5 = vld [vmem:[#allocation3 + $0xc0] ss:$8 sps:$4 sm:$0xff]   ;;  %930 = vperm.xlu0 %6847, %v644_v20  }
 0x373   :  { %1929 = vst [vmem:[#allocation3 + $0xd8] sm:$0xf] %v6054_v36  ;;  %v1610_v40 = vmax.f32 %v1440_v10, 0.0  ;;  %2734 = vrot.lane.b32.xlu1 %v7001_v5, %s7233_s5  ;;  %v627_v36 = vld [vmem:[%s9611_s4 + $0x130] sm:$0xff]  ;;  %v642_v5 = vld [vmem:[%s9611_s4 + $0x1a8] sm:$0xff] }
 0x374   :  { %v1442_v21 = vpop.f32.mrf.mxu1 }
 0x375   :  { %v6055_v41 = vpack.c.bf16 %v1610_v40, %v1610_v40  ;;  %v1443_v11 = vadd.f32 %v1442_v21, %v7604_v4  ;;  %v641_v40 = vld [vmem:[%s9611_s4 + $0x1a0] sm:$0xff]  ;;  %v7768_v21 = vpop.permute.xlu0 %950 }
 0x376   :  { %v1444_v44 = vpop.f32.mrf.mxu1  ;;  %850 = vperm.xlu0 %6847, %v628_v32  }
 0x377   :  { %1930 = vst [vmem:[#allocation3 + $0xe0] sm:$0xf] %v6055_v41  ;;  %v1611_v46 = vmax.f32 %v1443_v11, 0.0 }
 0x378   :  { %v1447_v45 = vpop.f32.mrf.mxu1 }
 0x379   :  { %v6056_v47 = vpack.c.bf16 %v1611_v46, %v1611_v46  ;;  %v1448_v1 = vadd.f32 %v1447_v45, %v7594_v59  ;;  %v626_v45 = vld [vmem:[%s9611_s4 + $0x128] sm:$0xff]  ;;  %v871_v12 = vpop.permute.xlu0 %870 }
 0x37a   :  { %v1449_v42 = vpop.f32.mrf.mxu1  ;;  %v7004_v38 = vld [vmem:[#allocation3 + $0xd0] ss:$8 sps:$4 sm:$0xff]   ;;  %920 = vperm.xlu0 %6847, %v642_v5  }
 0x37b   :  { %1931 = vst [vmem:[#allocation3 + $0xe8] sm:$0xf] %v6056_v47  ;;  %v1612_v48 = vmax.f32 %v1448_v1, 0.0  ;;  %2738 = vrot.lane.b32.xlu1 %v7004_v38, %s7233_s5  ;;  %v625_v47 = vld [vmem:[%s9611_s4 + $0x120] sm:$0xff] }
 0x37c   :  { %v1450_v49 = vpop.f32.mrf.mxu1 }
 0x37d   :  { %v6057_v50 = vpack.c.bf16 %v1612_v48, %v1612_v48  ;;  %v1451_v4 = vadd.f32 %v1450_v49, %v7596_v60  ;;  %v7704_v60 = vpop.permute.xlu1 %965 }
 0x37e   :  { %v1452_v51 = vpop.f32.mrf.mxu1  ;;  %840 = vperm.xlu0 %6847, %v626_v45  }
 0x37f   :  { %1932 = vst [vmem:[#allocation3 + $0xf0] sm:$0xf] %v6057_v50  ;;  %v1613_v34 = vmax.f32 %v1451_v4, 0.0  ;;  %v640_v50 = vld [vmem:[%s9611_s4 + $0x198] sm:$0xff]  ;;  %v639_v4 = vld [vmem:[%s9611_s4 + $0x190] sm:$0xff] }
 0x380   :  { %v7696_v52 = vpop.f32.mrf.mxu1 }
 0x381   :  { %9626 = vst [vmem:[#allocation11_spill] sm:$0xff] %v7696_v52  ;;  %v6058_v53 = vpack.c.bf16 %v1613_v34, %v1613_v34  ;;  %v7712_v63 = vpop.permute.xlu1 %885 }
 0x382   :  { %v1457_v59 = vpop.f32.mrf.mxu1  ;;  %v7007_v54 = vld [vmem:[#allocation3 + $0xe0] ss:$8 sps:$4 sm:$0xff]   ;;  %910 = vperm.xlu0 %6847, %v640_v50  }
 0x383   :  { %1933 = vst [vmem:[#allocation3 + $0xf8] sm:$0xf] %v6058_v53  ;;  %2742 = vrot.lane.b32.xlu1 %v7007_v54, %s7233_s5  ;;  %v624_v54 = vld [vmem:[%s9611_s4 + $0x118] sm:$0xff] }
 0x384   :  { %v7698_v39 = vpop.f32.mrf.mxu1 }
 0x385   :  { %9627 = vst [vmem:[#allocation12_spill] sm:$0xff] %v7698_v39  ;;  %v7728_v13 = vpop.permute.xlu1 %955 }
 0x386   :  { %v1460_v35 = vpop.f32.mrf.mxu1  ;;  %830 = vperm.xlu0 %6847, %v624_v54  }
 0x387   :  { %v623_v35 = vld [vmem:[%s9611_s4 + $0x110] sm:$0xff] }
 0x388   :  { %v7702_v55 = vpop.f32.mrf.mxu1 }
 0x389   :  { %v876_v23 = vpop.permute.xlu1 %875 }
 0x38a   :  { %v1465_v56 = vpop.f32.mrf.mxu1  ;;  %v7010_v30 = vld [vmem:[#allocation3 + $0xf0] ss:$8 sps:$4 sm:$0xff]  }
 0x38b   :  { %2746 = vrot.lane.b32.xlu1 %v7010_v30, %s7233_s5 }
 0x38c   :  { %v7706_v6 = vpop.f32.mrf.mxu1 }
 0x38d   :  { %v7758_v10 = vpop.permute.xlu1 %945 }
 0x38e   :  { %v1468_v58 = vpop.f32.mrf.mxu1 }
 0x38f   :  { %2718 = vrot.lane.b32.xlu1 %v7013_v26, %s7233_s5  ;;  %v638_v26 = vld [vmem:[%s9611_s4 + $0x188] sm:$0xff] }
 0x390   :  { %v7714_v24 = vpop.f32.mrf.mxu1  ;;  %900 = vperm.xlu0 %6847, %v638_v26  }
 0x391   :  { %v866_v11 = vpop.permute.xlu1 %865 }
 0x392   :  { %v1473_v8 = vpop.f32.mrf.mxu1 }
 0x393   :  { %935 = vperm.xlu1 %6848, %v645_v3  }
 0x394   :  { %v7726_v9 = vpop.f32.mrf.mxu1  ;;  %820 = vperm.xlu0 %6847, %v622_v17  }
 0x396   :  { %v1476_v25 = vpop.f32.mrf.mxu1 }
 0x397   :  { %2686 = vrot.lane.b32.xlu1 %v7016_v29, %s7233_s5 }
 0x398   :  { %v7730_v61 = vpop.f32.mrf.mxu1 }
 0x39a   :  { %v1481_v22 = vpop.f32.mrf.mxu1 }
 0x39b   :  { %855 = vperm.xlu1 %6848, %v629_v16   ;;  %v621_v16 = vld [vmem:[%s9611_s4 + $0x100] sm:$0xff] }
 0x39c   :  { %v7742_v27 = vpop.f32.mrf.mxu1 }
 0x39e   :  { %v1484_v19 = vpop.f32.mrf.mxu1 }
 0x39f   :  { %925 = vperm.xlu1 %6848, %v643_v0  }
 0x3a0   :  { %v7750_v31 = vpop.f32.mrf.mxu1 }
 0x3a2   :  { %v1489_v43 = vpop.f32.mrf.mxu1 }
 0x3a3   :  { %845 = vperm.xlu1 %6848, %v627_v36  }
 0x3a4   :  { %v7760_v37 = vpop.f32.mrf.mxu1 }
 0x3a6   :  { %v1492_v41 = vpop.f32.mrf.mxu1 }
 0x3a7   :  { %915 = vperm.xlu1 %6848, %v641_v40  }
 0x3a8   :  { %v1495_v44 = vpop.f32.mrf.mxu1 }
 0x3a9   :  { %v1496_v46 = vadd.f32 %v1495_v44, %v866_v11  ;;  %v7808_v11 = vpop.permute.xlu0 %2692  ;;  %v7810_v44 = vpop.permute.xlu1 %2690 }
 0x3aa   :  { %v1497_v1 = vpop.f32.mrf.mxu1 }
 0x3ab   :  { %v1624_v42 = vmax.f32 %v1496_v46, 0.0  ;;  %835 = vperm.xlu1 %6848, %v625_v47  }
 0x3ac   :  { %v1498_v38 = vpop.f32.mrf.mxu1 }
 0x3ad   :  { %v6069_v48 = vpack.c.bf16 %v1624_v42, %v1624_v42  ;;  %v1499_v49 = vadd.f32 %v1498_v38, %v871_v12  ;;  %v7816_v47 = vpop.permute.xlu1 %2694 }
 0x3ae   :  { %v1500_v51 = vpop.f32.mrf.mxu1 }
 0x3af   :  { %1944 = vst [vmem:[#allocation3 + $0x150] sm:$0xf] %v6069_v48  ;;  %v1625_v34 = vmax.f32 %v1499_v49, 0.0  ;;  %905 = vperm.xlu1 %6848, %v639_v4  }
 0x3b0   :  { %v1503_v53 = vpop.f32.mrf.mxu1 }
 0x3b1   :  { %v6070_v59 = vpack.c.bf16 %v1625_v34, %v1625_v34  ;;  %v1504_v15 = vadd.f32 %v1503_v53, %v876_v23  ;;  %v7822_v38 = vpop.permute.xlu1 %2698 }
 0x3b2   :  { %v1505_v56 = vpop.f32.mrf.mxu1 }
 0x3b3   :  { %1945 = vst [vmem:[#allocation3 + $0x158] sm:$0xf] %v6070_v59  ;;  %v1626_v57 = vmax.f32 %v1504_v15, 0.0  ;;  %825 = vperm.xlu1 %6848, %v623_v35  }
 0x3b4   :  { %v1506_v30 = vpop.f32.mrf.mxu1 }
 0x3b5   :  { %v6071_v58 = vpack.c.bf16 %v1626_v57, %v1626_v57  ;;  %v1507_v62 = vadd.f32 %v1506_v30, %v881_v28  ;;  %v7828_v4 = vpop.permute.xlu1 %2702 }
 0x3b6   :  { %v1508_v3 = vpop.f32.mrf.mxu1 }
 0x3b7   :  { %1946 = vst [vmem:[#allocation3 + $0x160] sm:$0xf] %v6071_v58  ;;  %v1627_v8 = vmax.f32 %v1507_v62, 0.0  ;;  %895 = vperm.xlu1 %6848, %v637_v2  }
 0x3b8   :  { %v1511_v25 = vpop.f32.mrf.mxu1 }
 0x3b9   :  { %v6072_v14 = vpack.c.bf16 %v1627_v8, %v1627_v8  ;;  %v1512_v29 = vadd.f32 %v1511_v25, %v7712_v63  ;;  %v7834_v59 = vpop.permute.xlu1 %2706 }
 0x3ba   :  { %v1513_v22 = vpop.f32.mrf.mxu1 }
 0x3bb   :  { %1947 = vst [vmem:[#allocation3 + $0x168] sm:$0xf] %v6072_v14  ;;  %v1628_v23 = vmax.f32 %v1512_v29, 0.0  ;;  %815 = vperm.xlu1 %6848, %v621_v16  }
 0x3bc   :  { %v1514_v20 = vpop.f32.mrf.mxu1 }
 0x3bd   :  { %v6073_v0 = vpack.c.bf16 %v1628_v23, %v1628_v23  ;;  %v1515_v19 = vadd.f32 %v1514_v20, %v7724_v7  ;;  %v7814_v7 = vpop.permute.xlu0 %2696  ;;  %v7840_v56 = vpop.permute.xlu1 %2710 }
 0x3be   :  { %v1516_v28 = vpop.f32.mrf.mxu1 }
 0x3bf   :  { %1948 = vst [vmem:[#allocation3 + $0x170] sm:$0xf] %v6073_v0  ;;  %v1629_v63 = vmax.f32 %v1515_v19, 0.0 }
 0x3c0   :  { %v7802_v32 = vpop.f32.mrf.mxu1 }
 0x3c1   :  { %v6074_v36 = vpack.c.bf16 %v1629_v63, %v1629_v63  ;;  %v7820_v12 = vpop.permute.xlu0 %2700  ;;  %v2715_v62 = vpop.permute.xlu1 %2714 }
 0x3c2   :  { %v1521_v43 = vpop.f32.mrf.mxu1 }
 0x3c3   :  { %1949 = vst [vmem:[#allocation3 + $0x178] sm:$0xf] %v6074_v36 }
 0x3c4   :  { %v7804_v5 = vpop.f32.mrf.mxu1 }
 0x3c5   :  { %v7826_v50 = vpop.permute.xlu0 %2704 }
 0x3c6   :  { %v1524_v40 = vpop.f32.mrf.mxu1 }
 0x3c8   :  { %v7806_v41 = vpop.f32.mrf.mxu1 }
 0x3c9   :  { %v7832_v53 = vpop.permute.xlu0 %2708 }
 0x3ca   :  { %v1529_v46 = vpop.f32.mrf.mxu1 }
 0x3cc   :  { %v7812_v45 = vpop.f32.mrf.mxu1 }
 0x3cd   :  { %v7838_v35 = vpop.permute.xlu0 %2712  ;;  %v7848_v8 = vpop.permute.xlu1 %2722 }
 0x3ce   :  { %v1532_v1 = vpop.f32.mrf.mxu1 }
 0x3d0   :  { %v7818_v42 = vpop.f32.mrf.mxu1 }
 0x3d1   :  { %v2717_v58 = vpop.permute.xlu0 %2716 }
 0x3d2   :  { %v1537_v48 = vpop.f32.mrf.mxu1 }
 0x3d4   :  { %v7824_v49 = vpop.f32.mrf.mxu1 }
 0x3d5   :  { %v7846_v3 = vpop.permute.xlu0 %2724  ;;  %v7853_v16 = vpop.permute.xlu1 %2726 }
 0x3d6   :  { %v1540_v51 = vpop.f32.mrf.mxu1 }
 0x3d8   :  { %v7830_v34 = vpop.f32.mrf.mxu1 }
 0x3d9   :  { %v7850_v29 = vpop.permute.xlu0 %2728 }
 0x3da   :  { %v1545_v15 = vpop.f32.mrf.mxu1 }
 0x3db   :  { %v7861_v15 = vld [vmem:[#allocation8 + $0x10] sm:$0xff] }
 0x3dc   :  { %v7836_v54 = vpop.f32.mrf.mxu1 }
 0x3dd   :  { %v7855_v0 = vpop.permute.xlu0 %2732  ;;  %v7858_v63 = vpop.permute.xlu1 %2730 }
 0x3de   :  { %v1548_v57 = vpop.f32.mrf.mxu1 }
 0x3df   :  { %v7863_v57 = vld [vmem:[#allocation8 + $0x50] sm:$0xff] }
 0x3e0   :  { %v7842_v30 = vpop.f32.mrf.mxu1 }
 0x3e1   :  { %v2737_v46 = vpop.permute.xlu0 %2736 }
 0x3e2   :  { %v1553_v26 = vpop.f32.mrf.mxu1 }
 0x3e4   :  { %v7844_v2 = vpop.f32.mrf.mxu1 }
 0x3e5   :  { %v2735_v48 = vpop.permute.xlu1 %2734 }
 0x3e6   :  { %v1556_v25 = vpop.f32.mrf.mxu1 }
 0x3e8   :  { %v1559_v14 = vpop.f32.mrf.mxu1 }
 0x3e9   :  { %v1560_v17 = vadd.f32 %v1559_v14, %v7758_v10  ;;  %v2741_v14 = vpop.permute.xlu0 %2740 }
 0x3ea   :  { %v1561_v22 = vpop.f32.mrf.mxu1 }
 0x3eb   :  { %v1640_v23 = vmax.f32 %v1560_v17, 0.0 }
 0x3ec   :  { %v1562_v20 = vpop.f32.mrf.mxu1 }
 0x3ed   :  { %v6085_v19 = vpack.c.bf16 %v1640_v23, %v1640_v23  ;;  %v1563_v28 = vadd.f32 %v1562_v20, %v7768_v21  ;;  %v5732_v21 = vcombine.high %v7861_v15, %v7863_v57  ;;  %v2739_v23 = vpop.permute.xlu1 %2738 }
 0x3ee   :  { %v1564_v36 = vpop.f32.mrf.mxu1 }
 0x3ef   :  { %1960 = vst [vmem:[#allocation3 + $0x1d0] sm:$0xf] %v6085_v19  ;;  %v1641_v43 = vmax.f32 %v1563_v28, 0.0  ;;  %2910 = vmatprep.mubr.bf16.mxu0 %v5732_v21  ;;  %v2745_v36 = vpop.permute.xlu0 %2744 }
 0x3f0   :  { %v1567_v40 = vpop.f32.mrf.mxu1 }
 0x3f1   :  { %v6086_v1 = vpack.c.bf16 %v1641_v43, %v1641_v43  ;;  %v1568_v10 = vadd.f32 %v1567_v40, %v7728_v13 }
 0x3f2   :  { %v1569_v51 = vpop.f32.mrf.mxu1 }
 0x3f3   :  { %1961 = vst [vmem:[#allocation3 + $0x1d8] sm:$0xf] %v6086_v1  ;;  %v1642_v26 = vmax.f32 %v1568_v10, 0.0  ;;  %v2749_v39 = vpop.permute.xlu0 %2748 }
 0x3f4   :  { %v1570_v25 = vpop.f32.mrf.mxu1 }
 0x3f5   :  { %v6087_v17 = vpack.c.bf16 %v1642_v26, %v1642_v26  ;;  %v1571_v22 = vadd.f32 %v1570_v25, %v7740_v18  ;;  %v2743_v40 = vpop.permute.xlu1 %2742 }
 0x3f6   :  { %v1572_v20 = vpop.f32.mrf.mxu1 }
 0x3f7   :  { %1962 = vst [vmem:[#allocation3 + $0x1e0] sm:$0xf] %v6087_v17  ;;  %v1643_v13 = vmax.f32 %v1571_v22, 0.0  ;;  %v2821_v22 = vsel %vm162_vm3, %v2715_v62, %v2717_v58  ;;  %v2826_v58 = vsel %vm162_vm3, %v2735_v48, %v2737_v46  ;;  %v7020_v48 = vld [vmem:[#allocation3 + $0x160] ss:$8 sps:$4 sm:$0xff]  }
 0x3f8   :  { %v1575_v19 = vpop.f32.mrf.mxu1 }
 0x3f9   :  { %v6088_v28 = vpack.c.bf16 %v1643_v13, %v1643_v13  ;;  %v1576_v43 = vadd.f32 %v1575_v19, %v7704_v60  ;;  %v2828_v60 = vsel %vm162_vm3, %v2743_v40, %v2745_v36  ;;  %v2721_v13 = vpop.permute.xlu0 %2720 }
 0x3fa   :  { %v1577_v1 = vpop.f32.mrf.mxu1 }
 0x3fb   :  { %1963 = vst [vmem:[#allocation3 + $0x1e8] sm:$0xf] %v6088_v28  ;;  %v1644_v10 = vmax.f32 %v1576_v43, 0.0  ;;  %v7018_v28 = vld [vmem:[#allocation3 + $0x170] ss:$8 sps:$4 sm:$0xff]  }
 0x3fc   :  { %v1578_v51 = vpop.f32.mrf.mxu1  ;;  %v7022_v1 = vld [vmem:[#allocation3 + $0x150] ss:$8 sps:$4 sm:$0xff]  }
 0x3fd   :  { %v6089_v52 = vpack.c.bf16 %v1644_v10, %v1644_v10  ;;  %v1579_v26 = vadd.f32 %v1578_v51, %v7710_v33  ;;  %v2747_v18 = vpop.permute.xlu1 %2746  ;;  %v2820_v33 = vsel %vm162_vm3, %v7840_v56, %v7838_v35  ;;  %v2818_v35 = vsel %vm162_vm3, %v7828_v4, %v7826_v50  ;;  %v7021_v4 = vld [vmem:[#allocation3 + $0x1d0] ss:$8 sps:$4 sm:$0xff]  }
 0x3fe   :  { %v2829_v25 = vsel %vm162_vm3, %v2747_v18, %v2749_v39  ;;  %v1580_v17 = vpop.f32.mrf.mxu1  ;;  %v2819_v39 = vsel %vm162_vm3, %v7834_v59, %v7832_v53  ;;  %v2825_v53 = vsel %vm162_vm3, %v7858_v63, %v7855_v0  ;;  %v941_v59 = vpop.permute.xlu0 %940  ;;  %v2824_v0 = vsel %vm162_vm3, %v7853_v16, %v7850_v29 }
 0x3ff   :  { %1964 = vst [vmem:[#allocation3 + $0x1f0] sm:$0xf] %v6089_v52  ;;  %v1645_v21 = vmax.f32 %v1579_v26, 0.0  ;;  %6099 = vmatprep.subr.bf16.mxu0 %v2829_v25  ;;  %v2827_v52 = vsel %vm162_vm3, %v2739_v23, %v2741_v14  ;;  %v2817_v14 = vsel %vm162_vm3, %v7822_v38, %v7820_v12  ;;  %v1555_v23 = vadd.f32 %v7844_v2, %v941_v59 }
 0x400   :  { %6100 = vmatpush3.bf16.msra.mxu0 %v2821_v22  ;;  %v2816_v12 = vsel %vm162_vm3, %v7816_v47, %v7814_v7  ;;  %v2823_v2 = vsel %vm162_vm3, %v7848_v8, %v7846_v3  ;;  %v2815_v10 = vsel %vm162_vm3, %v7810_v44, %v7808_v11  ;;  %v2082_v3 = vld [vmem:[#allocation8 + $0x90] sm:$0xff]  ;;  %v5731_v22 = vcombine.low %v7861_v15, %v7863_v57 }
 0x401   :  { %v6090_v20 = vpack.c.bf16 %v1645_v21, %v1645_v21  ;;  %6101 = vmatprep.subr.bf16.mxu0 %v2828_v60  ;;  %v2719_v19 = vpop.permute.xlu1 %2718  ;;  %v1639_v63 = vmax.f32 %v1555_v23, 0.0  ;;  %v2084_v8 = vld [vmem:[#allocation8 + $0xd0] sm:$0xff] }
 0x402   :  { %v7019_v56 = vld [vmem:[#allocation3 + $0x1e0] ss:$8 sps:$4 sm:$0xff]   ;;  %v2689_v43 = vpop.permute.xlu0 %2688  ;;  %v2822_v47 = vsel %vm162_vm3, %v2719_v19, %v2721_v13  ;;  %v5736_v60 = vcombine.high %v2082_v3, %v2084_v8 }
 0x403   :  { %1965 = vst [vmem:[#allocation3 + $0x1f8] sm:$0xf] %v6090_v20  ;;  %v6084_v38 = vpack.c.bf16 %v1639_v63, %v1639_v63 }
 0x404   :  { %6102 = vmatpush3.bf16.msra.mxu0 %v2820_v33 }
 0x405   :  { %6103 = vmatprep.subr.bf16.mxu0 %v2827_v52  ;;  %1959 = vst [vmem:[#allocation3 + $0x1c8] sm:$0xf] %v6084_v38 }
 0x406   :  { %v861_v29 = vpop.permute.xlu0 %860 }
 0x407   :  { %v1491_v51 = vadd.f32 %v7760_v37, %v861_v29 }
 0x408   :  { %6104 = vmatpush3.bf16.msra.mxu0 %v2819_v39 }
 0x409   :  { %6105 = vmatprep.subr.bf16.mxu0 %v2826_v58  ;;  %v1623_v26 = vmax.f32 %v1491_v51, 0.0 }
 0x40a   :  { %v7017_v62 = vld [vmem:[#allocation3 + $0x1f0] ss:$8 sps:$4 sm:$0xff]   ;;  %v931_v25 = vpop.permute.xlu0 %930 }
 0x40b   :  { %6819 = vmatprep.subr.bf16.mxu1 %v7017_v62  ;;  %v6068_v11 = vpack.c.bf16 %v1623_v26, %v1623_v26  ;;  %v1547_v37 = vadd.f32 %v7836_v54, %v931_v25  ;;  %v7946_v26 = vld [vmem:[#allocation3 + $0x164] ss:$8 sps:$4 sm:$0xff]   ;;  %v7950_v25 = vld [vmem:[#allocation3 + $0x160] ss:$8 sps:$4 sm:$0xff]  }
 0x40c   :  { %6106 = vmatpush3.bf16.msra.mxu0 %v2818_v35  ;;  %6827 = vmatpush3.bf16.msra.mxu1 %v7018_v28  ;;  %v7914_v35 = vld [vmem:[#allocation8 + $0x110] sm:$0xff] }
 0x40d   :  { %6107 = vmatprep.subr.bf16.mxu0 %v2825_v53  ;;  %6820 = vmatprep.subr.bf16.mxu1 %v7019_v56  ;;  %1943 = vst [vmem:[#allocation3 + $0x148] sm:$0xf] %v6068_v11  ;;  %v1637_v33 = vmax.f32 %v1547_v37, 0.0  ;;  %v7916_v56 = vld [vmem:[#allocation8 + $0x150] sm:$0xff] }
 0x40e   :  { %v936_v46 = vpop.permute.xlu1 %935  ;;  %v851_v39 = vpop.permute.xlu0 %850 }
 0x40f   :  { %v1552_v50 = vadd.f32 %v7842_v30, %v936_v46  ;;  %v6082_v62 = vpack.c.bf16 %v1637_v33, %v1637_v33  ;;  %v1483_v15 = vadd.f32 %v7742_v27, %v851_v39 }
 0x410   :  { %6108 = vmatpush3.bf16.msra.mxu0 %v2817_v14  ;;  %6828 = vmatpush3.bf16.msra.mxu1 %v7020_v48  ;;  %v7920_v48 = vld [vmem:[#allocation3 + $0x144] ss:$8 sps:$4 sm:$0xff]  }
 0x411   :  { %v1638_v36 = vmax.f32 %v1552_v50, 0.0  ;;  %6109 = vmatprep.subr.bf16.mxu0 %v2824_v0  ;;  %6821 = vmatprep.subr.bf16.mxu1 %v7021_v4  ;;  %1957 = vst [vmem:[#allocation3 + $0x1b8] sm:$0xf] %v6082_v62  ;;  %v5740_v4 = vcombine.high %v7914_v35, %v7916_v56 }
 0x412   :  { %v2687_v40 = vpop.permute.xlu1 %2686  ;;  %v921_v19 = vpop.permute.xlu0 %920  ;;  %2768 = vrot.lane.b32.xlu0 %v7920_v48, %s7233_s5 }
 0x413   :  { %v6083_v30 = vpack.c.bf16 %v1638_v36, %v1638_v36  ;;  %v2814_v21 = vsel %vm162_vm3, %v2687_v40, %v2689_v43  ;;  %v1539_v46 = vadd.f32 %v7824_v49, %v921_v19 }
 0x414   :  { %6110 = vmatpush3.bf16.msra.mxu0 %v2816_v12  ;;  %6829 = vmatpush3.bf16.msra.mxu1 %v7022_v1  ;;  %v7932_v1 = vld [vmem:[#allocation3 + $0x154] ss:$8 sps:$4 sm:$0xff]  }
 0x415   :  { %1958 = vst [vmem:[#allocation3 + $0x1c0] sm:$0xf] %v6083_v30  ;;  %6111 = vmatprep.subr.bf16.mxu0 %v2823_v2  ;;  %v1635_v14 = vmax.f32 %v1539_v46, 0.0  ;;  %v7934_v2 = vld [vmem:[#allocation3 + $0x150] ss:$8 sps:$4 sm:$0xff]  }
 0x416   :  { %v856_v16 = vpop.permute.xlu1 %855  ;;  %v841_v0 = vpop.permute.xlu0 %840  ;;  %2772 = vrot.lane.b32.xlu0 %v7932_v1, %s7233_s5 }
 0x417   :  { %v1488_v7 = vadd.f32 %v7750_v31, %v856_v16  ;;  %v6080_v36 = vpack.c.bf16 %v1635_v14, %v1635_v14  ;;  %v1475_v43 = vadd.f32 %v7726_v9, %v841_v0  ;;  %v7940_v9 = vld [vmem:[#allocation8 + $0x1d0] sm:$0xff]  ;;  %v9629_v14 = vld [vmem:[#allocation11_spill] sm:$0xff] }
 0x418   :  { %6112 = vmatpush3.bf16.msra.mxu0 %v2815_v10 }
 0x419   :  { %v1622_v18 = vmax.f32 %v1488_v7, 0.0  ;;  %6113 = vmatprep.subr.bf16.mxu0 %v2822_v47  ;;  %1955 = vst [vmem:[#allocation3 + $0x1a8] sm:$0xf] %v6080_v36  ;;  %v1619_v38 = vmax.f32 %v1475_v43, 0.0  ;;  %v7984_v36 = vld [vmem:[#allocation3 + $0x1d0] ss:$8 sps:$4 sm:$0xff]  }
 0x41a   :  { %v926_v17 = vpop.permute.xlu1 %925  ;;  %v911_v29 = vpop.permute.xlu0 %910  ;;  %2776 = vrot.lane.b32.xlu0 %v7946_v26, %s7233_s5  ;;  %v2100_v43 = vld [vmem:[#allocation8 + $0x2d0] sm:$0xff] }
 0x41b   :  { %v6067_v44 = vpack.c.bf16 %v1622_v18, %v1622_v18  ;;  %v1544_v31 = vadd.f32 %v7830_v34, %v926_v17  ;;  %v1621_v34 = vmax.f32 %v1483_v15, 0.0  ;;  %v6064_v10 = vpack.c.bf16 %v1619_v38, %v1619_v38  ;;  %v7990_v38 = vld [vmem:[#allocation3 + $0x1e4] ss:$8 sps:$4 sm:$0xff]  }
 0x41c   :  { %6114 = vmatpush3.bf16.msra.mxu0 %v2814_v21  ;;  %v7023_v20 = vld [vmem:[#allocation3 + $0x1c0] ss:$8 sps:$4 sm:$0xff]   ;;  %v1531_v7 = vadd.f32 %v7812_v45, %v911_v29 }
 0x41d   :  { %1942 = vst [vmem:[#allocation3 + $0x140] sm:$0xf] %v6067_v44  ;;  %v1636_v52 = vmax.f32 %v1544_v31, 0.0  ;;  %6822 = vmatprep.subr.bf16.mxu1 %v7023_v20  ;;  %v6066_v53 = vpack.c.bf16 %v1621_v34, %v1621_v34  ;;  %1939 = vst [vmem:[#allocation3 + $0x128] sm:$0xf] %v6064_v10 }
 0x41e   :  { %v846_v58 = vpop.permute.xlu1 %845  ;;  %v831_v17 = vpop.permute.xlu0 %830  ;;  %v7960_v31 = vld [vmem:[#allocation3 + $0x174] ss:$8 sps:$4 sm:$0xff]   ;;  %v7970_v34 = vld [vmem:[#allocation3 + $0x1c4] ss:$8 sps:$4 sm:$0xff]  }
 0x41f   :  { %v6081_v13 = vpack.c.bf16 %v1636_v52, %v1636_v52  ;;  %v1480_v57 = vadd.f32 %v7730_v61, %v846_v58  ;;  %2911 = vmatmul.mubr.bf16.vlgmr.msra.gmra.mxu0 %v5731_v22  ;;  %v5735_v61 = vcombine.low %v2082_v3, %v2084_v8  ;;  %1941 = vst [vmem:[#allocation3 + $0x138] sm:$0xf] %v6066_v53  ;;  %v1633_v8 = vmax.f32 %v1531_v7, 0.0  ;;  %v7962_v52 = vld [vmem:[#allocation3 + $0x170] ss:$8 sps:$4 sm:$0xff]  }
 0x420   :  { %2918 = vmatprep.mubr.bf16.mxu0 %v5736_v60  ;;  %v5739_v3 = vcombine.low %v7914_v35, %v7916_v56  ;;  %v1467_v44 = vadd.f32 %v7706_v6, %v831_v17  ;;  %2780 = vrot.lane.b32.xlu0 %v7960_v31, %s7233_s5  ;;  %v2096_v6 = vld [vmem:[#allocation8 + $0x250] sm:$0xff]  ;;  %v7974_v56 = vld [vmem:[#allocation3 + $0x1c0] ss:$8 sps:$4 sm:$0xff]  }
 0x421   :  { %1956 = vst [vmem:[#allocation3 + $0x1b0] sm:$0xf] %v6081_v13  ;;  %v1620_v54 = vmax.f32 %v1480_v57, 0.0  ;;  %v6078_v22 = vpack.c.bf16 %v1633_v8, %v1633_v8  ;;  %v2102_v7 = vld [vmem:[#allocation8 + $0x310] sm:$0xff] }
 0x422   :  { %v916_v28 = vpop.permute.xlu1 %915  ;;  %v1617_v60 = vmax.f32 %v1467_v44, 0.0  ;;  %v901_v39 = vpop.permute.xlu0 %900  ;;  %v8014_v17 = vld [vmem:[#allocation3 + $0x134] ss:$8 sps:$4 sm:$0xff]   ;;  %v8022_v44 = vld [vmem:[#allocation3 + $0x1a4] ss:$8 sps:$4 sm:$0xff]  }
 0x423   :  { %v6065_v59 = vpack.c.bf16 %v1620_v54, %v1620_v54  ;;  %v1536_v27 = vadd.f32 %v7818_v42, %v916_v28  ;;  %1953 = vst [vmem:[#allocation3 + $0x198] sm:$0xf] %v6078_v22  ;;  %v1523_v15 = vadd.f32 %v7804_v5, %v901_v39  ;;  %9632 = vst [vmem:[#allocation13_spill] sm:$0xff] %v8014_v17  ;;  %v2106_v22 = vld [vmem:[#allocation8 + $0x390] sm:$0xff] }
 0x424   :  { %v7922_v50 = vld [vmem:[#allocation3 + $0x140] ss:$8 sps:$4 sm:$0xff]   ;;  %v6062_v62 = vpack.c.bf16 %v1617_v60, %v1617_v60  ;;  %2800 = vrot.lane.b32.xlu0 %v7970_v34, %s7233_s5  ;;  %9634 = vst [vmem:[#allocation15_spill] sm:$0xff] %v8022_v44 }
 0x425   :  { %1940 = vst [vmem:[#allocation3 + $0x130] sm:$0xf] %v6065_v59  ;;  %v1634_v23 = vmax.f32 %v1536_v27, 0.0  ;;  %v7027_v49 = vld [vmem:[#allocation3 + $0x140] ss:$8 sps:$4 sm:$0xff]   ;;  %2766 = vrot.lane.b32.xlu1 %v7922_v50, %s7233_s5  ;;  %v1631_v28 = vmax.f32 %v1523_v15, 0.0 }
 0x426   :  { %v836_v63 = vpop.permute.xlu1 %835  ;;  %6830 = vmatpush3.bf16.msra.mxu1 %v7027_v49  ;;  %1937 = vst [vmem:[#allocation3 + $0x118] sm:$0xf] %v6062_v62  ;;  %v821_v59 = vpop.permute.xlu0 %820  ;;  %v9628_v27 = vld [vmem:[#allocation12_spill] sm:$0xff] }
 0x427   :  { %v6079_v42 = vpack.c.bf16 %v1634_v23, %v1634_v23  ;;  %v1472_v40 = vadd.f32 %v7714_v24, %v836_v63  ;;  %2919 = vmatmul.mubr.bf16.gmra.mxu0 %v5735_v61  ;;  %v7938_v24 = vld [vmem:[#allocation8 + $0x190] sm:$0xff]  ;;  %v1459_v61 = vadd.f32 %v9628_v27, %v821_v59 }
 0x428   :  { %v7031_v12 = vld [vmem:[#allocation3 + $0x1b0] ss:$8 sps:$4 sm:$0xff]   ;;  %2926 = vmatprep.mubr.bf16.mxu0 %v5740_v4  ;;  %v5744_v45 = vcombine.high %v7938_v24, %v7940_v9  ;;  %v5743_v19 = vcombine.low %v7938_v24, %v7940_v9  ;;  %v7982_v4 = vld [vmem:[#allocation3 + $0x1d4] ss:$8 sps:$4 sm:$0xff]  }
 0x429   :  { %1954 = vst [vmem:[#allocation3 + $0x1a0] sm:$0xf] %v6079_v42  ;;  %v1618_v30 = vmax.f32 %v1472_v40, 0.0  ;;  %6823 = vmatprep.subr.bf16.mxu1 %v7031_v12  ;;  %2770 = vrot.lane.b32.xlu1 %v7934_v2, %s7233_s5  ;;  %v1615_v63 = vmax.f32 %v1459_v61, 0.0  ;;  %v2098_v42 = vld [vmem:[#allocation8 + $0x290] sm:$0xff] }
 0x42a   :  { %v906_v16 = vpop.permute.xlu1 %905  ;;  %2804 = vrot.lane.b32.xlu0 %v7982_v4, %s7233_s5  ;;  %v5752_v24 = vcombine.high %v2098_v42, %v2100_v43  ;;  %v7998_v9 = vld [vmem:[#allocation3 + $0x1f4] ss:$8 sps:$4 sm:$0xff]   ;;  %v5751_v8 = vcombine.low %v2098_v42, %v2100_v43  ;;  %v8068_v61 = vld [vmem:[#allocation3 + $0x104] ss:$8 sps:$4 sm:$0xff]   ;;  %v8080_v43 = vld [vmem:[#allocation3 + $0xf0] ss:$8 sps:$4 sm:$0xff]  }
 0x42b   :  { %v6063_v51 = vpack.c.bf16 %v1618_v30, %v1618_v30  ;;  %v1528_v47 = vadd.f32 %v7806_v41, %v906_v16  ;;  %v6060_v40 = vpack.c.bf16 %v1615_v63, %v1615_v63  ;;  %v7992_v16 = vld [vmem:[#allocation3 + $0x1e0] ss:$8 sps:$4 sm:$0xff]   ;;  %v2116_v59 = vld [vmem:[#allocation8 + $0x4d0] sm:$0xff] }
 0x42c   :  { %v7035_v18 = vld [vmem:[#allocation3 + $0x130] ss:$8 sps:$4 sm:$0xff]   ;;  %v8076_v42 = vld [vmem:[#allocation3 + $0xf4] ss:$8 sps:$4 sm:$0xff]  }
 0x42d   :  { %1938 = vst [vmem:[#allocation3 + $0x120] sm:$0xf] %v6063_v51  ;;  %v1632_v21 = vmax.f32 %v1528_v47, 0.0  ;;  %6831 = vmatpush3.bf16.msra.mxu1 %v7035_v18  ;;  %2774 = vrot.lane.b32.xlu1 %v7950_v25, %s7233_s5  ;;  %1935 = vst [vmem:[#allocation3 + $0x108] sm:$0xf] %v6060_v40  ;;  %v2104_v47 = vld [vmem:[#allocation8 + $0x350] sm:$0xff] }
 0x42e   :  { %v826_v41 = vpop.permute.xlu1 %825  ;;  %2808 = vrot.lane.b32.xlu0 %v7990_v38, %s7233_s5  ;;  %v8000_v51 = vld [vmem:[#allocation3 + $0x1f0] ss:$8 sps:$4 sm:$0xff]   ;;  %v8006_v18 = vld [vmem:[#allocation3 + $0x1b4] ss:$8 sps:$4 sm:$0xff]  }
 0x42f   :  { %v6077_v11 = vpack.c.bf16 %v1632_v21, %v1632_v21  ;;  %v1464_v37 = vadd.f32 %v7702_v55, %v826_v41  ;;  %2927 = vmatmul.mubr.bf16.gmra.mxu0 %v5739_v3  ;;  %v2094_v55 = vld [vmem:[#allocation8 + $0x210] sm:$0xff]  ;;  %9630 = vst [vmem:[#allocation12_spill] sm:$0xff] %v8006_v18 }
 0x430   :  { %v7039_v20 = vld [vmem:[#allocation3 + $0x1a0] ss:$8 sps:$4 sm:$0xff]   ;;  %2934 = vmatprep.mubr.bf16.mxu0 %v5744_v45  ;;  %v5748_v53 = vcombine.high %v2094_v55, %v2096_v6  ;;  %v5747_v29 = vcombine.low %v2094_v55, %v2096_v6  ;;  %v8008_v21 = vld [vmem:[#allocation3 + $0x1b0] ss:$8 sps:$4 sm:$0xff]   ;;  %v5756_v45 = vcombine.high %v2102_v7, %v2104_v47  ;;  %v8038_v6 = vld [vmem:[#allocation3 + $0x194] ss:$8 sps:$4 sm:$0xff]  }
 0x431   :  { %1952 = vst [vmem:[#allocation3 + $0x190] sm:$0xf] %v6077_v11  ;;  %v1616_v33 = vmax.f32 %v1464_v37, 0.0  ;;  %6824 = vmatprep.subr.bf16.mxu1 %v7039_v20  ;;  %2778 = vrot.lane.b32.xlu1 %v7962_v52, %s7233_s5  ;;  %9631 = vst [vmem:[#allocation11_spill] sm:$0xff] %v8008_v21  ;;  %v8016_v41 = vld [vmem:[#allocation3 + $0x130] ss:$8 sps:$4 sm:$0xff]   ;;  %v5755_v37 = vcombine.low %v2102_v7, %v2104_v47 }
 0x432   :  { %v896_v58 = vpop.permute.xlu1 %895  ;;  %2812 = vrot.lane.b32.xlu0 %v7998_v9, %s7233_s5  ;;  %9633 = vst [vmem:[#allocation14_spill] sm:$0xff] %v8016_v41  ;;  %v2108_v11 = vld [vmem:[#allocation8 + $0x3d0] sm:$0xff]  ;;  %v8024_v20 = vld [vmem:[#allocation3 + $0x1a0] ss:$8 sps:$4 sm:$0xff]   ;;  %v8096_v7 = vld [vmem:[#allocation3 + $0xe4] ss:$8 sps:$4 sm:$0xff]  }
 0x433   :  { %v6061_v13 = vpack.c.bf16 %v1616_v33, %v1616_v33  ;;  %v1520_v57 = vadd.f32 %v7802_v32, %v896_v58  ;;  %v6076_v32 = vpack.c.bf16 %v1631_v28, %v1631_v28  ;;  %v5760_v60 = vcombine.high %v2106_v22, %v2108_v11  ;;  %v8030_v33 = vld [vmem:[#allocation3 + $0x124] ss:$8 sps:$4 sm:$0xff]   ;;  %v2110_v58 = vld [vmem:[#allocation8 + $0x410] sm:$0xff]  ;;  %v8100_v47 = vld [vmem:[#allocation3 + $0xe0] ss:$8 sps:$4 sm:$0xff]  }
 0x434   :  { %v7043_v54 = vld [vmem:[#allocation3 + $0x120] ss:$8 sps:$4 sm:$0xff]   ;;  %v2112_v55 = vld [vmem:[#allocation8 + $0x450] sm:$0xff]  ;;  %v5759_v62 = vcombine.low %v2106_v22, %v2108_v11 }
 0x435   :  { %1936 = vst [vmem:[#allocation3 + $0x110] sm:$0xf] %v6061_v13  ;;  %v1630_v35 = vmax.f32 %v1520_v57, 0.0  ;;  %6832 = vmatpush3.bf16.msra.mxu1 %v7043_v54  ;;  %2798 = vrot.lane.b32.xlu1 %v7974_v56, %s7233_s5  ;;  %1951 = vst [vmem:[#allocation3 + $0x188] sm:$0xf] %v6076_v32  ;;  %v5764_v15 = vcombine.high %v2110_v58, %v2112_v55  ;;  %v8046_v57 = vld [vmem:[#allocation8 + $0x18] sm:$0xff]  ;;  %v5763_v32 = vcombine.low %v2110_v58, %v2112_v55 }
 0x436   :  { %v816_v5 = vpop.permute.xlu1 %815  ;;  %2796 = vrot.lane.b32.xlu0 %v8006_v18, %s7233_s5  ;;  %v8032_v39 = vld [vmem:[#allocation3 + $0x120] ss:$8 sps:$4 sm:$0xff]   ;;  %v8048_v54 = vld [vmem:[#allocation8 + $0x58] sm:$0xff]  ;;  %v8146_v55 = vld [vmem:[#allocation3 + $0xc4] ss:$8 sps:$4 sm:$0xff]  }
 0x437   :  { %v6075_v46 = vpack.c.bf16 %v1630_v35, %v1630_v35  ;;  %v1456_v23 = vadd.f32 %v9629_v14, %v816_v5  ;;  %2935 = vmatmul.mubr.bf16.gmra.mxu0 %v5743_v19  ;;  %v8050_v19 = vld [vmem:[#allocation3 + $0x114] ss:$8 sps:$4 sm:$0xff]   ;;  %v8060_v5 = vld [vmem:[#allocation3 + $0x184] ss:$8 sps:$4 sm:$0xff]   ;;  %v8114_v22 = vld [vmem:[#allocation3 + $0x60] ss:$8 sps:$4 sm:$0xff]  }
 0x438   :  { %v7047_v0 = vld [vmem:[#allocation3 + $0x190] ss:$8 sps:$4 sm:$0xff]   ;;  %2942 = vmatprep.mubr.bf16.mxu0 %v5748_v53  ;;  %v8084_v40 = vld [vmem:[#allocation3 + $0x74] ss:$8 sps:$4 sm:$0xff]  }
 0x439   :  { %1950 = vst [vmem:[#allocation3 + $0x180] sm:$0xf] %v6075_v46  ;;  %v1614_v49 = vmax.f32 %v1456_v23, 0.0  ;;  %6825 = vmatprep.subr.bf16.mxu1 %v7047_v0  ;;  %2802 = vrot.lane.b32.xlu1 %v7984_v36, %s7233_s5  ;;  %v8040_v13 = vld [vmem:[#allocation3 + $0x190] ss:$8 sps:$4 sm:$0xff]  }
 0x43a   :  { %2764 = vrot.lane.b32.xlu0 %v8014_v17, %s7233_s5  ;;  %v2114_v53 = vld [vmem:[#allocation8 + $0x490] sm:$0xff] }
 0x43b   :  { %v6059_v12 = vpack.c.bf16 %v1614_v49, %v1614_v49  ;;  %v5768_v27 = vcombine.high %v2114_v53, %v2116_v59  ;;  %v2118_v23 = vld [vmem:[#allocation8 + $0x510] sm:$0xff]  ;;  %v5767_v63 = vcombine.low %v2114_v53, %v2116_v59  ;;  %v8166_v53 = vld [vmem:[#allocation3 + $0x40] ss:$8 sps:$4 sm:$0xff]  }
 0x43c   :  { %v7051_v30 = vld [vmem:[#allocation3 + $0x110] ss:$8 sps:$4 sm:$0xff]   ;;  %v8122_v11 = vld [vmem:[#allocation3 + $0xd4] ss:$8 sps:$4 sm:$0xff]  }
 0x43d   :  { %1934 = vst [vmem:[#allocation3 + $0x100] sm:$0xf] %v6059_v12  ;;  %6833 = vmatpush3.bf16.msra.mxu1 %v7051_v30  ;;  %2806 = vrot.lane.b32.xlu1 %v7992_v16, %s7233_s5  ;;  %v8054_v35 = vld [vmem:[#allocation3 + $0x110] ss:$8 sps:$4 sm:$0xff]  }
 0x43e   :  { %2792 = vrot.lane.b32.xlu0 %v8022_v44, %s7233_s5  ;;  %v2120_v0 = vld [vmem:[#allocation8 + $0x550] sm:$0xff] }
 0x43f   :  { %2943 = vmatmul.mubr.bf16.gmra.mxu0 %v5747_v29  ;;  %v5772_v49 = vcombine.high %v2118_v23, %v2120_v0  ;;  %v2122_v12 = vld [vmem:[#allocation8 + $0x590] sm:$0xff] }
 0x440   :  { %v7055_v10 = vld [vmem:[#allocation3 + $0x180] ss:$8 sps:$4 sm:$0xff]   ;;  %2950 = vmatprep.mubr.bf16.mxu0 %v5752_v24  ;;  %v2124_v30 = vld [vmem:[#allocation8 + $0x5d0] sm:$0xff]  ;;  %v5771_v24 = vcombine.low %v2118_v23, %v2120_v0 }
 0x441   :  { %6826 = vmatprep.subr.bf16.mxu1 %v7055_v10  ;;  %2810 = vrot.lane.b32.xlu1 %v8000_v51, %s7233_s5  ;;  %v8062_v46 = vld [vmem:[#allocation3 + $0x180] ss:$8 sps:$4 sm:$0xff]   ;;  %v8088_v29 = vld [vmem:[#allocation3 + $0x70] ss:$8 sps:$4 sm:$0xff]   ;;  %v5776_v10 = vcombine.high %v2122_v12, %v2124_v30  ;;  %v8174_v0 = vld [vmem:[#allocation3 + $0xb4] ss:$8 sps:$4 sm:$0xff]  }
 0x442   :  { %2760 = vrot.lane.b32.xlu0 %v8030_v33, %s7233_s5  ;;  %v8138_v58 = vld [vmem:[#allocation3 + $0x50] ss:$8 sps:$4 sm:$0xff]   ;;  %9635 = vst [vmem:[#allocation16_spill] sm:$0xff] %v8174_v0 }
 0x444   :  { %v7059_v3 = vld [vmem:[#allocation3 + $0x100] ss:$8 sps:$4 sm:$0xff]  }
 0x445   :  { %6834 = vmatpush3.bf16.msra.mxu1 %v7059_v3  ;;  %2794 = vrot.lane.b32.xlu1 %v8008_v21, %s7233_s5  ;;  %v8070_v14 = vld [vmem:[#allocation3 + $0x100] ss:$8 sps:$4 sm:$0xff]   ;;  %v5775_v3 = vcombine.low %v2122_v12, %v2124_v30  ;;  %v8186_v30 = vld [vmem:[#allocation3 + $0x34] ss:$8 sps:$4 sm:$0xff]  }
 0x446   :  { %2788 = vrot.lane.b32.xlu0 %v8038_v6, %s7233_s5  ;;  %9637 = vst [vmem:[#allocation18_spill] sm:$0xff] %v8186_v30 }
 0x447   :  { %2951 = vmatmul.mubr.bf16.gmra.mxu0 %v5751_v8  ;;  %v5734_v8 = vcombine.high %v8046_v57, %v8048_v54 }
 0x448   :  { %2958 = vmatprep.mubr.bf16.mxu0 %v5756_v45  ;;  %v8110_v45 = vld [vmem:[#allocation3 + $0x64] ss:$8 sps:$4 sm:$0xff]  }
 0x449   :  { %2762 = vrot.lane.b32.xlu1 %v8016_v41, %s7233_s5 }
 0x44a   :  { %2756 = vrot.lane.b32.xlu0 %v8050_v19, %s7233_s5 }
 0x44d   :  { %2790 = vrot.lane.b32.xlu1 %v8024_v20, %s7233_s5 }
 0x44e   :  { %2784 = vrot.lane.b32.xlu0 %v8060_v5, %s7233_s5 }
 0x44f   :  { %2959 = vmatmul.mubr.bf16.gmra.mxu0 %v5755_v37  ;;  %v8126_v37 = vld [vmem:[#allocation3 + $0xd0] ss:$8 sps:$4 sm:$0xff]  }
 0x450   :  { %2966 = vmatprep.mubr.bf16.mxu0 %v5760_v60  ;;  %v8134_v60 = vld [vmem:[#allocation3 + $0x54] ss:$8 sps:$4 sm:$0xff]  }
 0x451   :  { %2758 = vrot.lane.b32.xlu1 %v8032_v39, %s7233_s5 }
 0x452   :  { %2752 = vrot.lane.b32.xlu0 %v8068_v61, %s7233_s5 }
 0x455   :  { %2786 = vrot.lane.b32.xlu1 %v8040_v13, %s7233_s5 }
 0x456   :  { %4176 = vrot.lane.b32.xlu0 %v8076_v42, %s7231_s23 }
 0x457   :  { %2967 = vmatmul.mubr.bf16.gmra.mxu0 %v5759_v62  ;;  %v8150_v62 = vld [vmem:[#allocation3 + $0xc0] ss:$8 sps:$4 sm:$0xff]  }
 0x458   :  { %2974 = vmatprep.mubr.bf16.mxu0 %v5764_v15 }
 0x459   :  { %2754 = vrot.lane.b32.xlu1 %v8054_v35, %s7233_s5 }
 0x45a   :  { %4144 = vrot.lane.b32.xlu0 %v8084_v40, %s7231_s23 }
 0x45d   :  { %2782 = vrot.lane.b32.xlu1 %v8062_v46, %s7233_s5 }
 0x45e   :  { %4208 = vrot.lane.b32.xlu0 %v7960_v31, %s7231_s23 }
 0x45f   :  { %2975 = vmatmul.mubr.bf16.gmra.mxu0 %v5763_v32 }
 0x460   :  { %2982 = vmatprep.mubr.bf16.mxu0 %v5768_v27 }
 0x461   :  { %2750 = vrot.lane.b32.xlu1 %v8070_v14, %s7233_s5 }
 0x462   :  { %4172 = vrot.lane.b32.xlu0 %v8096_v7, %s7231_s23 }
 0x465   :  { %4174 = vrot.lane.b32.xlu1 %v8080_v43, %s7231_s23 }
 0x466   :  { %4236 = vrot.lane.b32.xlu0 %v7990_v38, %s7231_s23 }
 0x467   :  { %2983 = vmatmul.mubr.bf16.gmra.mxu0 %v5767_v63  ;;  %v8178_v63 = vld [vmem:[#allocation3 + $0xb0] ss:$8 sps:$4 sm:$0xff]  }
 0x468   :  { %2990 = vmatprep.mubr.bf16.mxu0 %v5772_v49  ;;  %9636 = vst [vmem:[#allocation17_spill] sm:$0xff] %v8178_v63 }
 0x469   :  { %4142 = vrot.lane.b32.xlu1 %v8088_v29, %s7231_s23 }
 0x46a   :  { %4140 = vrot.lane.b32.xlu0 %v8110_v45, %s7231_s23 }
 0x46d   :  { %4206 = vrot.lane.b32.xlu1 %v7962_v52, %s7231_s23 }
 0x46e   :  { %4204 = vrot.lane.b32.xlu0 %v7946_v26, %s7231_s23 }
 0x46f   :  { %2991 = vmatmul.mubr.bf16.gmra.mxu0 %v5771_v24  ;;  %v8190_v24 = vld [vmem:[#allocation3 + $0x30] ss:$8 sps:$4 sm:$0xff]  }
 0x470   :  { %2998 = vmatprep.mubr.bf16.mxu0 %v5776_v10  ;;  %9638 = vst [vmem:[#allocation19_spill] sm:$0xff] %v8190_v24 }
 0x471   :  { %4170 = vrot.lane.b32.xlu1 %v8100_v47, %s7231_s23 }
 0x472   :  { %4168 = vrot.lane.b32.xlu0 %v8122_v11, %s7231_s23 }
 0x475   :  { %4234 = vrot.lane.b32.xlu1 %v7992_v16, %s7231_s23 }
 0x476   :  { %4232 = vrot.lane.b32.xlu0 %v7982_v4, %s7231_s23 }
 0x477   :  { %2999 = vmatmul.mubr.bf16.gmra.mxu0 %v5775_v3 }
 0x478   :  { %3039 = vmatprep.mubr.bf16.mxu0 %v5734_v8 }
 0x479   :  { %4138 = vrot.lane.b32.xlu1 %v8114_v22, %s7231_s23 }
 0x47a   :  { %4136 = vrot.lane.b32.xlu0 %v8134_v60, %s7231_s23 }
 0x47d   :  { %4202 = vrot.lane.b32.xlu1 %v7950_v25, %s7231_s23 }
 0x47e   :  { %4200 = vrot.lane.b32.xlu0 %v7932_v1, %s7231_s23 }
 0x481   :  { %4166 = vrot.lane.b32.xlu1 %v8126_v37, %s7231_s23 }
 0x482   :  { %4164 = vrot.lane.b32.xlu0 %v8146_v55, %s7231_s23 }
 0x484   :  { %v8158_v1 = vpop.permute.xlu0 %2768 }
 0x485   :  { %4230 = vrot.lane.b32.xlu1 %v7984_v36, %s7231_s23 }
 0x486   :  { %4228 = vrot.lane.b32.xlu0 %v7970_v34, %s7231_s23 }
 0x488   :  { %v2773_v59 = vpop.permute.xlu0 %2772 }
 0x489   :  { %4134 = vrot.lane.b32.xlu1 %v8138_v58, %s7231_s23 }
 0x48c   :  { %v2777_v27 = vpop.permute.xlu0 %2776 }
 0x48d   :  { %4198 = vrot.lane.b32.xlu1 %v7934_v2, %s7231_s23  ;;  %v8162_v2 = vld [vmem:[#allocation3 + $0x44] ss:$8 sps:$4 sm:$0xff]  }
 0x48e   :  { %4132 = vrot.lane.b32.xlu0 %v8162_v2, %s7231_s23 }
 0x491   :  { %4162 = vrot.lane.b32.xlu1 %v8150_v62, %s7231_s23 }
 0x492   :  { %4196 = vrot.lane.b32.xlu0 %v7920_v48, %s7231_s23  ;;  %v2781_v49 = vpop.permute.xlu0 %2780 }
 0x495   :  { %4226 = vrot.lane.b32.xlu1 %v7974_v56, %s7231_s23 }
 0x496   :  { %4160 = vrot.lane.b32.xlu0 %v8174_v0, %s7231_s23  ;;  %v2801_v48 = vpop.permute.xlu0 %2800 }
 0x497   :  { %v8160_v15 = vpop.permute.xlu1 %2766 }
 0x499   :  { %4130 = vrot.lane.b32.xlu1 %v8166_v53, %s7231_s23 }
 0x49a   :  { %4224 = vrot.lane.b32.xlu0 %v8006_v18, %s7231_s23 }
 0x49b   :  { %v2771_v32 = vpop.permute.xlu1 %2770 }
 0x49c   :  { %v2805_v10 = vpop.permute.xlu0 %2804 }
 0x49d   :  { %4194 = vrot.lane.b32.xlu1 %v7922_v50, %s7231_s23 }
 0x49e   :  { %4128 = vrot.lane.b32.xlu0 %v8186_v30, %s7231_s23  ;;  %v8202_v30 = vld [vmem:[#allocation3 + $0xa0] ss:$8 sps:$4 sm:$0xff]  }
 0x49f   :  { %v2775_v23 = vpop.permute.xlu1 %2774  ;;  %9640 = vst [vmem:[#allocation21_spill] sm:$0xff] %v8202_v30 }
 0x4a0   :  { %v2809_v8 = vpop.permute.xlu0 %2808 }
 0x4a1   :  { %4158 = vrot.lane.b32.xlu1 %v8178_v63, %s7231_s23 }
 0x4a2   :  { %4192 = vrot.lane.b32.xlu0 %v8014_v17, %s7231_s23 }
 0x4a3   :  { %v2779_v12 = vpop.permute.xlu1 %2778 }
 0x4a5   :  { %4222 = vrot.lane.b32.xlu1 %v8008_v21, %s7231_s23  ;;  %v8198_v21 = vld [vmem:[#allocation3 + $0xa4] ss:$8 sps:$4 sm:$0xff]  }
 0x4a6   :  { %9639 = vst [vmem:[#allocation20_spill] sm:$0xff] %v8198_v21  ;;  %4156 = vrot.lane.b32.xlu0 %v8198_v21, %s7231_s23 }
 0x4a7   :  { %v2799_v50 = vpop.permute.xlu1 %2798 }
 0x4a9   :  { %4126 = vrot.lane.b32.xlu1 %v8190_v24, %s7231_s23  ;;  %v2813_v24 = vpop.permute.xlu0 %2812 }
 0x4aa   :  { %4220 = vrot.lane.b32.xlu0 %v8022_v44, %s7231_s23  ;;  %v2836_v44 = vsel %vm162_vm3, %v2775_v23, %v2777_v27  ;;  %v2842_v23 = vsel %vm162_vm3, %v2799_v50, %v2801_v48 }
 0x4ab   :  { %v2803_v3 = vpop.permute.xlu1 %2802 }
 0x4ad   :  { %4190 = vrot.lane.b32.xlu1 %v8016_v41, %s7231_s23  ;;  %v2837_v41 = vsel %vm162_vm3, %v2779_v12, %v2781_v49  ;;  %v2797_v21 = vpop.permute.xlu0 %2796  ;;  %v2834_v12 = vsel %vm162_vm3, %v8160_v15, %v8158_v1 }
 0x4af   :  { %v2807_v28 = vpop.permute.xlu1 %2806 }
 0x4b0   :  { %v2844_v63 = vsel %vm162_vm3, %v2807_v28, %v2809_v8 }
 0x4b1   :  { %4154 = vrot.lane.b32.xlu1 %v8202_v30, %s7231_s23  ;;  %v8213_v30 = vld [vmem:[#allocation3 + $0x24] ss:$8 sps:$4 sm:$0xff]  }
 0x4b2   :  { %4124 = vrot.lane.b32.xlu0 %v8213_v30, %s7231_s23 }
 0x4b3   :  { %v2811_v18 = vpop.permute.xlu1 %2810 }
 0x4b4   :  { %v2845_v17 = vsel %vm162_vm3, %v2811_v18, %v2813_v24  ;;  %v8218_v18 = vld [vmem:[#allocation3 + $0x20] ss:$8 sps:$4 sm:$0xff]   ;;  %v8236_v24 = vld [vmem:[#allocation3 + $0x90] ss:$8 sps:$4 sm:$0xff]  }
 0x4b5   :  { %4218 = vrot.lane.b32.xlu1 %v8024_v20, %s7231_s23  ;;  %6187 = vmatprep.subr.bf16.mxu0 %v2845_v17  ;;  %v2765_v17 = vpop.permute.xlu0 %2764 }
 0x4b6   :  { %6188 = vmatpush3.bf16.msra.mxu0 %v2837_v41  ;;  %v2843_v41 = vsel %vm162_vm3, %v2803_v3, %v2805_v10  ;;  %4188 = vrot.lane.b32.xlu0 %v8030_v33, %s7231_s23  ;;  %v8247_v3 = vld [vmem:[#allocation3 + $0x14] ss:$8 sps:$4 sm:$0xff]  }
 0x4b7   :  { %6189 = vmatprep.subr.bf16.mxu0 %v2844_v63  ;;  %v2795_v0 = vpop.permute.xlu1 %2794  ;;  %v2835_v63 = vsel %vm162_vm3, %v2771_v32, %v2773_v59 }
 0x4b8   :  { %v2841_v32 = vsel %vm162_vm3, %v2795_v0, %v2797_v21  ;;  %v8252_v0 = vld [vmem:[#allocation3 + $0x10] ss:$8 sps:$4 sm:$0xff]  }
 0x4b9   :  { %4122 = vrot.lane.b32.xlu1 %v8218_v18, %s7231_s23  ;;  %v2793_v27 = vpop.permute.xlu0 %2792 }
 0x4ba   :  { %6190 = vmatpush3.bf16.msra.mxu0 %v2836_v44  ;;  %v8229_v44 = vld [vmem:[#allocation3 + $0x94] ss:$8 sps:$4 sm:$0xff]  }
 0x4bb   :  { %6191 = vmatprep.subr.bf16.mxu0 %v2843_v41  ;;  %v2763_v28 = vpop.permute.xlu1 %2762  ;;  %4152 = vrot.lane.b32.xlu0 %v8229_v44, %s7231_s23 }
 0x4bc   :  { %v2833_v50 = vsel %vm162_vm3, %v2763_v28, %v2765_v17 }
 0x4bd   :  { %4186 = vrot.lane.b32.xlu1 %v8032_v39, %s7231_s23  ;;  %v2761_v59 = vpop.permute.xlu0 %2760 }
 0x4be   :  { %6192 = vmatpush3.bf16.msra.mxu0 %v2835_v63  ;;  %v8262_v63 = vld [vmem:[#allocation3 + $0x84] ss:$8 sps:$4 sm:$0xff]  }
 0x4bf   :  { %6193 = vmatprep.subr.bf16.mxu0 %v2842_v23  ;;  %v2791_v49 = vpop.permute.xlu1 %2790  ;;  %4216 = vrot.lane.b32.xlu0 %v8038_v6, %s7231_s23  ;;  %v8267_v23 = vld [vmem:[#allocation3 + $0x80] ss:$8 sps:$4 sm:$0xff]  }
 0x4c0   :  { %v2840_v15 = vsel %vm162_vm3, %v2791_v49, %v2793_v27  ;;  %v2083_v49 = vld [vmem:[#allocation8 + $0x98] sm:$0xff] }
 0x4c1   :  { %4150 = vrot.lane.b32.xlu1 %v8236_v24, %s7231_s23  ;;  %v2789_v1 = vpop.permute.xlu0 %2788 }
 0x4c2   :  { %6194 = vmatpush3.bf16.msra.mxu0 %v2834_v12 }
 0x4c3   :  { %6195 = vmatprep.subr.bf16.mxu0 %v2841_v32  ;;  %v2759_v48 = vpop.permute.xlu1 %2758  ;;  %4120 = vrot.lane.b32.xlu0 %v8247_v3, %s7231_s23  ;;  %v1989_v32 = vld [vmem:[#allocation8 + $0x2c8] sm:$0xff] }
 0x4c4   :  { %v2832_v21 = vsel %vm162_vm3, %v2759_v48, %v2761_v59  ;;  %v1987_v59 = vld [vmem:[#allocation8 + $0x288] sm:$0xff] }
 0x4c5   :  { %4214 = vrot.lane.b32.xlu1 %v8040_v13, %s7231_s23  ;;  %v2757_v6 = vpop.permute.xlu0 %2756 }
 0x4c6   :  { %6196 = vmatpush3.bf16.msra.mxu0 %v2833_v50  ;;  %v7081_v50 = vld [vmem:[#allocation3 + $0xf0] ss:$8 sps:$4 sm:$0xff]  }
 0x4c7   :  { %6197 = vmatprep.subr.bf16.mxu0 %v2840_v15  ;;  %v2787_v10 = vpop.permute.xlu1 %2786  ;;  %4184 = vrot.lane.b32.xlu0 %v8050_v19, %s7231_s23  ;;  %v5865_v15 = vcombine.low %v1987_v59, %v1989_v32 }
 0x4c8   :  { %v2839_v13 = vsel %vm162_vm3, %v2787_v10, %v2789_v1  ;;  %v5866_v1 = vcombine.high %v1987_v59, %v1989_v32 }
 0x4c9   :  { %4118 = vrot.lane.b32.xlu1 %v8252_v0, %s7231_s23  ;;  %v2785_v41 = vpop.permute.xlu0 %2784 }
 0x4ca   :  { %6198 = vmatpush3.bf16.msra.mxu0 %v2832_v21  ;;  %3769 = vmatprep.mubr.bf16.mxu1 %v5866_v1  ;;  %v7086_v1 = vld [vmem:[#allocation3 + $0x50] ss:$8 sps:$4 sm:$0xff]  }
 0x4cb   :  { %6199 = vmatprep.subr.bf16.mxu0 %v2839_v13  ;;  %v2755_v8 = vpop.permute.xlu1 %2754  ;;  %4148 = vrot.lane.b32.xlu0 %v8262_v63, %s7231_s23  ;;  %v7082_v13 = vld [vmem:[#allocation3 + $0x70] ss:$8 sps:$4 sm:$0xff]  }
 0x4cc   :  { %v2831_v17 = vsel %vm162_vm3, %v2755_v8, %v2757_v6  ;;  %3770 = vmatmul.mubr.bf16.vlgmr.msra.gmra.mxu1 %v5865_v15  ;;  %v9641_v8 = vcombine.low %v8046_v57, %v8048_v54  ;;  %v7084_v57 = vld [vmem:[#allocation3 + $0x60] ss:$8 sps:$4 sm:$0xff]   ;;  %v2087_v54 = vld [vmem:[#allocation8 + $0x118] sm:$0xff] }
 0x4cd   :  { %4182 = vrot.lane.b32.xlu1 %v8054_v35, %s7231_s23  ;;  %v2753_v19 = vpop.permute.xlu0 %2752  ;;  %v2085_v35 = vld [vmem:[#allocation8 + $0xd8] sm:$0xff] }
 0x4ce   :  { %6200 = vmatpush3.bf16.msra.mxu0 %v2831_v17  ;;  %v5738_v21 = vcombine.high %v2083_v49, %v2085_v35  ;;  %v8287_v17 = vld [vmem:[#allocation3] ss:$8 sps:$4 sm:$0xff]  }
 0x4cf   :  { %v2783_v28 = vpop.permute.xlu1 %2782  ;;  %4212 = vrot.lane.b32.xlu0 %v8060_v5, %s7231_s23  ;;  %v8283_v5 = vld [vmem:[#allocation3 + $0x4] ss:$8 sps:$4 sm:$0xff]  }
 0x4d0   :  { %v2838_v27 = vsel %vm162_vm3, %v2783_v28, %v2785_v41 }
 0x4d1   :  { %4146 = vrot.lane.b32.xlu1 %v8267_v23, %s7231_s23  ;;  %6201 = vmatprep.subr.bf16.mxu0 %v2838_v27  ;;  %v8276_v10 = vpop.permute.xlu0 %4176  ;;  %v2089_v27 = vld [vmem:[#allocation8 + $0x158] sm:$0xff] }
 0x4d3   :  { %v2751_v12 = vpop.permute.xlu1 %2750  ;;  %4116 = vrot.lane.b32.xlu0 %v8283_v5, %s7231_s23 }
 0x4d4   :  { %v2830_v48 = vsel %vm162_vm3, %v2751_v12, %v2753_v19  ;;  %v7085_v19 = vld [vmem:[#allocation3 + $0xd0] ss:$8 sps:$4 sm:$0xff]   ;;  %v5737_v12 = vcombine.low %v2083_v49, %v2085_v35 }
 0x4d5   :  { %4210 = vrot.lane.b32.xlu1 %v8062_v46, %s7231_s23  ;;  %6202 = vmatpush3.bf16.msra.mxu0 %v2830_v48  ;;  %v7083_v46 = vld [vmem:[#allocation3 + $0xe0] ss:$8 sps:$4 sm:$0xff]   ;;  %v8291_v41 = vpop.permute.xlu0 %4144  ;;  %v5742_v48 = vcombine.high %v2087_v54, %v2089_v27 }
 0x4d6   :  { %6275 = vmatprep.subr.bf16.mxu0 %v7081_v50 }
 0x4d7   :  { %v8278_v6 = vpop.permute.xlu1 %4174  ;;  %4180 = vrot.lane.b32.xlu0 %v8068_v61, %s7231_s23  ;;  %v7087_v61 = vld [vmem:[#allocation3 + $0xc0] ss:$8 sps:$4 sm:$0xff]  }
 0x4d8   :  { %3040 = vmatmul.mubr.bf16.vlgmr.msra.gmra.mxu0 %v9641_v8  ;;  %v2091_v8 = vld [vmem:[#allocation8 + $0x198] sm:$0xff] }
 0x4d9   :  { %4114 = vrot.lane.b32.xlu1 %v8287_v17, %s7231_s23  ;;  %6276 = vmatpush3.bf16.msra.mxu0 %v7082_v13  ;;  %v8299_v32 = vpop.permute.xlu0 %4208  ;;  %v7088_v13 = vld [vmem:[#allocation3 + $0x40] ss:$8 sps:$4 sm:$0xff]  }
 0x4da   :  { %6277 = vmatprep.subr.bf16.mxu0 %v7083_v46  ;;  %3047 = vmatprep.mubr.bf16.mxu0 %v5738_v21  ;;  %v2093_v46 = vld [vmem:[#allocation8 + $0x1d8] sm:$0xff] }
 0x4db   :  { %v8293_v28 = vpop.permute.xlu1 %4142  ;;  %4240 = vrot.lane.b32.xlu0 %v7998_v9, %s7231_s23  ;;  %v7089_v9 = vld [vmem:[#allocation3 + $0xb0] ss:$8 sps:$4 sm:$0xff]  }
 0x4dd   :  { %4178 = vrot.lane.b32.xlu1 %v8070_v14, %s7231_s23  ;;  %6278 = vmatpush3.bf16.msra.mxu0 %v7084_v57  ;;  %v8311_v49 = vpop.permute.xlu0 %4172 }
 0x4de   :  { %6279 = vmatprep.subr.bf16.mxu0 %v7085_v19  ;;  %v5741_v19 = vcombine.low %v2087_v54, %v2089_v27 }
 0x4df   :  { %v6115_v59 = vpop.f32.mrf.mxu0  ;;  %v8301_v50 = vpop.permute.xlu1 %4206  ;;  %4938 = vrot.lane.b32.xlu0 %v8076_v42, %s7232_s24  ;;  %v7091_v42 = vld [vmem:[#allocation3 + $0xa0] ss:$8 sps:$4 sm:$0xff]  }
 0x4e0   :  { %3048 = vmatmul.mubr.bf16.gmra.mxu0 %v5737_v12  ;;  %v5746_v12 = vcombine.high %v2091_v8, %v2093_v46 }
 0x4e1   :  { %v6116_v15 = vpop.f32.mrf.mxu0  ;;  %4238 = vrot.lane.b32.xlu1 %v8000_v51, %s7231_s23  ;;  %6280 = vmatpush3.bf16.msra.mxu0 %v7086_v1  ;;  %v8321_v51 = vpop.permute.xlu0 %4236  ;;  %v7090_v1 = vld [vmem:[#allocation3 + $0x30] ss:$8 sps:$4 sm:$0xff]  }
 0x4e2   :  { %v8305_v21 = vadd.f32 %v6116_v15, %v6115_v59  ;;  %6281 = vmatprep.subr.bf16.mxu0 %v7087_v61  ;;  %3055 = vmatprep.mubr.bf16.mxu0 %v5742_v48  ;;  %v1991_v15 = vld [vmem:[#allocation8 + $0x308] sm:$0xff] }
 0x4e3   :  { %v8309_v14 = vpop.f32.mrf.mxu0  ;;  %v8313_v35 = vpop.permute.xlu1 %4170  ;;  %v1993_v61 = vld [vmem:[#allocation8 + $0x348] sm:$0xff]  ;;  %4906 = vrot.lane.b32.xlu0 %v8084_v40, %s7232_s24  ;;  %v2095_v40 = vld [vmem:[#allocation8 + $0x218] sm:$0xff] }
 0x4e4   :  { %9642 = vst [vmem:[#allocation22_spill] sm:$0xff] %v8305_v21  ;;  %9643 = vst [vmem:[#allocation23_spill] sm:$0xff] %v8309_v14  ;;  %v5870_v27 = vcombine.high %v1991_v15, %v1993_v61  ;;  %v7092_v14 = vld [vmem:[#allocation3 + $0x20] ss:$8 sps:$4 sm:$0xff]   ;;  %v2097_v21 = vld [vmem:[#allocation8 + $0x258] sm:$0xff] }
 0x4e5   :  { %v8315_v57 = vpop.f32.mrf.mxu0  ;;  %4936 = vrot.lane.b32.xlu1 %v8080_v43, %s7232_s24  ;;  %6282 = vmatpush3.bf16.msra.mxu0 %v7088_v13  ;;  %v5869_v13 = vcombine.low %v1991_v15, %v1993_v61  ;;  %v5750_v15 = vcombine.high %v2095_v40, %v2097_v21 }
 0x4e6   :  { %9644 = vst [vmem:[#allocation24_spill] sm:$0xff] %v8315_v57  ;;  %6283 = vmatprep.subr.bf16.mxu0 %v7089_v9  ;;  %v8331_v9 = vpop.permute.xlu0 %4140  ;;  %3777 = vmatprep.mubr.bf16.mxu1 %v5870_v27  ;;  %v1995_v27 = vld [vmem:[#allocation8 + $0x388] sm:$0xff] }
 0x4e7   :  { %v6121_v59 = vpop.f32.mrf.mxu0  ;;  %v8323_v48 = vpop.permute.xlu1 %4234  ;;  %4970 = vrot.lane.b32.xlu0 %v7960_v31, %s7232_s24  ;;  %3778 = vmatmul.mubr.bf16.gmra.mxu1 %v5869_v13  ;;  %v7095_v31 = vld [vmem:[#allocation3 + $0x80] ss:$8 sps:$4 sm:$0xff]  }
 0x4e8   :  { %3056 = vmatmul.mubr.bf16.gmra.mxu0 %v5741_v19 }
 0x4e9   :  { %v6122_v54 = vpop.f32.mrf.mxu0  ;;  %4904 = vrot.lane.b32.xlu1 %v8088_v29, %s7232_s24  ;;  %6284 = vmatpush3.bf16.msra.mxu0 %v7090_v1  ;;  %v7093_v29 = vld [vmem:[#allocation3 + $0x90] ss:$8 sps:$4 sm:$0xff]   ;;  %v5745_v1 = vcombine.low %v2091_v8, %v2093_v46 }
 0x4ea   :  { %v8329_v43 = vadd.f32 %v6122_v54, %v6121_v59  ;;  %6285 = vmatprep.subr.bf16.mxu0 %v7091_v42  ;;  %3063 = vmatprep.mubr.bf16.mxu0 %v5746_v12  ;;  %v8343_v12 = vpop.permute.xlu0 %4204  ;;  %v7094_v54 = vld [vmem:[#allocation3 + $0x10] ss:$8 sps:$4 sm:$0xff]  }
 0x4eb   :  { %v8333_v57 = vpop.f32.mrf.mxu0  ;;  %v8335_v19 = vpop.permute.xlu1 %4138  ;;  %4934 = vrot.lane.b32.xlu0 %v8096_v7, %s7232_s24  ;;  %v7096_v7 = vld [vmem:[#allocation3] ss:$8 sps:$4 sm:$0xff]  }
 0x4ec   :  { %9645 = vst [vmem:[#allocation25_spill] sm:$0xff] %v8329_v43  ;;  %9646 = vst [vmem:[#allocation26_spill] sm:$0xff] %v8333_v57  ;;  %v1997_v57 = vld [vmem:[#allocation8 + $0x3c8] sm:$0xff] }
 0x4ed   :  { %v8339_v59 = vpop.f32.mrf.mxu0  ;;  %4968 = vrot.lane.b32.xlu1 %v7962_v52, %s7232_s24  ;;  %6286 = vmatpush3.bf16.msra.mxu0 %v7092_v14  ;;  %v5874_v46 = vcombine.high %v1995_v27, %v1997_v57  ;;  %v5873_v14 = vcombine.low %v1995_v27, %v1997_v57 }
 0x4ee   :  { %9647 = vst [vmem:[#allocation27_spill] sm:$0xff] %v8339_v59  ;;  %6287 = vmatprep.subr.bf16.mxu0 %v7093_v29  ;;  %v8353_v13 = vpop.permute.xlu0 %4168  ;;  %v2099_v29 = vld [vmem:[#allocation8 + $0x298] sm:$0xff] }
 0x4ef   :  { %v6127_v61 = vpop.f32.mrf.mxu0  ;;  %v8345_v42 = vpop.permute.xlu1 %4202  ;;  %v2101_v59 = vld [vmem:[#allocation8 + $0x2d8] sm:$0xff]  ;;  %3785 = vmatprep.mubr.bf16.mxu1 %v5874_v46  ;;  %4998 = vrot.lane.b32.xlu0 %v7990_v38, %s7232_s24  ;;  %v2001_v46 = vld [vmem:[#allocation8 + $0x448] sm:$0xff] }
 0x4f0   :  { %3064 = vmatmul.mubr.bf16.gmra.mxu0 %v5745_v1  ;;  %3786 = vmatmul.mubr.bf16.gmra.mxu1 %v5873_v14  ;;  %v5754_v57 = vcombine.high %v2099_v29, %v2101_v59 }
 0x4f1   :  { %v6128_v8 = vpop.f32.mrf.mxu0  ;;  %4932 = vrot.lane.b32.xlu1 %v8100_v47, %s7232_s24  ;;  %6288 = vmatpush3.bf16.msra.mxu0 %v7094_v54  ;;  %v5749_v47 = vcombine.low %v2095_v40, %v2097_v21 }
 0x4f2   :  { %v8351_v52 = vadd.f32 %v6128_v8, %v6127_v61  ;;  %6289 = vmatprep.subr.bf16.mxu0 %v7095_v31  ;;  %3071 = vmatprep.mubr.bf16.mxu0 %v5750_v15  ;;  %v7129_v15 = vld [vmem:[#allocation3 + $0x1f0] ss:$8 sps:$4 sm:$0xff]   ;;  %v8365_v61 = vpop.permute.xlu0 %4232  ;;  %v1999_v8 = vld [vmem:[#allocation8 + $0x408] sm:$0xff] }
 0x4f3   :  { %v8355_v1 = vpop.f32.mrf.mxu0  ;;  %v8357_v43 = vpop.permute.xlu1 %4166  ;;  %4902 = vrot.lane.b32.xlu0 %v8110_v45, %s7232_s24  ;;  %v5878_v21 = vcombine.high %v1999_v8, %v2001_v46  ;;  %v5877_v40 = vcombine.low %v1999_v8, %v2001_v46  ;;  %v5753_v45 = vcombine.low %v2099_v29, %v2101_v59  ;;  %v2003_v46 = vld [vmem:[#allocation8 + $0x488] sm:$0xff] }
 0x4f4   :  { %9648 = vst [vmem:[#allocation28_spill] sm:$0xff] %v8351_v52  ;;  %9649 = vst [vmem:[#allocation29_spill] sm:$0xff] %v8355_v1 }
 0x4f5   :  { %v8361_v54 = vpop.f32.mrf.mxu0  ;;  %4996 = vrot.lane.b32.xlu1 %v7992_v16, %s7232_s24  ;;  %6290 = vmatpush3.bf16.msra.mxu0 %v7096_v7  ;;  %v2103_v7 = vld [vmem:[#allocation8 + $0x318] sm:$0xff] }
 0x4f6   :  { %9650 = vst [vmem:[#allocation30_spill] sm:$0xff] %v8361_v54  ;;  %6363 = vmatprep.subr.bf16.mxu0 %v7129_v15  ;;  %v8375_v14 = vpop.permute.xlu0 %4136  ;;  %v2105_v15 = vld [vmem:[#allocation8 + $0x358] sm:$0xff]  ;;  %3793 = vmatprep.mubr.bf16.mxu1 %v5878_v21 }
 0x4f7   :  { %v6133_v27 = vpop.f32.mrf.mxu0  ;;  %v8367_v31 = vpop.permute.xlu1 %4230  ;;  %4966 = vrot.lane.b32.xlu0 %v7946_v26, %s7232_s24 }
 0x4f8   :  { %3072 = vmatmul.mubr.bf16.gmra.mxu0 %v5749_v47  ;;  %3794 = vmatmul.mubr.bf16.gmra.mxu1 %v5877_v40  ;;  %v2107_v40 = vld [vmem:[#allocation8 + $0x398] sm:$0xff] }
 0x4f9   :  { %v6134_v38 = vpop.f32.mrf.mxu0  ;;  %4900 = vrot.lane.b32.xlu1 %v8114_v22, %s7232_s24  ;;  %3079 = vmatprep.mubr.bf16.mxu0 %v5754_v57  ;;  %v5758_v22 = vcombine.high %v2103_v7, %v2105_v15 }
 0x4fa   :  { %v8373_v16 = vadd.f32 %v6134_v38, %v6133_v27  ;;  %v8387_v57 = vpop.permute.xlu0 %4200  ;;  %v2005_v38 = vld [vmem:[#allocation8 + $0x4c8] sm:$0xff] }
 0x4fb   :  { %v8377_v54 = vpop.f32.mrf.mxu0  ;;  %v8379_v47 = vpop.permute.xlu1 %4134  ;;  %4930 = vrot.lane.b32.xlu0 %v8122_v11, %s7232_s24  ;;  %v5882_v59 = vcombine.high %v2003_v46, %v2005_v38  ;;  %v5757_v11 = vcombine.low %v2103_v7, %v2105_v15 }
 0x4fc   :  { %9651 = vst [vmem:[#allocation31_spill] sm:$0xff] %v8373_v16  ;;  %9652 = vst [vmem:[#allocation32_spill] sm:$0xff] %v8377_v54 }
 0x4fd   :  { %v8383_v1 = vpop.f32.mrf.mxu0  ;;  %4964 = vrot.lane.b32.xlu1 %v7950_v25, %s7232_s24  ;;  %v5881_v25 = vcombine.low %v2003_v46, %v2005_v38  ;;  %3801 = vmatprep.mubr.bf16.mxu1 %v5882_v59  ;;  %v2007_v38 = vld [vmem:[#allocation8 + $0x508] sm:$0xff] }
 0x4fe   :  { %9653 = vst [vmem:[#allocation33_spill] sm:$0xff] %v8383_v1  ;;  %v8397_v21 = vpop.permute.xlu0 %4164  ;;  %v2109_v1 = vld [vmem:[#allocation8 + $0x3d8] sm:$0xff] }
 0x4ff   :  { %v6139_v27 = vpop.f32.mrf.mxu0  ;;  %v8389_v8 = vpop.permute.xlu1 %4198  ;;  %4994 = vrot.lane.b32.xlu0 %v7982_v4, %s7232_s24 }
 0x500   :  { %3080 = vmatmul.mubr.bf16.gmra.mxu0 %v5753_v45  ;;  %3802 = vmatmul.mubr.bf16.gmra.mxu1 %v5881_v25  ;;  %v2111_v25 = vld [vmem:[#allocation8 + $0x418] sm:$0xff] }
 0x501   :  { %v6140_v26 = vpop.f32.mrf.mxu0  ;;  %4928 = vrot.lane.b32.xlu1 %v8126_v37, %s7232_s24  ;;  %3087 = vmatprep.mubr.bf16.mxu0 %v5758_v22  ;;  %v5762_v37 = vcombine.high %v2107_v40, %v2109_v1 }
 0x502   :  { %v8395_v29 = vadd.f32 %v6140_v26, %v6139_v27  ;;  %v8409_v22 = vpop.permute.xlu0 %4228  ;;  %v2009_v26 = vld [vmem:[#allocation8 + $0x548] sm:$0xff] }
 0x503   :  { %v8399_v54 = vpop.f32.mrf.mxu0  ;;  %v8401_v45 = vpop.permute.xlu1 %4162  ;;  %4898 = vrot.lane.b32.xlu0 %v8134_v60, %s7232_s24  ;;  %v5886_v7 = vcombine.high %v2007_v38, %v2009_v26  ;;  %v5761_v60 = vcombine.low %v2107_v40, %v2109_v1 }
 0x504   :  { %9654 = vst [vmem:[#allocation34_spill] sm:$0xff] %v8395_v29  ;;  %9655 = vst [vmem:[#allocation35_spill] sm:$0xff] %v8399_v54  ;;  %v7130_v29 = vld [vmem:[#allocation3 + $0x154] ss:$8 sps:$4 sm:$0xff]  }
 0x505   :  { %9656 = vst [vmem:[#allocation36_spill] sm:$0xff] %v8401_v45  ;;  %v8405_v16 = vpop.f32.mrf.mxu0  ;;  %4992 = vrot.lane.b32.xlu1 %v7984_v36, %s7232_s24  ;;  %v5885_v36 = vcombine.low %v2007_v38, %v2009_v26  ;;  %3809 = vmatprep.mubr.bf16.mxu1 %v5886_v7  ;;  %v2013_v7 = vld [vmem:[#allocation8 + $0x5c8] sm:$0xff] }
 0x506   :  { %9657 = vst [vmem:[#allocation37_spill] sm:$0xff] %v8405_v16  ;;  %v8419_v59 = vpop.permute.xlu0 %4132  ;;  %v2113_v16 = vld [vmem:[#allocation8 + $0x458] sm:$0xff] }
 0x507   :  { %v6145_v27 = vpop.f32.mrf.mxu0  ;;  %v8411_v46 = vpop.permute.xlu1 %4226  ;;  %9659 = vst [vmem:[#allocation39_spill] sm:$0xff] %v8419_v59  ;;  %4962 = vrot.lane.b32.xlu0 %v7130_v29, %s7232_s24  ;;  %v8531_v59 = vld [vmem:[#allocation8 + $0x28] sm:$0xff] }
 0x508   :  { %3088 = vmatmul.mubr.bf16.gmra.mxu0 %v5757_v11  ;;  %3810 = vmatmul.mubr.bf16.gmra.mxu1 %v5885_v36 }
 0x509   :  { %v6146_v4 = vpop.f32.mrf.mxu0  ;;  %4896 = vrot.lane.b32.xlu1 %v8138_v58, %s7232_s24  ;;  %3095 = vmatprep.mubr.bf16.mxu0 %v5762_v37  ;;  %v7131_v58 = vld [vmem:[#allocation3 + $0x150] ss:$8 sps:$4 sm:$0xff]   ;;  %v5766_v37 = vcombine.high %v2111_v25, %v2113_v16 }
 0x50a   :  { %v8417_v15 = vadd.f32 %v6146_v4, %v6145_v27  ;;  %v8429_v27 = vpop.permute.xlu0 %4196  ;;  %v2011_v4 = vld [vmem:[#allocation8 + $0x588] sm:$0xff] }
 0x50b   :  { %v8421_v54 = vpop.f32.mrf.mxu0  ;;  %v8423_v11 = vpop.permute.xlu1 %4130  ;;  %4926 = vrot.lane.b32.xlu0 %v8146_v55, %s7232_s24  ;;  %v5890_v1 = vcombine.high %v2011_v4, %v2013_v7  ;;  %v5889_v36 = vcombine.low %v2011_v4, %v2013_v7  ;;  %v5765_v55 = vcombine.low %v2111_v25, %v2113_v16  ;;  %v2121_v25 = vld [vmem:[#allocation8 + $0x558] sm:$0xff] }
 0x50c   :  { %9658 = vst [vmem:[#allocation38_spill] sm:$0xff] %v8417_v15  ;;  %9660 = vst [vmem:[#allocation40_spill] sm:$0xff] %v8421_v54  ;;  %v2117_v54 = vld [vmem:[#allocation8 + $0x4d8] sm:$0xff] }
 0x50d   :  { %9661 = vst [vmem:[#allocation41_spill] sm:$0xff] %v8423_v11  ;;  %v8426_v52 = vpop.f32.mrf.mxu0  ;;  %4960 = vrot.lane.b32.xlu1 %v7131_v58, %s7232_s24  ;;  %3817 = vmatprep.mubr.bf16.mxu1 %v5890_v1 }
 0x50e   :  { %9662 = vst [vmem:[#allocation42_spill] sm:$0xff] %v8426_v52  ;;  %v8439_v58 = vpop.permute.xlu0 %4160  ;;  %v2115_v52 = vld [vmem:[#allocation8 + $0x498] sm:$0xff] }
 0x50f   :  { %v6151_v38 = vpop.f32.mrf.mxu0  ;;  %v8431_v26 = vpop.permute.xlu1 %4194  ;;  %9664 = vst [vmem:[#allocation44_spill] sm:$0xff] %v8439_v58  ;;  %4990 = vrot.lane.b32.xlu0 %v7970_v34, %s7232_s24  ;;  %v9690_v58 = vld [vmem:[#allocation14_spill] sm:$0xff] }
 0x510   :  { %3096 = vmatmul.mubr.bf16.gmra.mxu0 %v5761_v60  ;;  %3818 = vmatmul.mubr.bf16.gmra.mxu1 %v5889_v36  ;;  %v7132_v36 = vld [vmem:[#allocation3 + $0x144] ss:$8 sps:$4 sm:$0xff]  }
 0x511   :  { %v6152_v29 = vpop.f32.mrf.mxu0  ;;  %4924 = vrot.lane.b32.xlu1 %v8150_v62, %s7232_s24  ;;  %3103 = vmatprep.mubr.bf16.mxu0 %v5766_v37  ;;  %v5770_v62 = vcombine.high %v2115_v52, %v2117_v54 }
 0x512   :  { %v8437_v40 = vadd.f32 %v6152_v29, %v6151_v38  ;;  %v8451_v37 = vpop.permute.xlu0 %4224 }
 0x513   :  { %v8441_v15 = vpop.f32.mrf.mxu0  ;;  %v8443_v60 = vpop.permute.xlu1 %4158  ;;  %4894 = vrot.lane.b32.xlu0 %v8162_v2, %s7232_s24 }
 0x514   :  { %9663 = vst [vmem:[#allocation43_spill] sm:$0xff] %v8437_v40  ;;  %9665 = vst [vmem:[#allocation45_spill] sm:$0xff] %v8441_v15  ;;  %v9674_v15 = vld [vmem:[#allocation17_spill] sm:$0xff] }
 0x515   :  { %9666 = vst [vmem:[#allocation46_spill] sm:$0xff] %v8443_v60  ;;  %v8447_v11 = vpop.f32.mrf.mxu0  ;;  %4988 = vrot.lane.b32.xlu1 %v7974_v56, %s7232_s24  ;;  %v2119_v56 = vld [vmem:[#allocation8 + $0x518] sm:$0xff] }
 0x516   :  { %9667 = vst [vmem:[#allocation47_spill] sm:$0xff] %v8447_v11  ;;  %v8461_v16 = vpop.permute.xlu0 %4128  ;;  %v7133_v11 = vld [vmem:[#allocation3 + $0x140] ss:$8 sps:$4 sm:$0xff]  }
 0x517   :  { %v6157_v38 = vpop.f32.mrf.mxu0  ;;  %v8453_v4 = vpop.permute.xlu1 %4222  ;;  %9669 = vst [vmem:[#allocation49_spill] sm:$0xff] %v8461_v16  ;;  %4958 = vrot.lane.b32.xlu0 %v7132_v36, %s7232_s24  ;;  %v2125_v36 = vld [vmem:[#allocation8 + $0x5d8] sm:$0xff]  ;;  %v9681_v16 = vld [vmem:[#allocation11_spill] sm:$0xff] }
 0x518   :  { %3104 = vmatmul.mubr.bf16.gmra.mxu0 %v5765_v55  ;;  %v5769_v55 = vcombine.low %v2115_v52, %v2117_v54 }
 0x519   :  { %v6158_v7 = vpop.f32.mrf.mxu0  ;;  %4892 = vrot.lane.b32.xlu1 %v8166_v53, %s7232_s24  ;;  %3111 = vmatprep.mubr.bf16.mxu0 %v5770_v62  ;;  %v5774_v53 = vcombine.high %v2119_v56, %v2121_v25 }
 0x51a   :  { %v8459_v34 = vadd.f32 %v6158_v7, %v6157_v38  ;;  %v8471_v62 = vpop.permute.xlu0 %4192 }
 0x51b   :  { %v8463_v29 = vpop.f32.mrf.mxu0  ;;  %v8465_v1 = vpop.permute.xlu1 %4126 }
 0x51c   :  { %9668 = vst [vmem:[#allocation48_spill] sm:$0xff] %v8459_v34  ;;  %9670 = vst [vmem:[#allocation50_spill] sm:$0xff] %v8463_v29  ;;  %v9673_v29 = vld [vmem:[#allocation16_spill] sm:$0xff] }
 0x51d   :  { %9671 = vst [vmem:[#allocation51_spill] sm:$0xff] %v8465_v1  ;;  %v8468_v2 = vpop.f32.mrf.mxu0  ;;  %4956 = vrot.lane.b32.xlu1 %v7133_v11, %s7232_s24  ;;  %4922 = vrot.lane.b32.xlu0 %v9673_v29, %s7232_s24  ;;  %v2123_v11 = vld [vmem:[#allocation8 + $0x598] sm:$0xff]  ;;  %v5773_v1 = vcombine.low %v2119_v56, %v2121_v25 }
 0x51e   :  { %9672 = vst [vmem:[#allocation52_spill] sm:$0xff] %v8468_v2  ;;  %v8481_v54 = vpop.permute.xlu0 %4156  ;;  %v5777_v60 = vcombine.low %v2123_v11, %v2125_v36 }
 0x51f   :  { %v6163_v38 = vpop.f32.mrf.mxu0  ;;  %v8473_v7 = vpop.permute.xlu1 %4190  ;;  %9676 = vst [vmem:[#allocation17_spill] sm:$0xff] %v8481_v54 }
 0x520   :  { %3112 = vmatmul.mubr.bf16.gmra.mxu0 %v5769_v55  ;;  %v9679_v55 = vld [vmem:[#allocation12_spill] sm:$0xff] }
 0x521   :  { %v6164_v34 = vpop.f32.mrf.mxu0  ;;  %4920 = vrot.lane.b32.xlu1 %v9674_v15, %s7232_s24  ;;  %3119 = vmatprep.mubr.bf16.mxu0 %v5774_v53  ;;  %v5778_v15 = vcombine.high %v2123_v11, %v2125_v36 }
 0x522   :  { %v8479_v52 = vadd.f32 %v6164_v34, %v6163_v38  ;;  %4986 = vrot.lane.b32.xlu0 %v9679_v55, %s7232_s24  ;;  %v8493_v34 = vpop.permute.xlu0 %4220  ;;  %v1968_v55 = vld [vmem:[#allocation8 + $0x40] sm:$0xff] }
 0x523   :  { %v8483_v2 = vpop.f32.mrf.mxu0  ;;  %v8485_v40 = vpop.permute.xlu1 %4154 }
 0x524   :  { %9675 = vst [vmem:[#allocation16_spill] sm:$0xff] %v8479_v52  ;;  %9677 = vst [vmem:[#allocation53_spill] sm:$0xff] %v8483_v2  ;;  %v9682_v2 = vld [vmem:[#allocation18_spill] sm:$0xff] }
 0x525   :  { %9678 = vst [vmem:[#allocation54_spill] sm:$0xff] %v8485_v40  ;;  %v8489_v29 = vpop.f32.mrf.mxu0  ;;  %4984 = vrot.lane.b32.xlu1 %v9681_v16, %s7232_s24  ;;  %v9683_v40 = vld [vmem:[#allocation19_spill] sm:$0xff] }
 0x526   :  { %9680 = vst [vmem:[#allocation12_spill] sm:$0xff] %v8489_v29  ;;  %4890 = vrot.lane.b32.xlu0 %v9682_v2, %s7232_s24  ;;  %v8503_v25 = vpop.permute.xlu0 %4124  ;;  %v1966_v16 = vld [vmem:[#allocation8] sm:$0xff] }
 0x527   :  { %v6169_v53 = vpop.f32.mrf.mxu0  ;;  %v8495_v38 = vpop.permute.xlu1 %4218  ;;  %9685 = vst [vmem:[#allocation18_spill] sm:$0xff] %v8503_v25  ;;  %v1972_v25 = vld [vmem:[#allocation8 + $0xc0] sm:$0xff]  ;;  %v5843_v45 = vcombine.low %v1966_v16, %v1968_v55 }
 0x528   :  { %3120 = vmatmul.mubr.bf16.gmra.mxu0 %v5773_v1  ;;  %v9688_v1 = vld [vmem:[#allocation13_spill] sm:$0xff] }
 0x529   :  { %v6170_v52 = vpop.f32.mrf.mxu0  ;;  %4888 = vrot.lane.b32.xlu1 %v9683_v40, %s7232_s24  ;;  %3127 = vmatprep.mubr.bf16.mxu0 %v5778_v15  ;;  %v5844_v40 = vcombine.high %v1966_v16, %v1968_v55  ;;  %v7134_v55 = vld [vmem:[#allocation3 + $0x170] ss:$8 sps:$4 sm:$0xff]  }
 0x52a   :  { %v8501_v56 = vadd.f32 %v6170_v52, %v6169_v53  ;;  %4954 = vrot.lane.b32.xlu0 %v9688_v1, %s7232_s24  ;;  %v8515_v52 = vpop.permute.xlu0 %4188 }
 0x52b   :  { %v8505_v29 = vpop.f32.mrf.mxu0  ;;  %v8507_v54 = vpop.permute.xlu1 %4122 }
 0x52c   :  { %9684 = vst [vmem:[#allocation11_spill] sm:$0xff] %v8501_v56  ;;  %9686 = vst [vmem:[#allocation19_spill] sm:$0xff] %v8505_v29  ;;  %v9691_v29 = vld [vmem:[#allocation20_spill] sm:$0xff] }
 0x52d   :  { %9687 = vst [vmem:[#allocation55_spill] sm:$0xff] %v8507_v54  ;;  %v8511_v2 = vpop.f32.mrf.mxu0  ;;  %4952 = vrot.lane.b32.xlu1 %v9690_v58, %s7232_s24  ;;  %v9692_v54 = vld [vmem:[#allocation21_spill] sm:$0xff]  ;;  %v1970_v58 = vld [vmem:[#allocation8 + $0x80] sm:$0xff] }
 0x52e   :  { %9689 = vst [vmem:[#allocation13_spill] sm:$0xff] %v8511_v2  ;;  %4918 = vrot.lane.b32.xlu0 %v9691_v29, %s7232_s24  ;;  %v8525_v36 = vpop.permute.xlu0 %4152  ;;  %v9697_v29 = vld [vmem:[#allocation15_spill] sm:$0xff] }
 0x52f   :  { %v6175_v15 = vpop.f32.mrf.mxu0  ;;  %v8517_v53 = vpop.permute.xlu1 %4186  ;;  %9694 = vst [vmem:[#allocation20_spill] sm:$0xff] %v8525_v36  ;;  %v7136_v36 = vld [vmem:[#allocation3 + $0x160] ss:$8 sps:$4 sm:$0xff]  }
 0x530   :  { %3128 = vmatmul.mubr.bf16.gmra.mxu0 %v5777_v60  ;;  %v8533_v60 = vld [vmem:[#allocation8 + $0x68] sm:$0xff] }
 0x531   :  { %v6176_v56 = vpop.f32.mrf.mxu0  ;;  %4916 = vrot.lane.b32.xlu1 %v9692_v54, %s7232_s24  ;;  %3600 = vmatprep.mubr.bf16.mxu0 %v5844_v40 }
 0x532   :  { %v8523_v11 = vadd.f32 %v6176_v56, %v6175_v15  ;;  %4982 = vrot.lane.b32.xlu0 %v9697_v29, %s7232_s24  ;;  %v5926_v56 = vcombine.high %v8531_v59, %v8533_v60  ;;  %v8545_v15 = vpop.permute.xlu0 %4216  ;;  %v7135_v29 = vld [vmem:[#allocation3 + $0x1e0] ss:$8 sps:$4 sm:$0xff]  }
 0x533   :  { %v8527_v1 = vpop.f32.mrf.mxu0  ;;  %v8529_v2 = vpop.permute.xlu1 %4150 }
 0x534   :  { %9693 = vst [vmem:[#allocation14_spill] sm:$0xff] %v8523_v11  ;;  %9695 = vst [vmem:[#allocation21_spill] sm:$0xff] %v8527_v1  ;;  %v5848_v1 = vcombine.high %v1970_v58, %v1972_v25  ;;  %4467 = vmatprep.mubr.bf16.mxu1 %v5926_v56 }
 0x535   :  { %9696 = vst [vmem:[#allocation56_spill] sm:$0xff] %v8529_v2  ;;  %v8537_v54 = vpop.f32.mrf.mxu0  ;;  %4980 = vrot.lane.b32.xlu1 %v8024_v20, %s7232_s24 }
 0x536   :  { %9698 = vst [vmem:[#allocation15_spill] sm:$0xff] %v8537_v54  ;;  %4886 = vrot.lane.b32.xlu0 %v8213_v30, %s7232_s24  ;;  %v8555_v40 = vpop.permute.xlu0 %4120  ;;  %v1974_v54 = vld [vmem:[#allocation8 + $0x100] sm:$0xff]  ;;  %v5847_v30 = vcombine.low %v1970_v58, %v1972_v25 }
 0x537   :  { %v6181_v11 = vpop.f32.mrf.mxu0  ;;  %v8547_v2 = vpop.permute.xlu1 %4214  ;;  %v7141_v25 = vld [vmem:[#allocation3 + $0x1c0] ss:$8 sps:$4 sm:$0xff]  }
 0x538   :  { %3601 = vmatmul.mubr.bf16.vlgmr.msra.gmra.mxu0 %v5843_v45  ;;  %v1976_v45 = vld [vmem:[#allocation8 + $0x140] sm:$0xff] }
 0x539   :  { %v6182_v16 = vpop.f32.mrf.mxu0  ;;  %6364 = vmatpush3.bf16.msra.mxu0 %v7134_v55  ;;  %4884 = vrot.lane.b32.xlu1 %v8218_v18, %s7232_s24  ;;  %v7137_v18 = vld [vmem:[#allocation3 + $0x1d0] ss:$8 sps:$4 sm:$0xff]   ;;  %v1978_v58 = vld [vmem:[#allocation8 + $0x180] sm:$0xff] }
 0x53a   :  { %v8553_v20 = vadd.f32 %v6182_v16, %v6181_v11  ;;  %6365 = vmatprep.subr.bf16.mxu0 %v7135_v29  ;;  %3608 = vmatprep.mubr.bf16.mxu0 %v5848_v1  ;;  %v8563_v11 = vpop.permute.xlu0 %4184  ;;  %v5852_v16 = vcombine.high %v1974_v54, %v1976_v45  ;;  %v7138_v1 = vld [vmem:[#allocation3 + $0x1f4] ss:$8 sps:$4 sm:$0xff]   ;;  %v7139_v29 = vld [vmem:[#allocation3 + $0x150] ss:$8 sps:$4 sm:$0xff]  }
 0x53b   :  { %v8557_v56 = vpop.permute.xlu1 %4118  ;;  %4950 = vrot.lane.b32.xlu0 %v8030_v33, %s7232_s24  ;;  %v7140_v33 = vld [vmem:[#allocation3 + $0x1f0] ss:$8 sps:$4 sm:$0xff]  }
 0x53c   :  { %9699 = vst [vmem:[#allocation57_spill] sm:$0xff] %v8553_v20  ;;  %9700 = vst [vmem:[#allocation58_spill] sm:$0xff] %v8557_v56  ;;  %v5851_v20 = vcombine.low %v1974_v54, %v1976_v45  ;;  %v7144_v56 = vld [vmem:[#allocation3 + $0x194] ss:$8 sps:$4 sm:$0xff]   ;;  %v7146_v54 = vld [vmem:[#allocation3 + $0x190] ss:$8 sps:$4 sm:$0xff]  }
 0x53d   :  { %6366 = vmatpush3.bf16.msra.mxu0 %v7136_v36  ;;  %4948 = vrot.lane.b32.xlu1 %v8032_v39, %s7232_s24  ;;  %v7147_v45 = vld [vmem:[#allocation3 + $0x1a0] ss:$8 sps:$4 sm:$0xff]  }
 0x53e   :  { %6367 = vmatprep.subr.bf16.mxu0 %v7137_v18  ;;  %v4149_v36 = vpop.permute.xlu0 %4148  ;;  %v1980_v18 = vld [vmem:[#allocation8 + $0x1c0] sm:$0xff] }
 0x53f   :  { %v8565_v55 = vpop.permute.xlu1 %4182  ;;  %5002 = vrot.lane.b32.xlu0 %v7138_v1, %s7232_s24  ;;  %v7142_v1 = vld [vmem:[#allocation3 + $0x140] ss:$8 sps:$4 sm:$0xff]  }
 0x540   :  { %3609 = vmatmul.mubr.bf16.gmra.mxu0 %v5847_v30 }
 0x541   :  { %6368 = vmatpush3.bf16.msra.mxu0 %v7139_v29  ;;  %5000 = vrot.lane.b32.xlu1 %v7140_v33, %s7232_s24  ;;  %v7143_v29 = vld [vmem:[#allocation3 + $0x1b0] ss:$8 sps:$4 sm:$0xff]  }
 0x542   :  { %6369 = vmatprep.subr.bf16.mxu0 %v7141_v25  ;;  %3616 = vmatprep.mubr.bf16.mxu0 %v5852_v16  ;;  %v8576_v33 = vpop.permute.xlu0 %4212  ;;  %v5856_v16 = vcombine.high %v1978_v58, %v1980_v18 }
 0x543   :  { %v4147_v39 = vpop.permute.xlu1 %4146  ;;  %4914 = vrot.lane.b32.xlu0 %v8229_v44, %s7232_s24  ;;  %v7145_v44 = vld [vmem:[#allocation3 + $0x130] ss:$8 sps:$4 sm:$0xff]  }
 0x544   :  { %v8572_v30 = vsel %vm169_vm2, %v4147_v39, %v4149_v36  ;;  %v1982_v39 = vld [vmem:[#allocation8 + $0x200] sm:$0xff] }
 0x545   :  { %9701 = vst [vmem:[#allocation59_spill] sm:$0xff] %v8572_v30  ;;  %6370 = vmatpush3.bf16.msra.mxu0 %v7142_v1  ;;  %4912 = vrot.lane.b32.xlu1 %v8236_v24, %s7232_s24  ;;  %v1984_v1 = vld [vmem:[#allocation8 + $0x240] sm:$0xff]  ;;  %v7150_v30 = vld [vmem:[#allocation3 + $0x114] ss:$8 sps:$4 sm:$0xff]  }
 0x546   :  { %6371 = vmatprep.subr.bf16.mxu0 %v7143_v29  ;;  %v4117_v36 = vpop.permute.xlu0 %4116 }
 0x547   :  { %v8578_v25 = vpop.permute.xlu1 %4210  ;;  %4978 = vrot.lane.b32.xlu0 %v7144_v56, %s7232_s24  ;;  %v7148_v56 = vld [vmem:[#allocation3 + $0x120] ss:$8 sps:$4 sm:$0xff]  }
 0x548   :  { %3617 = vmatmul.mubr.bf16.gmra.mxu0 %v5851_v20  ;;  %v5855_v20 = vcombine.low %v1978_v58, %v1980_v18  ;;  %v7153_v58 = vld [vmem:[#allocation3 + $0x180] ss:$8 sps:$4 sm:$0xff]  }
 0x549   :  { %6372 = vmatpush3.bf16.msra.mxu0 %v7145_v44  ;;  %4976 = vrot.lane.b32.xlu1 %v7146_v54, %s7232_s24  ;;  %v7149_v44 = vld [vmem:[#allocation3 + $0x190] ss:$8 sps:$4 sm:$0xff]  }
 0x54a   :  { %6373 = vmatprep.subr.bf16.mxu0 %v7147_v45  ;;  %3624 = vmatprep.mubr.bf16.mxu0 %v5856_v16  ;;  %v8589_v54 = vpop.permute.xlu0 %4180  ;;  %v5860_v16 = vcombine.high %v1982_v39, %v1984_v1 }
 0x54b   :  { %v4115_v24 = vpop.permute.xlu1 %4114  ;;  %4882 = vrot.lane.b32.xlu0 %v8247_v3, %s7232_s24  ;;  %v7152_v3 = vld [vmem:[#allocation3 + $0x110] ss:$8 sps:$4 sm:$0xff]  }
 0x54c   :  { %v8583_v29 = vsel %vm169_vm2, %v4115_v24, %v4117_v36  ;;  %v7151_v36 = vld [vmem:[#allocation3 + $0x110] ss:$8 sps:$4 sm:$0xff]   ;;  %v1986_v24 = vld [vmem:[#allocation8 + $0x280] sm:$0xff] }
 0x54d   :  { %9702 = vst [vmem:[#allocation60_spill] sm:$0xff] %v8583_v29  ;;  %6374 = vmatpush3.bf16.msra.mxu0 %v7148_v56  ;;  %4880 = vrot.lane.b32.xlu1 %v8252_v0, %s7232_s24  ;;  %v1988_v56 = vld [vmem:[#allocation8 + $0x2c0] sm:$0xff] }
 0x54e   :  { %6375 = vmatprep.subr.bf16.mxu0 %v7149_v44  ;;  %v4241_v18 = vpop.permute.xlu0 %4240  ;;  %v5859_v44 = vcombine.low %v1982_v39, %v1984_v1  ;;  %v7154_v29 = vld [vmem:[#allocation3 + $0x100] ss:$8 sps:$4 sm:$0xff]   ;;  %v4272_v39 = vsel %vm169_vm2, %v8323_v48, %v8321_v51  ;;  %v4271_v51 = vsel %vm169_vm2, %v8367_v31, %v8365_v61  ;;  %v4270_v31 = vsel %vm169_vm2, %v8411_v46, %v8409_v22 }
 0x54f   :  { %v8591_v45 = vpop.permute.xlu1 %4178  ;;  %4946 = vrot.lane.b32.xlu0 %v7150_v30, %s7232_s24  ;;  %v4257_v30 = vsel %vm169_vm2, %v8278_v6, %v8276_v10  ;;  %v7156_v6 = vld [vmem:[#allocation3 + $0x180] ss:$8 sps:$4 sm:$0xff]  }
 0x550   :  { %3625 = vmatmul.mubr.bf16.gmra.mxu0 %v5855_v20  ;;  %v5351_v22 = vld [vmem:[%s9613_s6 + $0x8] sm:$0xff]  ;;  %v5350_v46 = vld [vmem:[%s9613_s6] sm:$0xff] }
 0x551   :  { %6376 = vmatpush3.bf16.msra.mxu0 %v7151_v36  ;;  %4944 = vrot.lane.b32.xlu1 %v7152_v3, %s7232_s24  ;;  %v1992_v3 = vld [vmem:[#allocation8 + $0x340] sm:$0xff] }
 0x552   :  { %6377 = vmatprep.subr.bf16.mxu0 %v7153_v58  ;;  %3632 = vmatprep.mubr.bf16.mxu0 %v5860_v16  ;;  %v4265_v16 = vsel %vm169_vm2, %v8301_v50, %v8299_v32  ;;  %v4939_v36 = vpop.permute.xlu0 %4938  ;;  %v4264_v32 = vsel %vm169_vm2, %v8345_v42, %v8343_v12  ;;  %v4263_v12 = vsel %vm169_vm2, %v8389_v8, %v8387_v57 }
 0x553   :  { %v4239_v0 = vpop.permute.xlu1 %4238  ;;  %4910 = vrot.lane.b32.xlu0 %v8262_v63, %s7232_s24  ;;  %v5864_v63 = vcombine.high %v1986_v24, %v1988_v56  ;;  %v4262_v57 = vsel %vm169_vm2, %v8431_v26, %v8429_v27 }
 0x554   :  { %v4273_v20 = vsel %vm169_vm2, %v4239_v0, %v4241_v18  ;;  %v5863_v18 = vcombine.low %v1986_v24, %v1988_v56  ;;  %v4269_v56 = vsel %vm169_vm2, %v8453_v4, %v8451_v37  ;;  %v5352_v37 = vld [vmem:[%s9613_s6 + $0x10] sm:$0xff] }
 0x555   :  { %6378 = vmatpush3.bf16.msra.mxu0 %v7154_v29  ;;  %4908 = vrot.lane.b32.xlu1 %v8267_v23, %s7232_s24  ;;  %v7155_v23 = vld [vmem:[#allocation3 + $0x184] ss:$8 sps:$4 sm:$0xff]  }
 0x556   :  { %6451 = vmatprep.subr.bf16.mxu0 %v4257_v30  ;;  %6539 = vmatprep.subr.bf16.mxu1 %v4273_v20  ;;  %v4907_v50 = vpop.permute.xlu0 %4906  ;;  %v1990_v29 = vld [vmem:[#allocation8 + $0x300] sm:$0xff] }
 0x557   :  { %6540 = vmatpush3.bf16.msra.mxu1 %v4265_v16  ;;  %v4937_v1 = vpop.permute.xlu1 %4936  ;;  %4974 = vrot.lane.b32.xlu0 %v7155_v23, %s7232_s24  ;;  %v5868_v61 = vcombine.high %v1990_v29, %v1992_v3  ;;  %v1996_v30 = vld [vmem:[#allocation8 + $0x3c0] sm:$0xff]  ;;  %v5867_v27 = vcombine.low %v1990_v29, %v1992_v3  ;;  %v4261_v16 = vsel %vm169_vm2, %v8473_v7, %v8471_v62  ;;  %v5357_v3 = vld [vmem:[%s9613_s6 + $0x38] sm:$0xff] }
 0x558   :  { %6541 = vmatprep.subr.bf16.mxu1 %v4272_v39  ;;  %3633 = vmatmul.mubr.bf16.gmra.mxu0 %v5859_v44  ;;  %v8610_v10 = vsel %vm176_vm1, %v4937_v1, %v4939_v36  ;;  %v1994_v44 = vld [vmem:[#allocation8 + $0x380] sm:$0xff]  ;;  %v4268_v39 = vsel %vm169_vm2, %v8495_v38, %v8493_v34  ;;  %v4260_v7 = vsel %vm169_vm2, %v8517_v53, %v8515_v52 }
 0x559   :  { %4972 = vrot.lane.b32.xlu1 %v7156_v6, %s7232_s24  ;;  %3640 = vmatprep.mubr.bf16.mxu0 %v5864_v63  ;;  %v5353_v63 = vld [vmem:[%s9613_s6 + $0x18] sm:$0xff]  ;;  %v5872_v4 = vcombine.high %v1994_v44, %v1996_v30  ;;  %v5355_v6 = vld [vmem:[%s9613_s6 + $0x28] sm:$0xff]  ;;  %v5354_v34 = vld [vmem:[%s9613_s6 + $0x20] sm:$0xff]  ;;  %v4267_v38 = vsel %vm169_vm2, %v8547_v2, %v8545_v15  ;;  %v5871_v53 = vcombine.low %v1994_v44, %v1996_v30 }
 0x55a   :  { %v4971_v42 = vpop.permute.xlu0 %4970  ;;  %v5356_v2 = vld [vmem:[%s9613_s6 + $0x30] sm:$0xff] }
 0x55b   :  { %6542 = vmatpush3.bf16.msra.mxu1 %v4264_v32  ;;  %v4905_v48 = vpop.permute.xlu1 %4904  ;;  %4878 = vrot.lane.b32.xlu0 %v8283_v5, %s7232_s24  ;;  %v7157_v5 = vld [vmem:[#allocation3 + $0x104] ss:$8 sps:$4 sm:$0xff]  }
 0x55c   :  { %6543 = vmatprep.subr.bf16.mxu1 %v4271_v51  ;;  %v8621_v58 = vsel %vm176_vm1, %v4905_v48, %v4907_v50  ;;  %v1998_v50 = vld [vmem:[#allocation8 + $0x400] sm:$0xff]  ;;  %v4259_v48 = vsel %vm169_vm2, %v8565_v55, %v8563_v11  ;;  %v3831_v11 = vld [vmem:[#allocation8 + $0xa8] sm:$0xff] }
 0x55d   :  { %4876 = vrot.lane.b32.xlu1 %v8287_v17, %s7232_s24  ;;  %v7158_v17 = vld [vmem:[#allocation3 + $0x100] ss:$8 sps:$4 sm:$0xff]  }
 0x55e   :  { %v4935_v8 = vpop.permute.xlu0 %4934  ;;  %v2000_v51 = vld [vmem:[#allocation8 + $0x440] sm:$0xff]  ;;  %v3833_v55 = vld [vmem:[#allocation8 + $0xe8] sm:$0xff] }
 0x55f   :  { %6544 = vmatpush3.bf16.msra.mxu1 %v4263_v12  ;;  %v4969_v0 = vpop.permute.xlu1 %4968  ;;  %4942 = vrot.lane.b32.xlu0 %v7157_v5, %s7232_s24  ;;  %v5876_v15 = vcombine.high %v1998_v50, %v2000_v51  ;;  %v2002_v5 = vld [vmem:[#allocation8 + $0x480] sm:$0xff] }
 0x560   :  { %6545 = vmatprep.subr.bf16.mxu1 %v4270_v31  ;;  %v8634_v24 = vsel %vm176_vm1, %v4969_v0, %v4971_v42  ;;  %3641 = vmatmul.mubr.bf16.gmra.mxu0 %v5863_v18  ;;  %v4266_v18 = vsel %vm169_vm2, %v8578_v25, %v8576_v33  ;;  %v5359_v0 = vld [vmem:[%s9613_s6 + $0x48] sm:$0xff]  ;;  %v5358_v33 = vld [vmem:[%s9613_s6 + $0x40] sm:$0xff] }
 0x561   :  { %4940 = vrot.lane.b32.xlu1 %v7158_v17, %s7232_s24  ;;  %3648 = vmatprep.mubr.bf16.mxu0 %v5868_v61  ;;  %v4258_v61 = vsel %vm169_vm2, %v8591_v45, %v8589_v54  ;;  %v2004_v17 = vld [vmem:[#allocation8 + $0x4c0] sm:$0xff]  ;;  %v5361_v45 = vld [vmem:[%s9613_s6 + $0x58] sm:$0xff] }
 0x562   :  { %v4999_v36 = vpop.permute.xlu0 %4998 }
 0x563   :  { %6546 = vmatpush3.bf16.msra.mxu1 %v4262_v57  ;;  %v4933_v20 = vpop.permute.xlu1 %4932  ;;  %5381 = vperm.xlu0 %6847, %v5351_v22   ;;  %v5930_v57 = vcombine.high %v3831_v11, %v3833_v55 }
 0x564   :  { %6547 = vmatprep.subr.bf16.mxu1 %v4269_v56  ;;  %v8651_v26 = vsel %vm176_vm1, %v4933_v20, %v4935_v8  ;;  %v5875_v8 = vcombine.low %v1998_v50, %v2000_v51  ;;  %v5880_v56 = vcombine.high %v2002_v5, %v2004_v17  ;;  %v9703_v20 = vcombine.low %v8531_v59, %v8533_v60  ;;  %v5362_v59 = vld [vmem:[%s9613_s6 + $0x60] sm:$0xff]  ;;  %v3839_v51 = vld [vmem:[#allocation8 + $0x1a8] sm:$0xff] }
 0x565   :  { %5376 = vperm.xlu1 %6848, %v5350_v46   ;;  %v5360_v46 = vld [vmem:[%s9613_s6 + $0x50] sm:$0xff]  ;;  %v5929_v60 = vcombine.low %v3831_v11, %v3833_v55 }
 0x566   :  { %v4903_v23 = vpop.permute.xlu0 %4902 }
 0x567   :  { %6548 = vmatpush3.bf16.msra.mxu1 %v4261_v16  ;;  %v4997_v1 = vpop.permute.xlu1 %4996  ;;  %5391 = vperm.xlu0 %6847, %v5353_v63   ;;  %v3837_v16 = vld [vmem:[#allocation8 + $0x168] sm:$0xff] }
 0x568   :  { %6549 = vmatprep.subr.bf16.mxu1 %v4268_v39  ;;  %3649 = vmatmul.mubr.bf16.gmra.mxu0 %v5867_v27  ;;  %v8666_v62 = vsel %vm176_vm1, %v4997_v1, %v4999_v36  ;;  %v3835_v27 = vld [vmem:[#allocation8 + $0x128] sm:$0xff]  ;;  %v2008_v39 = vld [vmem:[#allocation8 + $0x540] sm:$0xff] }
 0x569   :  { %5386 = vperm.xlu1 %6848, %v5352_v37   ;;  %3656 = vmatprep.mubr.bf16.mxu0 %v5872_v4  ;;  %v5363_v63 = vld [vmem:[%s9613_s6 + $0x68] sm:$0xff]  ;;  %v2006_v4 = vld [vmem:[#allocation8 + $0x500] sm:$0xff]  ;;  %v5934_v1 = vcombine.high %v3835_v27, %v3837_v16 }
 0x56a   :  { %v4967_v29 = vpop.permute.xlu0 %4966  ;;  %v5883_v55 = vcombine.low %v2006_v4, %v2008_v39 }
 0x56b   :  { %6550 = vmatpush3.bf16.msra.mxu1 %v4260_v7  ;;  %v4901_v32 = vpop.permute.xlu1 %4900  ;;  %5401 = vperm.xlu0 %6847, %v5355_v6  }
 0x56c   :  { %6551 = vmatprep.subr.bf16.mxu1 %v4267_v38  ;;  %v8681_v52 = vsel %vm176_vm1, %v4901_v32, %v4903_v23  ;;  %v5879_v23 = vcombine.low %v2002_v5, %v2004_v17  ;;  %v5364_v38 = vld [vmem:[%s9613_s6 + $0x70] sm:$0xff]  ;;  %v5884_v32 = vcombine.high %v2006_v4, %v2008_v39  ;;  %v3843_v17 = vld [vmem:[#allocation8 + $0x228] sm:$0xff] }
 0x56d   :  { %5396 = vperm.xlu1 %6848, %v5354_v34   ;;  %v5365_v34 = vld [vmem:[%s9613_s6 + $0x78] sm:$0xff]  ;;  %v3847_v39 = vld [vmem:[#allocation8 + $0x2a8] sm:$0xff] }
 0x56e   :  { %v4931_v31 = vpop.permute.xlu0 %4930 }
 0x56f   :  { %6552 = vmatpush3.bf16.msra.mxu1 %v4259_v48  ;;  %v4965_v12 = vpop.permute.xlu1 %4964  ;;  %5411 = vperm.xlu0 %6847, %v5357_v3   ;;  %v5366_v3 = vld [vmem:[%s9613_s6 + $0x80] sm:$0xff] }
 0x570   :  { %6553 = vmatprep.subr.bf16.mxu1 %v4266_v18  ;;  %v8696_v42 = vsel %vm176_vm1, %v4965_v12, %v4967_v29  ;;  %3657 = vmatmul.mubr.bf16.gmra.mxu0 %v5871_v53  ;;  %v3841_v53 = vld [vmem:[#allocation8 + $0x1e8] sm:$0xff]  ;;  %v2010_v18 = vld [vmem:[#allocation8 + $0x580] sm:$0xff] }
 0x571   :  { %5406 = vperm.xlu1 %6848, %v5356_v2   ;;  %3664 = vmatprep.mubr.bf16.mxu0 %v5876_v15  ;;  %v5367_v29 = vld [vmem:[%s9613_s6 + $0x88] sm:$0xff]  ;;  %v5933_v2 = vcombine.low %v3835_v27, %v3837_v16  ;;  %v2012_v12 = vld [vmem:[#allocation8 + $0x5c0] sm:$0xff]  ;;  %v5938_v11 = vcombine.high %v3839_v51, %v3841_v53 }
 0x572   :  { %v4995_v54 = vpop.permute.xlu0 %4994 }
 0x573   :  { %6554 = vmatpush3.bf16.msra.mxu1 %v4258_v61  ;;  %v4929_v25 = vpop.permute.xlu1 %4928  ;;  %5421 = vperm.xlu0 %6847, %v5359_v0   ;;  %v5369_v0 = vld [vmem:[%s9613_s6 + $0x98] sm:$0xff] }
 0x574   :  { %v8708_v22 = vsel %vm176_vm1, %v4929_v25, %v4931_v31  ;;  %v5888_v25 = vcombine.high %v2010_v18, %v2012_v12 }
 0x575   :  { %5416 = vperm.xlu1 %6848, %v5358_v33   ;;  %v5368_v33 = vld [vmem:[%s9613_s6 + $0x90] sm:$0xff] }
 0x576   :  { %4468 = vmatmul.mubr.bf16.vlgmr.msra.gmra.mxu1 %v9703_v20  ;;  %v4899_v36 = vpop.permute.xlu0 %4898  ;;  %v1967_v20 = vld [vmem:[#allocation8 + $0x8] sm:$0xff] }
 0x577   :  { %v4993_v44 = vpop.permute.xlu1 %4992  ;;  %4475 = vmatprep.mubr.bf16.mxu1 %v5930_v57  ;;  %5431 = vperm.xlu0 %6847, %v5361_v45   ;;  %v3845_v57 = vld [vmem:[#allocation8 + $0x268] sm:$0xff]  ;;  %v5370_v45 = vld [vmem:[%s9613_s6 + $0xa0] sm:$0xff] }
 0x578   :  { %3665 = vmatmul.mubr.bf16.gmra.mxu0 %v5875_v8  ;;  %v8720_v30 = vsel %vm176_vm1, %v4993_v44, %v4995_v54  ;;  %v5371_v54 = vld [vmem:[%s9613_s6 + $0xa8] sm:$0xff]  ;;  %v5942_v27 = vcombine.high %v3843_v17, %v3845_v57 }
 0x579   :  { %5426 = vperm.xlu1 %6848, %v5360_v46   ;;  %3672 = vmatprep.mubr.bf16.mxu0 %v5880_v56  ;;  %v5937_v46 = vcombine.low %v3839_v51, %v3841_v53  ;;  %v1969_v44 = vld [vmem:[#allocation8 + $0x48] sm:$0xff]  ;;  %v5941_v51 = vcombine.low %v3843_v17, %v3845_v57 }
 0x57a   :  { %v8731_v6 = vpop.permute.xlu0 %4962  ;;  %v1975_v57 = vld [vmem:[#allocation8 + $0x108] sm:$0xff] }
 0x57b   :  { %v4897_v37 = vpop.permute.xlu1 %4896  ;;  %5441 = vperm.xlu0 %6847, %v5363_v63  }
 0x57c   :  { %v8729_v7 = vsel %vm176_vm1, %v4897_v37, %v4899_v36  ;;  %v5887_v36 = vcombine.low %v2010_v18, %v2012_v12  ;;  %v5846_v37 = vcombine.high %v1967_v20, %v1969_v44  ;;  %v4249_v12 = vsel %vm169_vm2, %v8293_v28, %v8291_v41 }
 0x57d   :  { %5436 = vperm.xlu1 %6848, %v5362_v59   ;;  %v5373_v59 = vld [vmem:[%s9613_s6 + $0xb8] sm:$0xff]  ;;  %v4248_v28 = vsel %vm169_vm2, %v8335_v19, %v8331_v9 }
 0x57e   :  { %4476 = vmatmul.mubr.bf16.gmra.mxu1 %v5929_v60  ;;  %v4927_v48 = vpop.permute.xlu0 %4926  ;;  %v5372_v60 = vld [vmem:[%s9613_s6 + $0xb0] sm:$0xff] }
 0x57f   :  { %v8739_v50 = vpop.permute.xlu1 %4960  ;;  %4483 = vmatprep.mubr.bf16.mxu1 %v5934_v1  ;;  %5451 = vperm.xlu0 %6847, %v5365_v34   ;;  %v3849_v1 = vld [vmem:[#allocation8 + $0x2e8] sm:$0xff]  ;;  %v8781_v34 = vpop.f32.mrf.mxu0 }
 0x580   :  { %3673 = vmatmul.mubr.bf16.gmra.mxu0 %v5879_v23 }
 0x581   :  { %5446 = vperm.xlu1 %6848, %v5364_v38   ;;  %3680 = vmatprep.mubr.bf16.mxu0 %v5884_v32  ;;  %v1971_v38 = vld [vmem:[#allocation8 + $0x88] sm:$0xff] }
 0x582   :  { %v8750_v31 = vpop.permute.xlu0 %4990  ;;  %v1973_v32 = vld [vmem:[#allocation8 + $0xc8] sm:$0xff] }
 0x583   :  { %v4925_v15 = vpop.permute.xlu1 %4924  ;;  %5461 = vperm.xlu0 %6847, %v5367_v29   ;;  %v5845_v29 = vcombine.low %v1967_v20, %v1969_v44  ;;  %v5849_v20 = vcombine.low %v1971_v38, %v1973_v32  ;;  %v9704_v44 = vld [vmem:[#allocation22_spill] sm:$0xff] }
 0x584   :  { %v8748_v61 = vsel %vm176_vm1, %v4925_v15, %v4927_v48  ;;  %v5946_v48 = vcombine.high %v3847_v39, %v3849_v1 }
 0x585   :  { %5456 = vperm.xlu1 %6848, %v5366_v3   ;;  %v5850_v3 = vcombine.high %v1971_v38, %v1973_v32 }
 0x586   :  { %4484 = vmatmul.mubr.bf16.gmra.mxu1 %v5933_v2  ;;  %v4895_v8 = vpop.permute.xlu0 %4894  ;;  %v8785_v2 = vpop.f32.mrf.mxu0 }
 0x587   :  { %v8758_v5 = vpop.permute.xlu1 %4988  ;;  %4491 = vmatprep.mubr.bf16.mxu1 %v5938_v11  ;;  %5471 = vperm.xlu0 %6847, %v5369_v0   ;;  %v3853_v0 = vld [vmem:[#allocation8 + $0x368] sm:$0xff] }
 0x588   :  { %3681 = vmatmul.mubr.bf16.gmra.mxu0 %v5883_v55  ;;  %v3851_v55 = vld [vmem:[#allocation8 + $0x328] sm:$0xff] }
 0x589   :  { %5466 = vperm.xlu1 %6848, %v5368_v33   ;;  %3688 = vmatprep.mubr.bf16.mxu0 %v5888_v25  ;;  %v4256_v33 = vsel %vm169_vm2, %v8313_v35, %v8311_v49  ;;  %v5950_v41 = vcombine.high %v3851_v55, %v3853_v0  ;;  %v4255_v35 = vsel %vm169_vm2, %v8357_v43, %v8353_v13  ;;  %v8819_v43 = vld [vmem:[#allocation8 + $0x3a8] sm:$0xff] }
 0x58a   :  { %v8769_v63 = vpop.permute.xlu0 %4958  ;;  %v8821_v13 = vld [vmem:[#allocation8 + $0x3e8] sm:$0xff] }
 0x58b   :  { %v4893_v56 = vpop.permute.xlu1 %4892  ;;  %5481 = vperm.xlu0 %6847, %v5371_v54   ;;  %v5945_v54 = vcombine.low %v3847_v39, %v3849_v1  ;;  %v4247_v1 = vsel %vm169_vm2, %v8379_v47, %v8375_v14  ;;  %v1981_v14 = vld [vmem:[#allocation8 + $0x1c8] sm:$0xff]  ;;  %v5949_v47 = vcombine.low %v3851_v55, %v3853_v0 }
 0x58c   :  { %v8767_v16 = vsel %vm176_vm1, %v4893_v56, %v4895_v8  ;;  %v1977_v8 = vld [vmem:[#allocation8 + $0x148] sm:$0xff] }
 0x58d   :  { %5476 = vperm.xlu1 %6848, %v5370_v45  }
 0x58e   :  { %4492 = vmatmul.mubr.bf16.gmra.mxu1 %v5937_v46 }
 0x58f   :  { %v8777_v4 = vpop.permute.xlu1 %4956  ;;  %4499 = vmatprep.mubr.bf16.mxu1 %v5942_v27  ;;  %5491 = vperm.xlu0 %6847, %v5373_v59   ;;  %v8779_v23 = vpop.permute.xlu0 %4922  ;;  %v5854_v27 = vcombine.high %v1975_v57, %v1977_v8 }
 0x590   :  { %3689 = vmatmul.mubr.bf16.gmra.mxu0 %v5887_v36 }
 0x591   :  { %5486 = vperm.xlu1 %6848, %v5372_v60   ;;  %3729 = vmatprep.mubr.bf16.mxu0 %v5846_v37  ;;  %v9705_v60 = vld [vmem:[#allocation23_spill] sm:$0xff]  ;;  %v9706_v37 = vld [vmem:[#allocation24_spill] sm:$0xff] }
 0x592   :  { %v6120_v39 = vadd.f32 %v9706_v37, %v9705_v60 }
 0x593   :  { %v8783_v53 = vpop.permute.xlu1 %4920 }
 0x594   :  { %v8787_v15 = vpop.permute.xlu0 %4986 }
 0x596   :  { %4500 = vmatmul.mubr.bf16.gmra.mxu1 %v5941_v51  ;;  %v9707_v51 = vld [vmem:[#allocation36_spill] sm:$0xff] }
 0x597   :  { %v8789_v18 = vpop.permute.xlu1 %4984  ;;  %4507 = vmatprep.mubr.bf16.mxu1 %v5946_v48  ;;  %v4254_v48 = vsel %vm169_vm2, %v9707_v51, %v8397_v21 }
 0x598   :  { %v6203_v11 = vpop.f32.mrf.mxu0  ;;  %3730 = vmatmul.mubr.bf16.vlgmr.msra.gmra.mxu0 %v5845_v29  ;;  %v8797_v17 = vpop.permute.xlu0 %4890 }
 0x599   :  { %6452 = vmatpush3.bf16.msra.mxu0 %v4249_v12  ;;  %3737 = vmatprep.mubr.bf16.mxu0 %v5850_v3  ;;  %v8830_v12 = vld [vmem:[#allocation8 + $0x188] sm:$0xff] }
 0x59a   :  { %6453 = vmatprep.subr.bf16.mxu0 %v4256_v33  ;;  %v6204_v25 = vpop.f32.mrf.mxu0  ;;  %v5858_v0 = vcombine.high %v8830_v12, %v1981_v14 }
 0x59b   :  { %v6205_v45 = vadd.f32 %v6204_v25, %v6203_v11  ;;  %v8799_v46 = vpop.permute.xlu1 %4888  ;;  %v5954_v25 = vcombine.high %v8819_v43, %v8821_v13 }
 0x59c   :  { %v6206_v56 = vpop.f32.mrf.mxu0  ;;  %v8810_v59 = vpop.permute.xlu0 %4954 }
 0x59d   :  { %v8805_v49 = vadd.f32 %v6205_v45, %v9704_v44  ;;  %6454 = vmatpush3.bf16.msra.mxu0 %v4248_v28  ;;  %v9708_v45 = vld [vmem:[#allocation39_spill] sm:$0xff] }
 0x59e   :  { %6455 = vmatprep.subr.bf16.mxu0 %v4255_v35  ;;  %v6207_v36 = vpop.f32.mrf.mxu0  ;;  %4508 = vmatmul.mubr.bf16.gmra.mxu1 %v5945_v54  ;;  %v6409_v54 = vpop.f32.mrf.mxu1  ;;  %v9711_v35 = vld [vmem:[#allocation44_spill] sm:$0xff] }
 0x59f   :  { %v6208_v9 = vadd.f32 %v6207_v36, %v6206_v56  ;;  %v8814_v19 = vpop.permute.xlu1 %4952  ;;  %4515 = vmatprep.mubr.bf16.mxu1 %v5950_v41  ;;  %v9709_v41 = vld [vmem:[#allocation41_spill] sm:$0xff]  ;;  %v5853_v56 = vcombine.low %v1975_v57, %v1977_v8  ;;  %v9715_v57 = vld [vmem:[#allocation27_spill] sm:$0xff] }
 0x5a0   :  { %v6209_v38 = vpop.f32.mrf.mxu0  ;;  %3738 = vmatmul.mubr.bf16.gmra.mxu0 %v5849_v20  ;;  %v8828_v3 = vpop.permute.xlu0 %4918  ;;  %v4246_v21 = vsel %vm169_vm2, %v9709_v41, %v9708_v45  ;;  %v9710_v20 = vld [vmem:[#allocation25_spill] sm:$0xff]  ;;  %v8859_v41 = vld [vmem:[#allocation8 + $0x428] sm:$0xff] }
 0x5a1   :  { %v8823_v32 = vadd.f32 %v6208_v9, %v6120_v39  ;;  %6456 = vmatpush3.bf16.msra.mxu0 %v4247_v1  ;;  %3745 = vmatprep.mubr.bf16.mxu0 %v5854_v27  ;;  %v9712_v27 = vld [vmem:[#allocation46_spill] sm:$0xff]  ;;  %v6410_v36 = vpop.f32.mrf.mxu1 }
 0x5a2   :  { %6457 = vmatprep.subr.bf16.mxu0 %v4254_v48  ;;  %v6210_v29 = vpop.f32.mrf.mxu0  ;;  %v4253_v55 = vsel %vm169_vm2, %v9712_v27, %v9711_v35  ;;  %v8848_v39 = vadd.f32 %v6410_v36, %v6409_v54  ;;  %v9714_v9 = vld [vmem:[#allocation26_spill] sm:$0xff]  ;;  %v9717_v48 = vld [vmem:[#allocation49_spill] sm:$0xff]  ;;  %v5953_v36 = vcombine.low %v8819_v43, %v8821_v13  ;;  %v9726_v43 = vld [vmem:[#allocation56_spill] sm:$0xff] }
 0x5a3   :  { %v6211_v11 = vadd.f32 %v6210_v29, %v6209_v38  ;;  %v8832_v33 = vpop.permute.xlu1 %4916  ;;  %v6126_v8 = vadd.f32 %v9715_v57, %v9714_v9  ;;  %v8854_v51 = vpop.f32.mrf.mxu1  ;;  %v9718_v29 = vld [vmem:[#allocation51_spill] sm:$0xff] }
 0x5a4   :  { %v6212_v28 = vpop.f32.mrf.mxu0  ;;  %v8846_v37 = vpop.permute.xlu0 %4982  ;;  %9713 = vst [vmem:[#allocation22_spill] sm:$0xff] %v8848_v39  ;;  %9716 = vst [vmem:[#allocation23_spill] sm:$0xff] %v8854_v51  ;;  %v9727_v51 = vld [vmem:[#allocation29_spill] sm:$0xff] }
 0x5a5   :  { %v8840_v44 = vadd.f32 %v6211_v11, %v9710_v20  ;;  %6458 = vmatpush3.bf16.msra.mxu0 %v4246_v21  ;;  %v4245_v11 = vsel %vm169_vm2, %v9718_v29, %v9717_v48  ;;  %v9719_v21 = vld [vmem:[#allocation17_spill] sm:$0xff]  ;;  %v5857_v29 = vcombine.low %v8830_v12, %v1981_v14 }
 0x5a6   :  { %6459 = vmatprep.subr.bf16.mxu0 %v4253_v55  ;;  %v6213_v60 = vpop.f32.mrf.mxu0  ;;  %4516 = vmatmul.mubr.bf16.gmra.mxu1 %v5949_v47  ;;  %v8861_v47 = vld [vmem:[#allocation8 + $0x468] sm:$0xff] }
 0x5a7   :  { %v6214_v1 = vadd.f32 %v6213_v60, %v6212_v28  ;;  %v8852_v38 = vpop.permute.xlu1 %4980  ;;  %4523 = vmatprep.mubr.bf16.mxu1 %v5954_v25  ;;  %v9720_v28 = vld [vmem:[#allocation54_spill] sm:$0xff]  ;;  %v8868_v25 = vpop.f32.mrf.mxu1  ;;  %v1983_v55 = vld [vmem:[#allocation8 + $0x208] sm:$0xff]  ;;  %v5958_v57 = vcombine.high %v8859_v41, %v8861_v47 }
 0x5a8   :  { %v6215_v45 = vpop.f32.mrf.mxu0  ;;  %3746 = vmatmul.mubr.bf16.gmra.mxu0 %v5853_v56  ;;  %v4252_v20 = vsel %vm169_vm2, %v9720_v28, %v9719_v21  ;;  %9721 = vst [vmem:[#allocation24_spill] sm:$0xff] %v8868_v25  ;;  %v8870_v27 = vpop.permute.xlu0 %4886  ;;  %v1985_v56 = vld [vmem:[#allocation8 + $0x248] sm:$0xff] }
 0x5a9   :  { %v8863_v54 = vadd.f32 %v6214_v1, %v6126_v8  ;;  %6460 = vmatpush3.bf16.msra.mxu0 %v4245_v11  ;;  %3753 = vmatprep.mubr.bf16.mxu0 %v5858_v0  ;;  %v9722_v8 = vld [vmem:[#allocation18_spill] sm:$0xff]  ;;  %v9723_v1 = vld [vmem:[#allocation55_spill] sm:$0xff]  ;;  %v6415_v11 = vpop.f32.mrf.mxu1  ;;  %v9724_v21 = vld [vmem:[#allocation28_spill] sm:$0xff] }
 0x5aa   :  { %6461 = vmatprep.subr.bf16.mxu0 %v4252_v20  ;;  %v6216_v35 = vpop.f32.mrf.mxu0  ;;  %v4244_v0 = vsel %vm169_vm2, %v9723_v1, %v9722_v8  ;;  %v9725_v20 = vld [vmem:[#allocation20_spill] sm:$0xff]  ;;  %v9728_v8 = vld [vmem:[#allocation30_spill] sm:$0xff] }
 0x5ab   :  { %v6217_v60 = vadd.f32 %v6216_v35, %v6215_v45  ;;  %v8874_v9 = vpop.permute.xlu1 %4884  ;;  %v4251_v13 = vsel %vm169_vm2, %v9726_v43, %v9725_v20  ;;  %v5862_v45 = vcombine.high %v1983_v55, %v1985_v56  ;;  %v6132_v1 = vadd.f32 %v9728_v8, %v9727_v51  ;;  %v6416_v14 = vpop.f32.mrf.mxu1  ;;  %v8903_v51 = vld [vmem:[#allocation8 + $0x4e8] sm:$0xff]  ;;  %v3826_v8 = vld [vmem:[#allocation8 + $0x20] sm:$0xff] }
 0x5ac   :  { %v6218_v48 = vpop.f32.mrf.mxu0  ;;  %v8897_v20 = vadd.f32 %v6416_v14, %v6415_v11  ;;  %v5861_v14 = vcombine.low %v1983_v55, %v1985_v56  ;;  %v9737_v55 = vld [vmem:[#allocation33_spill] sm:$0xff] }
 0x5ad   :  { %v8883_v28 = vadd.f32 %v6217_v60, %v9724_v21  ;;  %6462 = vmatpush3.bf16.msra.mxu0 %v4244_v0  ;;  %v8888_v25 = vpop.permute.xlu0 %4950  ;;  %v9729_v60 = vld [vmem:[#allocation58_spill] sm:$0xff] }
 0x5ae   :  { %6463 = vmatprep.subr.bf16.mxu0 %v4251_v13  ;;  %v6219_v35 = vpop.f32.mrf.mxu0  ;;  %4524 = vmatmul.mubr.bf16.gmra.mxu1 %v5953_v36  ;;  %v4243_v0 = vsel %vm169_vm2, %v9729_v60, %v8555_v40  ;;  %9730 = vst [vmem:[#allocation36_spill] sm:$0xff] %v8897_v20  ;;  %v8901_v36 = vld [vmem:[#allocation8 + $0x4a8] sm:$0xff]  ;;  %v3828_v40 = vld [vmem:[#allocation8 + $0x60] sm:$0xff] }
 0x5af   :  { %v6220_v39 = vadd.f32 %v6219_v35, %v6218_v48  ;;  %v8892_v12 = vpop.permute.xlu1 %4948  ;;  %4531 = vmatprep.mubr.bf16.mxu1 %v5958_v57  ;;  %v8905_v48 = vpop.f32.mrf.mxu1  ;;  %v9732_v57 = vld [vmem:[#allocation59_spill] sm:$0xff]  ;;  %v9735_v20 = vld [vmem:[#allocation60_spill] sm:$0xff] }
 0x5b0   :  { %v6221_v21 = vpop.f32.mrf.mxu0  ;;  %3754 = vmatmul.mubr.bf16.gmra.mxu0 %v5857_v29  ;;  %9731 = vst [vmem:[#allocation39_spill] sm:$0xff] %v8905_v48  ;;  %v9734_v48 = vld [vmem:[#allocation31_spill] sm:$0xff] }
 0x5b1   :  { %v8899_v43 = vadd.f32 %v6220_v39, %v6132_v1  ;;  %6464 = vmatpush3.bf16.msra.mxu0 %v4243_v0  ;;  %3761 = vmatprep.mubr.bf16.mxu0 %v5862_v45  ;;  %v5003_v35 = vpop.permute.xlu0 %5002  ;;  %v5957_v39 = vcombine.low %v8859_v41, %v8861_v47  ;;  %v8910_v11 = vpop.f32.mrf.mxu1  ;;  %v5962_v0 = vcombine.high %v8901_v36, %v8903_v51 }
 0x5b2   :  { %6465 = vmatprep.subr.bf16.mxu0 %v9732_v57  ;;  %v6222_v13 = vpop.f32.mrf.mxu0  ;;  %9733 = vst [vmem:[#allocation41_spill] sm:$0xff] %v8910_v11  ;;  %v8934_v11 = vld [vmem:[#allocation8 + $0x568] sm:$0xff] }
 0x5b3   :  { %v6223_v60 = vadd.f32 %v6222_v13, %v6221_v21  ;;  %v5001_v29 = vpop.permute.xlu1 %5000  ;;  %v5924_v21 = vcombine.high %v3826_v8, %v3828_v40  ;;  %v6421_v13 = vpop.f32.mrf.mxu1 }
 0x5b4   :  { %v6224_v45 = vpop.f32.mrf.mxu0  ;;  %v5035_v1 = vsel %vm176_vm1, %v5001_v29, %v5003_v35  ;;  %v9736_v35 = vld [vmem:[#allocation32_spill] sm:$0xff] }
 0x5b5   :  { %v8916_v57 = vadd.f32 %v6223_v60, %v9734_v48  ;;  %6466 = vmatpush3.bf16.msra.mxu0 %v9735_v20  ;;  %6715 = vmatprep.subr.bf16.mxu1 %v5035_v1  ;;  %v8921_v47 = vpop.permute.xlu0 %4914  ;;  %v6138_v56 = vadd.f32 %v9737_v55, %v9736_v35  ;;  %v6422_v20 = vpop.f32.mrf.mxu1 }
 0x5b6   :  { %6627 = vmatprep.subr.bf16.mxu0 %v8610_v10  ;;  %v6225_v41 = vpop.f32.mrf.mxu0  ;;  %6716 = vmatpush3.bf16.msra.mxu1 %v8634_v24  ;;  %v8928_v1 = vadd.f32 %v6422_v20, %v6421_v13  ;;  %v8932_v24 = vld [vmem:[#allocation8 + $0x528] sm:$0xff]  ;;  %v9741_v20 = vld [vmem:[#allocation34_spill] sm:$0xff] }
 0x5b7   :  { %v6226_v29 = vadd.f32 %v6225_v41, %v6224_v45  ;;  %6717 = vmatprep.subr.bf16.mxu1 %v8666_v62  ;;  %v8926_v48 = vpop.permute.xlu1 %4912  ;;  %4532 = vmatmul.mubr.bf16.gmra.mxu1 %v5957_v39  ;;  %v8936_v35 = vpop.f32.mrf.mxu1  ;;  %v8941_v39 = vld [vmem:[#allocation8 + $0xa0] sm:$0xff] }
 0x5b8   :  { %v6227_v60 = vpop.f32.mrf.mxu0  ;;  %3762 = vmatmul.mubr.bf16.gmra.mxu0 %v5861_v14  ;;  %4539 = vmatprep.mubr.bf16.mxu1 %v5962_v0  ;;  %9738 = vst [vmem:[#allocation25_spill] sm:$0xff] %v8928_v1  ;;  %9739 = vst [vmem:[#allocation44_spill] sm:$0xff] %v8936_v35  ;;  %v8943_v14 = vld [vmem:[#allocation8 + $0xe0] sm:$0xff] }
 0x5b9   :  { %v8930_v10 = vadd.f32 %v6226_v29, %v6138_v56  ;;  %4338 = vmatprep.mubr.bf16.mxu0 %v5924_v21  ;;  %v8939_v62 = vpop.permute.xlu0 %4978  ;;  %v5961_v21 = vcombine.low %v8901_v36, %v8903_v51  ;;  %v8950_v41 = vpop.f32.mrf.mxu1  ;;  %v5923_v56 = vcombine.low %v3826_v8, %v3828_v40  ;;  %v5025_v29 = vsel %vm176_vm1, %v8739_v50, %v8731_v6  ;;  %v9743_v8 = vld [vmem:[#allocation35_spill] sm:$0xff]  ;;  %v9744_v40 = vld [vmem:[#allocation37_spill] sm:$0xff] }
 0x5ba   :  { %v6228_v45 = vpop.f32.mrf.mxu0  ;;  %6718 = vmatpush3.bf16.msra.mxu1 %v8696_v42  ;;  %9740 = vst [vmem:[#allocation46_spill] sm:$0xff] %v8950_v41  ;;  %v5966_v42 = vcombine.high %v8932_v24, %v8934_v11  ;;  %v5032_v51 = vsel %vm176_vm1, %v8758_v5, %v8750_v31  ;;  %v6144_v41 = vadd.f32 %v9744_v40, %v9743_v8  ;;  %v8979_v31 = vld [vmem:[#allocation8 + $0x5a8] sm:$0xff] }
 0x5bb   :  { %v6229_v0 = vadd.f32 %v6228_v45, %v6227_v60  ;;  %6719 = vmatprep.subr.bf16.mxu1 %v8720_v30  ;;  %v8946_v13 = vpop.permute.xlu1 %4976  ;;  %v5928_v30 = vcombine.high %v8941_v39, %v8943_v14  ;;  %v6427_v45 = vpop.f32.mrf.mxu1  ;;  %v8981_v5 = vld [vmem:[#allocation8 + $0x5e8] sm:$0xff]  ;;  %v5030_v40 = vsel %vm176_vm1, %v8852_v38, %v8846_v37  ;;  %v5022_v37 = vsel %vm176_vm1, %v8892_v12, %v8888_v25 }
 0x5bc   :  { %v6230_v55 = vpop.f32.mrf.mxu0  ;;  %v5029_v25 = vsel %vm176_vm1, %v8946_v13, %v8939_v62  ;;  %v9748_v13 = vld [vmem:[#allocation43_spill] sm:$0xff] }
 0x5bd   :  { %v8958_v60 = vadd.f32 %v6229_v0, %v9741_v20  ;;  %v8962_v36 = vpop.permute.xlu0 %4882  ;;  %v6428_v50 = vpop.f32.mrf.mxu1 }
 0x5be   :  { %v6231_v35 = vpop.f32.mrf.mxu0  ;;  %6720 = vmatpush3.bf16.msra.mxu1 %v5025_v29  ;;  %v8971_v20 = vadd.f32 %v6428_v50, %v6427_v45  ;;  %v5024_v29 = vsel %vm176_vm1, %v8777_v4, %v8769_v63  ;;  %v8987_v63 = vld [vmem:[#allocation8 + $0x120] sm:$0xff]  ;;  %v5970_v45 = vcombine.high %v8979_v31, %v8981_v5 }
 0x5bf   :  { %9742 = vst [vmem:[#allocation26_spill] sm:$0xff] %v8958_v60  ;;  %v6232_v1 = vadd.f32 %v6231_v35, %v6230_v55  ;;  %6721 = vmatprep.subr.bf16.mxu1 %v5032_v51  ;;  %v8969_v6 = vpop.permute.xlu1 %4880  ;;  %4540 = vmatmul.mubr.bf16.gmra.mxu1 %v5961_v21  ;;  %v6430_v35 = vpop.f32.mrf.mxu1  ;;  %v8989_v4 = vld [vmem:[#allocation8 + $0x160] sm:$0xff] }
 0x5c0   :  { %v6233_v0 = vpop.f32.mrf.mxu0  ;;  %4339 = vmatmul.mubr.bf16.vlgmr.msra.gmra.mxu0 %v5923_v56  ;;  %4547 = vmatprep.mubr.bf16.mxu1 %v5966_v42  ;;  %v5031_v56 = vsel %vm176_vm1, %v8789_v18, %v8787_v15  ;;  %v5023_v15 = vsel %vm176_vm1, %v8814_v19, %v8810_v59  ;;  %v9745_v18 = vld [vmem:[#allocation38_spill] sm:$0xff]  ;;  %v9746_v59 = vld [vmem:[#allocation40_spill] sm:$0xff] }
 0x5c1   :  { %v8976_v60 = vadd.f32 %v6232_v1, %v6144_v41  ;;  %6628 = vmatpush3.bf16.msra.mxu0 %v8621_v58  ;;  %4346 = vmatprep.mubr.bf16.mxu0 %v5928_v30  ;;  %v4947_v55 = vpop.permute.xlu0 %4946  ;;  %v5965_v41 = vcombine.low %v8932_v24, %v8934_v11  ;;  %v6431_v42 = vpop.f32.mrf.mxu1  ;;  %v5932_v11 = vcombine.high %v8987_v63, %v8989_v4  ;;  %v9747_v19 = vld [vmem:[#allocation42_spill] sm:$0xff] }
 0x5c2   :  { %6629 = vmatprep.subr.bf16.mxu0 %v8651_v26  ;;  %v6234_v21 = vpop.f32.mrf.mxu0  ;;  %6722 = vmatpush3.bf16.msra.mxu1 %v5024_v29  ;;  %v5927_v26 = vcombine.low %v8941_v39, %v8943_v14  ;;  %v8997_v51 = vadd.f32 %v6431_v42, %v6430_v35  ;;  %v6150_v50 = vadd.f32 %v9747_v19, %v9746_v59  ;;  %v9749_v59 = vld [vmem:[#allocation45_spill] sm:$0xff]  ;;  %v9750_v19 = vld [vmem:[#allocation47_spill] sm:$0xff] }
 0x5c3   :  { %v6235_v58 = vadd.f32 %v6234_v21, %v6233_v0  ;;  %6723 = vmatprep.subr.bf16.mxu1 %v5031_v56  ;;  %v4945_v1 = vpop.permute.xlu1 %4944  ;;  %v6433_v24 = vpop.f32.mrf.mxu1  ;;  %v9028_v56 = vld [vmem:[#allocation8 + $0x1e0] sm:$0xff] }
 0x5c4   :  { %v6236_v30 = vpop.f32.mrf.mxu0  ;;  %v5021_v62 = vsel %vm176_vm1, %v4945_v1, %v4947_v55  ;;  %v6156_v55 = vadd.f32 %v9750_v19, %v9749_v59 }
 0x5c5   :  { %v9003_v8 = vadd.f32 %v6235_v58, %v9745_v18  ;;  %6630 = vmatpush3.bf16.msra.mxu0 %v8681_v52  ;;  %v9009_v14 = vpop.permute.xlu0 %4910  ;;  %v6434_v29 = vpop.f32.mrf.mxu1  ;;  %v9030_v58 = vld [vmem:[#allocation8 + $0x38] sm:$0xff]  ;;  %v5931_v18 = vcombine.low %v8987_v63, %v8989_v4 }
 0x5c6   :  { %6631 = vmatprep.subr.bf16.mxu0 %v8708_v22  ;;  %v6237_v39 = vpop.f32.mrf.mxu0  ;;  %6724 = vmatpush3.bf16.msra.mxu1 %v5023_v15  ;;  %v9018_v22 = vld [vmem:[#allocation8 + $0x1a0] sm:$0xff]  ;;  %v9020_v21 = vadd.f32 %v6434_v29, %v6433_v24 }
 0x5c7   :  { %v6238_v0 = vadd.f32 %v6237_v39, %v6236_v30  ;;  %6725 = vmatprep.subr.bf16.mxu1 %v5030_v40  ;;  %v9016_v52 = vpop.permute.xlu1 %4908  ;;  %4548 = vmatmul.mubr.bf16.gmra.mxu1 %v5965_v41  ;;  %v9032_v41 = vld [vmem:[#allocation8 + $0x78] sm:$0xff]  ;;  %v6436_v42 = vpop.f32.mrf.mxu1 }
 0x5c8   :  { %v6239_v35 = vpop.f32.mrf.mxu0  ;;  %4347 = vmatmul.mubr.bf16.gmra.mxu0 %v5927_v26  ;;  %4555 = vmatprep.mubr.bf16.mxu1 %v5970_v45  ;;  %v5969_v45 = vcombine.low %v8979_v31, %v8981_v5  ;;  %v5015_v31 = vsel %vm176_vm1, %v8783_v53, %v8779_v23 }
 0x5c9   :  { %v9025_v38 = vadd.f32 %v6238_v0, %v6150_v50  ;;  %6632 = vmatpush3.bf16.msra.mxu0 %v8729_v7  ;;  %4354 = vmatprep.mubr.bf16.mxu0 %v5932_v11  ;;  %v4975_v26 = vpop.permute.xlu0 %4974  ;;  %v5974_v11 = vcombine.high %v9030_v58, %v9032_v41  ;;  %v6437_v24 = vpop.f32.mrf.mxu1 }
 0x5ca   :  { %6633 = vmatprep.subr.bf16.mxu0 %v8748_v61  ;;  %v6240_v30 = vpop.f32.mrf.mxu0  ;;  %6726 = vmatpush3.bf16.msra.mxu1 %v5022_v37  ;;  %v5936_v61 = vcombine.high %v9018_v22, %v9028_v56  ;;  %v9054_v5 = vadd.f32 %v6437_v24, %v6436_v42  ;;  %v3842_v37 = vld [vmem:[#allocation8 + $0x220] sm:$0xff] }
 0x5cb   :  { %v6241_v12 = vadd.f32 %v6240_v30, %v6239_v35  ;;  %6727 = vmatprep.subr.bf16.mxu1 %v5029_v25  ;;  %v4973_v7 = vpop.permute.xlu1 %4972  ;;  %v6439_v40 = vpop.f32.mrf.mxu1  ;;  %v5014_v35 = vsel %vm176_vm1, %v8832_v33, %v8828_v3  ;;  %v3844_v42 = vld [vmem:[#allocation8 + $0x260] sm:$0xff]  ;;  %v5006_v3 = vsel %vm176_vm1, %v8874_v9, %v8870_v27 }
 0x5cc   :  { %v6242_v15 = vpop.f32.mrf.mxu0  ;;  %v5028_v4 = vsel %vm176_vm1, %v4973_v7, %v4975_v26  ;;  %v5935_v7 = vcombine.low %v9018_v22, %v9028_v56  ;;  %v5013_v22 = vsel %vm176_vm1, %v8926_v48, %v8921_v47  ;;  %v5012_v48 = vsel %vm176_vm1, %v9016_v52, %v9009_v14 }
 0x5cd   :  { %v9048_v39 = vadd.f32 %v6241_v12, %v9748_v13  ;;  %6634 = vmatpush3.bf16.msra.mxu0 %v8767_v16  ;;  %v4879_v50 = vpop.permute.xlu0 %4878  ;;  %v5007_v16 = vsel %vm176_vm1, %v8799_v46, %v8797_v17  ;;  %v6440_v53 = vpop.f32.mrf.mxu1 }
 0x5ce   :  { %6635 = vmatprep.subr.bf16.mxu0 %v5015_v31  ;;  %v6243_v63 = vpop.f32.mrf.mxu0  ;;  %6728 = vmatpush3.bf16.msra.mxu1 %v5021_v62  ;;  %v9067_v30 = vadd.f32 %v6440_v53, %v6439_v40  ;;  %v9751_v62 = vld [vmem:[#allocation48_spill] sm:$0xff] }
 0x5cf   :  { %v6244_v1 = vadd.f32 %v6243_v63, %v6242_v15  ;;  %6729 = vmatprep.subr.bf16.mxu1 %v5028_v4  ;;  %v4877_v0 = vpop.permute.xlu1 %4876  ;;  %4556 = vmatmul.mubr.bf16.gmra.mxu1 %v5969_v45  ;;  %v6442_v12 = vpop.f32.mrf.mxu1  ;;  %v4593_v45 = vld [vmem:[#allocation8 + $0xb8] sm:$0xff]  ;;  %v9753_v4 = vld [vmem:[#allocation52_spill] sm:$0xff] }
 0x5d0   :  { %v6245_v23 = vpop.f32.mrf.mxu0  ;;  %4355 = vmatmul.mubr.bf16.gmra.mxu0 %v5931_v18  ;;  %5229 = vmatprep.mubr.bf16.mxu1 %v5974_v11  ;;  %v4595_v15 = vld [vmem:[#allocation8 + $0xf8] sm:$0xff]  ;;  %v5973_v11 = vcombine.low %v9030_v58, %v9032_v41  ;;  %v5005_v41 = vsel %vm176_vm1, %v8969_v6, %v8962_v36 }
 0x5d1   :  { %v9062_v29 = vadd.f32 %v6244_v1, %v6156_v55  ;;  %6636 = vmatpush3.bf16.msra.mxu0 %v5007_v16  ;;  %4362 = vmatprep.mubr.bf16.mxu0 %v5936_v61  ;;  %v4943_v46 = vpop.permute.xlu0 %4942  ;;  %v5940_v61 = vcombine.high %v3842_v37, %v3844_v42  ;;  %v6443_v24 = vpop.f32.mrf.mxu1  ;;  %v5978_v9 = vcombine.high %v4593_v45, %v4595_v15  ;;  %v9752_v63 = vld [vmem:[#allocation50_spill] sm:$0xff]  ;;  %v3846_v55 = vld [vmem:[#allocation8 + $0x2a0] sm:$0xff] }
 0x5d2   :  { %6637 = vmatprep.subr.bf16.mxu0 %v5014_v35  ;;  %v6246_v25 = vpop.f32.mrf.mxu0  ;;  %v9083_v56 = vadd.f32 %v6443_v24, %v6442_v12  ;;  %v6162_v40 = vadd.f32 %v9753_v4, %v9752_v63  ;;  %v4597_v36 = vld [vmem:[#allocation8 + $0x138] sm:$0xff]  ;;  %v5004_v35 = vsel %vm176_vm1, %v4877_v0, %v4879_v50  ;;  %v5939_v12 = vcombine.low %v3842_v37, %v3844_v42  ;;  %v3850_v50 = vld [vmem:[#allocation8 + $0x320] sm:$0xff] }
 0x5d3   :  { %v6247_v17 = vadd.f32 %v6246_v25, %v6245_v23  ;;  %v4941_v26 = vpop.permute.xlu1 %4940  ;;  %v6445_v31 = vpop.f32.mrf.mxu1  ;;  %v3848_v23 = vld [vmem:[#allocation8 + $0x2e0] sm:$0xff]  ;;  %v4599_v6 = vld [vmem:[#allocation8 + $0x178] sm:$0xff] }
 0x5d4   :  { %v5020_v33 = vsel %vm176_vm1, %v4941_v26, %v4943_v46  ;;  %v6248_v18 = vpop.f32.mrf.mxu0  ;;  %v9754_v46 = vld [vmem:[#allocation16_spill] sm:$0xff]  ;;  %v5944_v14 = vcombine.high %v3846_v55, %v3848_v23  ;;  %v5982_v52 = vcombine.high %v4597_v36, %v4599_v6  ;;  %v3852_v37 = vld [vmem:[#allocation8 + $0x360] sm:$0xff]  ;;  %v4601_v42 = vld [vmem:[#allocation8 + $0x1b8] sm:$0xff] }
 0x5d5   :  { %v9078_v13 = vadd.f32 %v6247_v17, %v9751_v62  ;;  %6638 = vmatpush3.bf16.msra.mxu0 %v5006_v3  ;;  %6730 = vmatpush3.bf16.msra.mxu1 %v5020_v33  ;;  %v6446_v19 = vpop.f32.mrf.mxu1  ;;  %v5977_v17 = vcombine.low %v4593_v45, %v4595_v15  ;;  %v9755_v3 = vld [vmem:[#allocation53_spill] sm:$0xff]  ;;  %v9756_v33 = vld [vmem:[#allocation12_spill] sm:$0xff]  ;;  %v4603_v45 = vld [vmem:[#allocation8 + $0x1f8] sm:$0xff]  ;;  %v5948_v63 = vcombine.high %v3850_v50, %v3852_v37 }
 0x5d6   :  { %6639 = vmatprep.subr.bf16.mxu0 %v5013_v22  ;;  %v6249_v27 = vpop.f32.mrf.mxu0  ;;  %v9095_v1 = vadd.f32 %v6446_v19, %v6445_v31  ;;  %v5943_v22 = vcombine.low %v3846_v55, %v3848_v23  ;;  %v5986_v4 = vcombine.high %v4601_v42, %v4603_v45  ;;  %v3856_v23 = vld [vmem:[#allocation8 + $0x3e0] sm:$0xff] }
 0x5d7   :  { %v6250_v58 = vadd.f32 %v6249_v27, %v6248_v18  ;;  %v6168_v18 = vadd.f32 %v9756_v33, %v9755_v3  ;;  %v5981_v27 = vcombine.low %v4597_v36, %v4599_v6  ;;  %v4605_v36 = vld [vmem:[#allocation8 + $0x238] sm:$0xff]  ;;  %v9761_v33 = vld [vmem:[#allocation21_spill] sm:$0xff] }
 0x5d8   :  { %v6251_v59 = vpop.f32.mrf.mxu0  ;;  %4363 = vmatmul.mubr.bf16.gmra.mxu0 %v5935_v7  ;;  %5230 = vmatmul.mubr.bf16.vlgmr.msra.gmra.mxu1 %v5973_v11  ;;  %v4607_v6 = vld [vmem:[#allocation8 + $0x278] sm:$0xff] }
 0x5d9   :  { %v9090_v47 = vadd.f32 %v6250_v58, %v6162_v40  ;;  %6640 = vmatpush3.bf16.msra.mxu0 %v5005_v41  ;;  %4370 = vmatprep.mubr.bf16.mxu0 %v5940_v61  ;;  %v9758_v58 = vld [vmem:[#allocation19_spill] sm:$0xff]  ;;  %v9759_v41 = vld [vmem:[#allocation13_spill] sm:$0xff] }
 0x5da   :  { %6641 = vmatprep.subr.bf16.mxu0 %v5012_v48  ;;  %v6252_v16 = vpop.f32.mrf.mxu0  ;;  %5237 = vmatprep.mubr.bf16.mxu1 %v5978_v9  ;;  %v9757_v9 = vld [vmem:[#allocation11_spill] sm:$0xff] }
 0x5db   :  { %v6253_v53 = vadd.f32 %v6252_v16, %v6251_v59  ;;  %v6174_v59 = vadd.f32 %v9759_v41, %v9758_v58 }
 0x5dc   :  { %v6254_v25 = vpop.f32.mrf.mxu0 }
 0x5dd   :  { %v9099_v26 = vadd.f32 %v6253_v53, %v9754_v46  ;;  %6642 = vmatpush3.bf16.msra.mxu0 %v5004_v35  ;;  %v3854_v53 = vld [vmem:[#allocation8 + $0x3a0] sm:$0xff]  ;;  %v9760_v46 = vld [vmem:[#allocation14_spill] sm:$0xff] }
 0x5de   :  { %v6255_v7 = vpop.f32.mrf.mxu0 }
 0x5df   :  { %v6256_v61 = vadd.f32 %v6255_v7, %v6254_v25  ;;  %v5990_v7 = vcombine.high %v4605_v36, %v4607_v6 }
 0x5e0   :  { %v6257_v11 = vpop.f32.mrf.mxu0  ;;  %4371 = vmatmul.mubr.bf16.gmra.mxu0 %v5939_v12  ;;  %5238 = vmatmul.mubr.bf16.gmra.mxu1 %v5977_v17  ;;  %v5947_v12 = vcombine.low %v3850_v50, %v3852_v37  ;;  %v5985_v17 = vcombine.low %v4601_v42, %v4603_v45  ;;  %v3860_v37 = vld [vmem:[#allocation8 + $0x460] sm:$0xff]  ;;  %v4609_v42 = vld [vmem:[#allocation8 + $0x2b8] sm:$0xff] }
 0x5e1   :  { %v9103_v24 = vadd.f32 %v6256_v61, %v6168_v18  ;;  %4378 = vmatprep.mubr.bf16.mxu0 %v5944_v14  ;;  %5245 = vmatprep.mubr.bf16.mxu1 %v5982_v52  ;;  %v5952_v52 = vcombine.high %v3854_v53, %v3856_v23  ;;  %v9762_v18 = vld [vmem:[#allocation15_spill] sm:$0xff]  ;;  %v4611_v45 = vld [vmem:[#allocation8 + $0x2f8] sm:$0xff] }
 0x5e2   :  { %v6258_v0 = vpop.f32.mrf.mxu0  ;;  %v6180_v61 = vadd.f32 %v9762_v18, %v9761_v33  ;;  %v5994_v41 = vcombine.high %v4609_v42, %v4611_v45 }
 0x5e3   :  { %v6259_v15 = vadd.f32 %v6258_v0, %v6257_v11 }
 0x5e4   :  { %v6260_v62 = vpop.f32.mrf.mxu0 }
 0x5e5   :  { %v9106_v31 = vadd.f32 %v6259_v15, %v9757_v9  ;;  %v5951_v9 = vcombine.low %v3854_v53, %v3856_v23  ;;  %v3864_v23 = vld [vmem:[#allocation8 + $0x4e0] sm:$0xff] }
 0x5e6   :  { %v6261_v40 = vpop.f32.mrf.mxu0 }
 0x5e7   :  { %v6262_v19 = vadd.f32 %v6261_v40, %v6260_v62  ;;  %v3858_v62 = vld [vmem:[#allocation8 + $0x420] sm:$0xff] }
 0x5e8   :  { %v6263_v48 = vpop.f32.mrf.mxu0  ;;  %4379 = vmatmul.mubr.bf16.gmra.mxu0 %v5943_v22  ;;  %5246 = vmatmul.mubr.bf16.gmra.mxu1 %v5981_v27  ;;  %v5956_v58 = vcombine.high %v3858_v62, %v3860_v37 }
 0x5e9   :  { %v9110_v16 = vadd.f32 %v6262_v19, %v6174_v59  ;;  %4386 = vmatprep.mubr.bf16.mxu0 %v5948_v63  ;;  %5253 = vmatprep.mubr.bf16.mxu1 %v5986_v4  ;;  %v5989_v63 = vcombine.low %v4605_v36, %v4607_v6  ;;  %v9763_v4 = vld [vmem:[#allocation57_spill] sm:$0xff]  ;;  %v6186_v19 = vadd.f32 %v8785_v2, %v8781_v34  ;;  %v4613_v36 = vld [vmem:[#allocation8 + $0x338] sm:$0xff] }
 0x5ea   :  { %v6264_v55 = vpop.f32.mrf.mxu0  ;;  %v4615_v6 = vld [vmem:[#allocation8 + $0x378] sm:$0xff] }
 0x5eb   :  { %v6265_v35 = vadd.f32 %v6264_v55, %v6263_v48  ;;  %v5998_v2 = vcombine.high %v4613_v36, %v4615_v6 }
 0x5ec   :  { %v6266_v25 = vpop.f32.mrf.mxu0 }
 0x5ed   :  { %v9113_v14 = vadd.f32 %v6265_v35, %v9760_v46  ;;  %v5955_v46 = vcombine.low %v3858_v62, %v3860_v37  ;;  %v4617_v62 = vld [vmem:[#allocation8 + $0x3b8] sm:$0xff] }
 0x5ee   :  { %v6267_v3 = vpop.f32.mrf.mxu0  ;;  %v4619_v37 = vld [vmem:[#allocation8 + $0x3f8] sm:$0xff] }
 0x5ef   :  { %v6268_v11 = vadd.f32 %v6267_v3, %v6266_v25  ;;  %v3862_v25 = vld [vmem:[#allocation8 + $0x4a0] sm:$0xff] }
 0x5f0   :  { %v6269_v0 = vpop.f32.mrf.mxu0  ;;  %4387 = vmatmul.mubr.bf16.gmra.mxu0 %v5947_v12  ;;  %5254 = vmatmul.mubr.bf16.gmra.mxu1 %v5985_v17  ;;  %v5960_v34 = vcombine.high %v3862_v25, %v3864_v23 }
 0x5f1   :  { %v9117_v15 = vadd.f32 %v6268_v11, %v6180_v61  ;;  %4394 = vmatprep.mubr.bf16.mxu0 %v5952_v52  ;;  %5261 = vmatprep.mubr.bf16.mxu1 %v5990_v7  ;;  %v5993_v52 = vcombine.low %v4609_v42, %v4611_v45  ;;  %v3866_v11 = vld [vmem:[#allocation8 + $0x520] sm:$0xff]  ;;  %v5959_v45 = vcombine.low %v3862_v25, %v3864_v23  ;;  %v4623_v25 = vld [vmem:[#allocation8 + $0x478] sm:$0xff] }
 0x5f2   :  { %v6270_v50 = vpop.f32.mrf.mxu0 }
 0x5f3   :  { %v6271_v22 = vadd.f32 %v6270_v50, %v6269_v0  ;;  %v3868_v50 = vld [vmem:[#allocation8 + $0x560] sm:$0xff] }
 0x5f4   :  { %v6272_v27 = vpop.f32.mrf.mxu0  ;;  %v5963_v23 = vcombine.low %v3866_v11, %v3868_v50 }
 0x5f5   :  { %v9120_v40 = vadd.f32 %v6271_v22, %v9763_v4  ;;  %v5997_v22 = vcombine.low %v4613_v36, %v4615_v6  ;;  %v6001_v36 = vcombine.low %v4617_v62, %v4619_v37 }
 0x5f6   :  { %v6273_v59 = vpop.f32.mrf.mxu0 }
 0x5f7   :  { %v6274_v48 = vadd.f32 %v6273_v59, %v6272_v27  ;;  %v3870_v59 = vld [vmem:[#allocation8 + $0x5a0] sm:$0xff] }
 0x5f8   :  { %v6291_v55 = vpop.f32.mrf.mxu0  ;;  %4395 = vmatmul.mubr.bf16.gmra.mxu0 %v5951_v9  ;;  %5262 = vmatmul.mubr.bf16.gmra.mxu1 %v5989_v63  ;;  %v5964_v9 = vcombine.high %v3866_v11, %v3868_v50  ;;  %v6002_v63 = vcombine.high %v4617_v62, %v4619_v37  ;;  %v4627_v11 = vld [vmem:[#allocation8 + $0x4f8] sm:$0xff] }
 0x5f9   :  { %v9124_v35 = vadd.f32 %v6274_v48, %v6186_v19  ;;  %4402 = vmatprep.mubr.bf16.mxu0 %v5956_v58  ;;  %5269 = vmatprep.mubr.bf16.mxu1 %v5994_v41  ;;  %v3872_v48 = vld [vmem:[#allocation8 + $0x5e0] sm:$0xff] }
 0x5fa   :  { %v6292_v53 = vpop.f32.mrf.mxu0  ;;  %v5967_v50 = vcombine.low %v3870_v59, %v3872_v48 }
 0x5fb   :  { %v6293_v12 = vadd.f32 %v6292_v53, %v6291_v55  ;;  %v4621_v55 = vld [vmem:[#allocation8 + $0x438] sm:$0xff] }
 0x5fc   :  { %v6294_v17 = vpop.f32.mrf.mxu0  ;;  %v6005_v62 = vcombine.low %v4621_v55, %v4623_v25 }
 0x5fd   :  { %v9127_v7 = vadd.f32 %v6293_v12, %v8805_v49  ;;  %v5968_v12 = vcombine.high %v3870_v59, %v3872_v48  ;;  %v4631_v59 = vld [vmem:[#allocation8 + $0x578] sm:$0xff] }
 0x5fe   :  { %v6295_v3 = vpop.f32.mrf.mxu0 }
 0x5ff   :  { %v6296_v33 = vadd.f32 %v6295_v3, %v6294_v17  ;;  %v6006_v17 = vcombine.high %v4621_v55, %v4623_v25  ;;  %v9764_v25 = vld [vmem:[#allocation26_spill] sm:$0xff] }
 0x600   :  { %v6297_v18 = vpop.f32.mrf.mxu0  ;;  %4403 = vmatmul.mubr.bf16.gmra.mxu0 %v5955_v46  ;;  %5270 = vmatmul.mubr.bf16.gmra.mxu1 %v5993_v52 }
 0x601   :  { %v9130_v61 = vadd.f32 %v6296_v33, %v8823_v32  ;;  %4410 = vmatprep.mubr.bf16.mxu0 %v5960_v34  ;;  %5277 = vmatprep.mubr.bf16.mxu1 %v5998_v2  ;;  %v4588_v2 = vld [vmem:[#allocation8 + $0x30] sm:$0xff] }
 0x602   :  { %v6298_v0 = vpop.f32.mrf.mxu0  ;;  %v4590_v33 = vld [vmem:[#allocation8 + $0x70] sm:$0xff] }
 0x603   :  { %v6299_v42 = vadd.f32 %v6298_v0, %v6297_v18  ;;  %v4625_v18 = vld [vmem:[#allocation8 + $0x4b8] sm:$0xff]  ;;  %v5971_v48 = vcombine.low %v4588_v2, %v4590_v33 }
 0x604   :  { %v6300_v49 = vpop.f32.mrf.mxu0  ;;  %v6009_v55 = vcombine.low %v4625_v18, %v4627_v11 }
 0x605   :  { %v9133_v27 = vadd.f32 %v6299_v42, %v8840_v44  ;;  %v5972_v42 = vcombine.high %v4588_v2, %v4590_v33  ;;  %v4633_v2 = vld [vmem:[#allocation8 + $0x5b8] sm:$0xff] }
 0x606   :  { %v6301_v4 = vpop.f32.mrf.mxu0 }
 0x607   :  { %v6302_v58 = vadd.f32 %v6301_v4, %v6300_v49  ;;  %v6010_v49 = vcombine.high %v4625_v18, %v4627_v11 }
 0x608   :  { %v6303_v32 = vpop.f32.mrf.mxu0  ;;  %4411 = vmatmul.mubr.bf16.gmra.mxu0 %v5959_v45  ;;  %5278 = vmatmul.mubr.bf16.gmra.mxu1 %v5997_v22 }
 0x609   :  { %v9136_v41 = vadd.f32 %v6302_v58, %v8863_v54  ;;  %4418 = vmatprep.mubr.bf16.mxu0 %v5964_v9  ;;  %5285 = vmatprep.mubr.bf16.mxu1 %v6002_v63  ;;  %v4592_v63 = vld [vmem:[#allocation8 + $0xb0] sm:$0xff] }
 0x60a   :  { %v6304_v19 = vpop.f32.mrf.mxu0  ;;  %v4594_v58 = vld [vmem:[#allocation8 + $0xf0] sm:$0xff] }
 0x60b   :  { %v6305_v53 = vadd.f32 %v6304_v19, %v6303_v32  ;;  %v4629_v32 = vld [vmem:[#allocation8 + $0x538] sm:$0xff]  ;;  %v5975_v11 = vcombine.low %v4592_v63, %v4594_v58 }
 0x60c   :  { %v6306_v44 = vpop.f32.mrf.mxu0 }
 0x60d   :  { %v9139_v6 = vadd.f32 %v6305_v53, %v8883_v28 }
 0x60e   :  { %v6307_v46 = vpop.f32.mrf.mxu0 }
 0x60f   :  { %v6308_v52 = vadd.f32 %v6307_v46, %v6306_v44  ;;  %v5976_v44 = vcombine.high %v4592_v63, %v4594_v58  ;;  %v4596_v46 = vld [vmem:[#allocation8 + $0x130] sm:$0xff] }
 0x610   :  { %v6309_v54 = vpop.f32.mrf.mxu0  ;;  %4419 = vmatmul.mubr.bf16.gmra.mxu0 %v5963_v23  ;;  %5286 = vmatmul.mubr.bf16.gmra.mxu1 %v6001_v36  ;;  %v6014_v23 = vcombine.high %v4629_v32, %v4631_v59  ;;  %v4600_v58 = vld [vmem:[#allocation8 + $0x1b0] sm:$0xff] }
 0x611   :  { %v9142_v34 = vadd.f32 %v6308_v52, %v8899_v43  ;;  %4426 = vmatprep.mubr.bf16.mxu0 %v5968_v12  ;;  %5293 = vmatprep.mubr.bf16.mxu1 %v6006_v17 }
 0x612   :  { %v6310_v3 = vpop.f32.mrf.mxu0 }
 0x613   :  { %v6311_v0 = vadd.f32 %v6310_v3, %v6309_v54  ;;  %v4598_v54 = vld [vmem:[#allocation8 + $0x170] sm:$0xff]  ;;  %v4635_v3 = vld [vmem:[#allocation8 + $0x5f8] sm:$0xff] }
 0x614   :  { %v6312_v28 = vpop.f32.mrf.mxu0 }
 0x615   :  { %v9145_v37 = vadd.f32 %v6311_v0, %v8916_v57  ;;  %v6013_v0 = vcombine.low %v4629_v32, %v4631_v59 }
 0x616   :  { %v6313_v45 = vpop.f32.mrf.mxu0 }
 0x617   :  { %v6314_v22 = vadd.f32 %v6313_v45, %v6312_v28 }
 0x618   :  { %v6315_v43 = vpop.f32.mrf.mxu0  ;;  %4427 = vmatmul.mubr.bf16.gmra.mxu0 %v5967_v50  ;;  %5294 = vmatmul.mubr.bf16.gmra.mxu1 %v6005_v62  ;;  %v5980_v50 = vcombine.high %v4596_v46, %v4598_v54  ;;  %v6018_v62 = vcombine.high %v4633_v2, %v4635_v3 }
 0x619   :  { %v9148_v9 = vadd.f32 %v6314_v22, %v8930_v10  ;;  %5100 = vmatprep.mubr.bf16.mxu0 %v5972_v42  ;;  %5301 = vmatprep.mubr.bf16.mxu1 %v6010_v49  ;;  %v9765_v49 = vld [vmem:[#allocation22_spill] sm:$0xff]  ;;  %v9766_v22 = vld [vmem:[#allocation23_spill] sm:$0xff] }
 0x61a   :  { %v6316_v4 = vpop.f32.mrf.mxu0 }
 0x61b   :  { %v6317_v19 = vadd.f32 %v6316_v4, %v6315_v43  ;;  %v9767_v43 = vld [vmem:[#allocation24_spill] sm:$0xff] }
 0x61c   :  { %v6318_v57 = vpop.f32.mrf.mxu0  ;;  %v6414_v4 = vadd.f32 %v9767_v43, %v9766_v22 }
 0x61d   :  { %v9151_v53 = vadd.f32 %v6317_v19, %v9764_v25  ;;  %v6017_v25 = vcombine.low %v4633_v2, %v4635_v3 }
 0x61e   :  { %v6319_v36 = vpop.f32.mrf.mxu0 }
 0x61f   :  { %v6320_v12 = vadd.f32 %v6319_v36, %v6318_v57 }
 0x620   :  { %v6321_v10 = vpop.f32.mrf.mxu0  ;;  %5101 = vmatmul.mubr.bf16.vlgmr.msra.gmra.mxu0 %v5971_v48  ;;  %5302 = vmatmul.mubr.bf16.gmra.mxu1 %v6009_v55  ;;  %v5979_v55 = vcombine.low %v4596_v46, %v4598_v54  ;;  %v4604_v54 = vld [vmem:[#allocation8 + $0x230] sm:$0xff] }
 0x621   :  { %v9154_v17 = vadd.f32 %v6320_v12, %v8976_v60  ;;  %5108 = vmatprep.mubr.bf16.mxu0 %v5976_v44  ;;  %5309 = vmatprep.mubr.bf16.mxu1 %v6014_v23  ;;  %v9768_v12 = vld [vmem:[#allocation36_spill] sm:$0xff] }
 0x622   :  { %v6322_v52 = vpop.f32.mrf.mxu0 }
 0x623   :  { %v6323_v33 = vadd.f32 %v6322_v52, %v6321_v10 }
 0x624   :  { %v6324_v18 = vpop.f32.mrf.mxu0 }
 0x625   :  { %v3643_v28 = vadd.f32 %v6323_v33, %v9003_v8  ;;  %v4602_v8 = vld [vmem:[#allocation8 + $0x1f0] sm:$0xff] }
 0x626   :  { %v6325_v42 = vpop.f32.mrf.mxu0  ;;  %v5984_v23 = vcombine.high %v4600_v58, %v4602_v8  ;;  %v9770_v33 = vld [vmem:[#allocation41_spill] sm:$0xff] }
 0x627   :  { %v9158_v45 = vadd.f32 %v9765_v49, %v3643_v28  ;;  %v6326_v60 = vadd.f32 %v6325_v42, %v6324_v18 }
 0x628   :  { %v6327_v19 = vpop.f32.mrf.mxu0  ;;  %5109 = vmatmul.mubr.bf16.gmra.mxu0 %v5975_v11  ;;  %5310 = vmatmul.mubr.bf16.gmra.mxu1 %v6013_v0  ;;  %v9171_v0 = vpop.f32.mrf.mxu1 }
 0x629   :  { %v3646_v57 = vadd.f32 %v6326_v60, %v9025_v38  ;;  %5116 = vmatprep.mubr.bf16.mxu0 %v5980_v50  ;;  %5317 = vmatprep.mubr.bf16.mxu1 %v6018_v62  ;;  %v9769_v38 = vld [vmem:[#allocation39_spill] sm:$0xff]  ;;  %v5983_v62 = vcombine.low %v4600_v58, %v4602_v8 }
 0x62a   :  { %v6328_v63 = vpop.f32.mrf.mxu0  ;;  %v6420_v18 = vadd.f32 %v9770_v33, %v9769_v38  ;;  %v9176_v42 = vpop.f32.mrf.mxu1 }
 0x62b   :  { %v9163_v32 = vadd.f32 %v6414_v4, %v3646_v57  ;;  %v6329_v59 = vadd.f32 %v6328_v63, %v6327_v19  ;;  %v9771_v4 = vld [vmem:[#allocation25_spill] sm:$0xff]  ;;  %v9772_v57 = vld [vmem:[#allocation44_spill] sm:$0xff]  ;;  %v9773_v63 = vld [vmem:[#allocation46_spill] sm:$0xff] }
 0x62c   :  { %v6330_v48 = vpop.f32.mrf.mxu0 }
 0x62d   :  { %v3651_v44 = vadd.f32 %v6329_v59, %v9048_v39  ;;  %v4606_v39 = vld [vmem:[#allocation8 + $0x270] sm:$0xff]  ;;  %v6426_v59 = vadd.f32 %v9773_v63, %v9772_v57 }
 0x62e   :  { %v6331_v36 = vpop.f32.mrf.mxu0  ;;  %v5988_v60 = vcombine.high %v4604_v54, %v4606_v39  ;;  %v5987_v38 = vcombine.low %v4604_v54, %v4606_v39  ;;  %v4612_v39 = vld [vmem:[#allocation8 + $0x330] sm:$0xff] }
 0x62f   :  { %v9167_v10 = vadd.f32 %v9768_v12, %v3651_v44  ;;  %v6332_v52 = vadd.f32 %v6331_v36, %v6330_v48  ;;  %v4610_v44 = vld [vmem:[#allocation8 + $0x2f0] sm:$0xff] }
 0x630   :  { %v6333_v11 = vpop.f32.mrf.mxu0  ;;  %5117 = vmatmul.mubr.bf16.gmra.mxu0 %v5979_v55  ;;  %5318 = vmatmul.mubr.bf16.gmra.mxu1 %v6017_v25 }
 0x631   :  { %v3654_v28 = vadd.f32 %v6332_v52, %v9062_v29  ;;  %5124 = vmatprep.mubr.bf16.mxu0 %v5984_v23 }
 0x632   :  { %v6334_v46 = vpop.f32.mrf.mxu0 }
 0x633   :  { %v9174_v2 = vadd.f32 %v6420_v18, %v3654_v28  ;;  %v6335_v3 = vadd.f32 %v6334_v46, %v6333_v11 }
 0x634   :  { %v6336_v50 = vpop.f32.mrf.mxu0 }
 0x635   :  { %v3659_v49 = vadd.f32 %v6335_v3, %v9078_v13  ;;  %v4608_v13 = vld [vmem:[#allocation8 + $0x2b0] sm:$0xff] }
 0x636   :  { %v6337_v22 = vpop.f32.mrf.mxu0  ;;  %v6555_v43 = vpop.f32.mrf.mxu1  ;;  %v5992_v11 = vcombine.high %v4608_v13, %v4610_v44 }
 0x637   :  { %v9180_v19 = vadd.f32 %v9771_v4, %v3659_v49  ;;  %v6338_v29 = vadd.f32 %v6337_v22, %v6336_v50 }
 0x638   :  { %v6339_v48 = vpop.f32.mrf.mxu0  ;;  %5125 = vmatmul.mubr.bf16.gmra.mxu0 %v5983_v62  ;;  %v6556_v55 = vpop.f32.mrf.mxu1 }
 0x639   :  { %v3662_v25 = vadd.f32 %v6338_v29, %v9090_v47  ;;  %5132 = vmatprep.mubr.bf16.mxu0 %v5988_v60  ;;  %v9185_v58 = vadd.f32 %v6556_v55, %v6555_v43 }
 0x63a   :  { %v6340_v8 = vpop.f32.mrf.mxu0  ;;  %v6558_v23 = vpop.f32.mrf.mxu1 }
 0x63b   :  { %v9187_v36 = vadd.f32 %v6426_v59, %v3662_v25  ;;  %v6341_v12 = vadd.f32 %v6340_v8, %v6339_v48 }
 0x63c   :  { %v6342_v52 = vpop.f32.mrf.mxu0  ;;  %v6559_v33 = vpop.f32.mrf.mxu1 }
 0x63d   :  { %v3667_v18 = vadd.f32 %v6341_v12, %v9099_v26  ;;  %v9190_v28 = vadd.f32 %v6559_v33, %v6558_v23  ;;  %v4614_v26 = vld [vmem:[#allocation8 + $0x370] sm:$0xff] }
 0x63e   :  { %v6343_v46 = vpop.f32.mrf.mxu0  ;;  %v6561_v47 = vpop.f32.mrf.mxu1  ;;  %v5996_v48 = vcombine.high %v4612_v39, %v4614_v26 }
 0x63f   :  { %v9193_v3 = vadd.f32 %v8971_v20, %v3667_v18  ;;  %v6344_v50 = vadd.f32 %v6343_v46, %v6342_v52  ;;  %v5991_v20 = vcombine.low %v4608_v13, %v4610_v44  ;;  %v4616_v44 = vld [vmem:[#allocation8 + $0x3b0] sm:$0xff] }
 0x640   :  { %v6345_v62 = vpop.f32.mrf.mxu0  ;;  %5133 = vmatmul.mubr.bf16.gmra.mxu0 %v5987_v38  ;;  %v6562_v49 = vpop.f32.mrf.mxu1 }
 0x641   :  { %v3670_v60 = vadd.f32 %v6344_v50, %v9103_v24  ;;  %5140 = vmatprep.mubr.bf16.mxu0 %v5992_v11  ;;  %v9196_v22 = vadd.f32 %v6562_v49, %v6561_v47 }
 0x642   :  { %v6346_v54 = vpop.f32.mrf.mxu0  ;;  %v6564_v43 = vpop.f32.mrf.mxu1 }
 0x643   :  { %v9199_v4 = vadd.f32 %v8997_v51, %v3670_v60  ;;  %v6347_v29 = vadd.f32 %v6346_v54, %v6345_v62 }
 0x644   :  { %v6348_v57 = vpop.f32.mrf.mxu0  ;;  %v6565_v63 = vpop.f32.mrf.mxu1 }
 0x645   :  { %v3675_v59 = vadd.f32 %v6347_v29, %v9106_v31  ;;  %v9202_v55 = vadd.f32 %v6565_v63, %v6564_v43  ;;  %v4618_v31 = vld [vmem:[#allocation8 + $0x3f0] sm:$0xff] }
 0x646   :  { %v6349_v24 = vpop.f32.mrf.mxu0  ;;  %v6567_v25 = vpop.f32.mrf.mxu1  ;;  %v6000_v62 = vcombine.high %v4616_v44, %v4618_v31 }
 0x647   :  { %v9205_v8 = vadd.f32 %v9020_v21, %v3675_v59  ;;  %v6350_v23 = vadd.f32 %v6349_v24, %v6348_v57  ;;  %v5995_v21 = vcombine.low %v4612_v39, %v4614_v26  ;;  %v4620_v26 = vld [vmem:[#allocation8 + $0x430] sm:$0xff] }
 0x648   :  { %v6351_v12 = vpop.f32.mrf.mxu0  ;;  %5141 = vmatmul.mubr.bf16.gmra.mxu0 %v5991_v20  ;;  %v6568_v52 = vpop.f32.mrf.mxu1 }
 0x649   :  { %v3678_v51 = vadd.f32 %v6350_v23, %v9110_v16  ;;  %5148 = vmatprep.mubr.bf16.mxu0 %v5996_v48  ;;  %v9208_v38 = vadd.f32 %v6568_v52, %v6567_v25 }
 0x64a   :  { %v6352_v13 = vpop.f32.mrf.mxu0  ;;  %v6570_v33 = vpop.f32.mrf.mxu1 }
 0x64b   :  { %v9211_v18 = vadd.f32 %v9054_v5, %v3678_v51  ;;  %v6353_v11 = vadd.f32 %v6352_v13, %v6351_v12 }
 0x64c   :  { %v6354_v46 = vpop.f32.mrf.mxu0  ;;  %v6571_v47 = vpop.f32.mrf.mxu1 }
 0x64d   :  { %v3683_v50 = vadd.f32 %v6353_v11, %v9113_v14  ;;  %v9214_v49 = vadd.f32 %v6571_v47, %v6570_v33  ;;  %v4622_v14 = vld [vmem:[#allocation8 + $0x470] sm:$0xff]  ;;  %v6450_v11 = vadd.f32 %v9176_v42, %v9171_v0 }
 0x64e   :  { %v6355_v16 = vpop.f32.mrf.mxu0  ;;  %v6573_v60 = vpop.f32.mrf.mxu1  ;;  %v6004_v12 = vcombine.high %v4620_v26, %v4622_v14  ;;  %v4626_v47 = vld [vmem:[#allocation8 + $0x4f0] sm:$0xff] }
 0x64f   :  { %v9217_v54 = vadd.f32 %v9067_v30, %v3683_v50  ;;  %v6356_v43 = vadd.f32 %v6355_v16, %v6354_v46  ;;  %v5999_v30 = vcombine.low %v4616_v44, %v4618_v31 }
 0x650   :  { %v6357_v29 = vpop.f32.mrf.mxu0  ;;  %5149 = vmatmul.mubr.bf16.gmra.mxu0 %v5995_v21  ;;  %v6574_v57 = vpop.f32.mrf.mxu1  ;;  %v4624_v21 = vld [vmem:[#allocation8 + $0x4b0] sm:$0xff] }
 0x651   :  { %v3686_v5 = vadd.f32 %v6356_v43, %v9117_v15  ;;  %5156 = vmatprep.mubr.bf16.mxu0 %v6000_v62  ;;  %v9220_v20 = vadd.f32 %v6574_v57, %v6573_v60  ;;  %v6003_v60 = vcombine.low %v4620_v26, %v4622_v14  ;;  %v6008_v42 = vcombine.high %v4624_v21, %v4626_v47  ;;  %v4628_v14 = vld [vmem:[#allocation8 + $0x530] sm:$0xff] }
 0x652   :  { %v6358_v39 = vpop.f32.mrf.mxu0  ;;  %v6576_v63 = vpop.f32.mrf.mxu1 }
 0x653   :  { %v9223_v59 = vadd.f32 %v9083_v56, %v3686_v5  ;;  %v6359_v48 = vadd.f32 %v6358_v39, %v6357_v29 }
 0x654   :  { %v6360_v24 = vpop.f32.mrf.mxu0  ;;  %v6577_v25 = vpop.f32.mrf.mxu1 }
 0x655   :  { %v3691_v23 = vadd.f32 %v6359_v48, %v9120_v40  ;;  %v9226_v52 = vadd.f32 %v6577_v25, %v6576_v63 }
 0x656   :  { %v6361_v15 = vpop.f32.mrf.mxu0  ;;  %v6579_v51 = vpop.f32.mrf.mxu1 }
 0x657   :  { %v9229_v13 = vadd.f32 %v9095_v1, %v3691_v23  ;;  %v6362_v33 = vadd.f32 %v6361_v15, %v6360_v24 }
 0x658   :  { %v6379_v56 = vpop.f32.mrf.mxu0  ;;  %5157 = vmatmul.mubr.bf16.gmra.mxu0 %v5999_v30  ;;  %v6580_v46 = vpop.f32.mrf.mxu1  ;;  %v4630_v30 = vld [vmem:[#allocation8 + $0x570] sm:$0xff] }
 0x659   :  { %v3694_v44 = vadd.f32 %v6362_v33, %v9124_v35  ;;  %5164 = vmatprep.mubr.bf16.mxu0 %v6004_v12  ;;  %v9234_v31 = vadd.f32 %v6580_v46, %v6579_v51  ;;  %v6007_v12 = vcombine.low %v4624_v21, %v4626_v47  ;;  %v6012_v33 = vcombine.high %v4628_v14, %v4630_v30  ;;  %v4632_v47 = vld [vmem:[#allocation8 + $0x5b0] sm:$0xff] }
 0x65a   :  { %v6380_v40 = vpop.f32.mrf.mxu0  ;;  %v6582_v50 = vpop.f32.mrf.mxu1 }
 0x65b   :  { %v9236_v62 = vadd.f32 %v6450_v11, %v3694_v44  ;;  %v6381_v1 = vadd.f32 %v6380_v40, %v6379_v56 }
 0x65c   :  { %v6382_v16 = vpop.f32.mrf.mxu0  ;;  %v6583_v43 = vpop.f32.mrf.mxu1 }
 0x65d   :  { %v9239_v0 = vadd.f32 %v6381_v1, %v9127_v7  ;;  %v9241_v29 = vadd.f32 %v6583_v43, %v6582_v50 }
 0x65e   :  { %v6383_v35 = vpop.f32.mrf.mxu0  ;;  %v6585_v57 = vpop.f32.mrf.mxu1 }
 0x65f   :  { %v6384_v5 = vadd.f32 %v6383_v35, %v6382_v16  ;;  %v4634_v16 = vld [vmem:[#allocation8 + $0x5f0] sm:$0xff] }
 0x660   :  { %v6385_v39 = vpop.f32.mrf.mxu0  ;;  %5165 = vmatmul.mubr.bf16.gmra.mxu0 %v6003_v60  ;;  %v6586_v63 = vpop.f32.mrf.mxu1 }
 0x661   :  { %v9244_v48 = vadd.f32 %v6384_v5, %v9130_v61  ;;  %5172 = vmatprep.mubr.bf16.mxu0 %v6008_v42  ;;  %v9246_v24 = vadd.f32 %v6586_v63, %v6585_v57  ;;  %v6011_v42 = vcombine.low %v4628_v14, %v4630_v30  ;;  %v6016_v5 = vcombine.high %v4632_v47, %v4634_v16 }
 0x662   :  { %v6386_v26 = vpop.f32.mrf.mxu0  ;;  %v6588_v7 = vpop.f32.mrf.mxu1 }
 0x663   :  { %v6387_v25 = vadd.f32 %v6386_v26, %v6385_v39 }
 0x664   :  { %v6388_v23 = vpop.f32.mrf.mxu0  ;;  %v6589_v15 = vpop.f32.mrf.mxu1 }
 0x665   :  { %v9249_v51 = vadd.f32 %v6387_v25, %v9133_v27  ;;  %v9251_v11 = vadd.f32 %v6589_v15, %v6588_v7 }
 0x666   :  { %v6389_v56 = vpop.f32.mrf.mxu0  ;;  %v6591_v61 = vpop.f32.mrf.mxu1 }
 0x667   :  { %v6390_v46 = vadd.f32 %v6389_v56, %v6388_v23 }
 0x668   :  { %v6391_v44 = vpop.f32.mrf.mxu0  ;;  %5173 = vmatmul.mubr.bf16.gmra.mxu0 %v6007_v12  ;;  %v6592_v40 = vpop.f32.mrf.mxu1 }
 0x669   :  { %v9254_v50 = vadd.f32 %v6390_v46, %v9136_v41  ;;  %5180 = vmatprep.mubr.bf16.mxu0 %v6012_v33  ;;  %v9256_v1 = vadd.f32 %v6592_v40, %v6591_v61  ;;  %v6015_v33 = vcombine.low %v4632_v47, %v4634_v16 }
 0x66a   :  { %v6392_v21 = vpop.f32.mrf.mxu0  ;;  %v6594_v27 = vpop.f32.mrf.mxu1 }
 0x66b   :  { %v6393_v60 = vadd.f32 %v6392_v21, %v6391_v44 }
 0x66c   :  { %v6394_v43 = vpop.f32.mrf.mxu0  ;;  %v6595_v35 = vpop.f32.mrf.mxu1 }
 0x66d   :  { %v9259_v57 = vadd.f32 %v6393_v60, %v9139_v6  ;;  %v9261_v39 = vadd.f32 %v6595_v35, %v6594_v27 }
 0x66e   :  { %v6395_v63 = vpop.f32.mrf.mxu0  ;;  %v6597_v41 = vpop.f32.mrf.mxu1 }
 0x66f   :  { %v6396_v26 = vadd.f32 %v6395_v63, %v6394_v43 }
 0x670   :  { %v6397_v7 = vpop.f32.mrf.mxu0  ;;  %5181 = vmatmul.mubr.bf16.gmra.mxu0 %v6011_v42  ;;  %v6598_v25 = vpop.f32.mrf.mxu1 }
 0x671   :  { %v9264_v23 = vadd.f32 %v6396_v26, %v9142_v34  ;;  %5188 = vmatprep.mubr.bf16.mxu0 %v6016_v5  ;;  %v9266_v12 = vadd.f32 %v6598_v25, %v6597_v41 }
 0x672   :  { %v6398_v14 = vpop.f32.mrf.mxu0  ;;  %v6600_v30 = vpop.f32.mrf.mxu1 }
 0x673   :  { %v6399_v15 = vadd.f32 %v6398_v14, %v6397_v7 }
 0x674   :  { %v6400_v6 = vpop.f32.mrf.mxu0  ;;  %v6601_v56 = vpop.f32.mrf.mxu1 }
 0x675   :  { %v9269_v61 = vadd.f32 %v6399_v15, %v9145_v37  ;;  %v9271_v46 = vadd.f32 %v6601_v56, %v6600_v30 }
 0x676   :  { %v6401_v44 = vpop.f32.mrf.mxu0 }
 0x677   :  { %v6402_v40 = vadd.f32 %v6401_v44, %v6400_v6  ;;  %v6603_v21 = vpop.f32.mrf.mxu1 }
 0x678   :  { %v6403_v27 = vpop.f32.mrf.mxu0  ;;  %5189 = vmatmul.mubr.bf16.gmra.mxu0 %v6015_v33 }
 0x679   :  { %v9274_v34 = vadd.f32 %v6402_v40, %v9148_v9  ;;  %v6604_v60 = vpop.f32.mrf.mxu1 }
 0x67a   :  { %v6404_v43 = vpop.f32.mrf.mxu0  ;;  %v9276_v42 = vadd.f32 %v6604_v60, %v6603_v21 }
 0x67b   :  { %v6405_v35 = vadd.f32 %v6404_v43, %v6403_v27  ;;  %v6606_v47 = vpop.f32.mrf.mxu1 }
 0x67c   :  { %v6406_v16 = vpop.f32.mrf.mxu0 }
 0x67d   :  { %v9279_v37 = vadd.f32 %v6405_v35, %v9151_v53  ;;  %v6607_v5 = vpop.f32.mrf.mxu1 }
 0x67e   :  { %v6407_v63 = vpop.f32.mrf.mxu0  ;;  %v9281_v41 = vadd.f32 %v6607_v5, %v6606_v47 }
 0x67f   :  { %v6408_v26 = vadd.f32 %v6407_v63, %v6406_v16  ;;  %v6609_v7 = vpop.f32.mrf.mxu1 }
 0x680   :  { %v6467_v25 = vpop.f32.mrf.mxu0 }
 0x681   :  { %v9284_v9 = vadd.f32 %v6408_v26, %v9154_v17  ;;  %v6610_v14 = vpop.f32.mrf.mxu1 }
 0x682   :  { %v6468_v30 = vpop.f32.mrf.mxu0  ;;  %v9286_v15 = vadd.f32 %v6610_v14, %v6609_v7 }
 0x683   :  { %v6469_v6 = vadd.f32 %v6468_v30, %v6467_v25  ;;  %v6612_v33 = vpop.f32.mrf.mxu1 }
 0x684   :  { %v6470_v56 = vpop.f32.mrf.mxu0 }
 0x685   :  { %v4470_v53 = vadd.f32 %v9185_v58, %v6469_v6  ;;  %v6613_v44 = vpop.f32.mrf.mxu1 }
 0x686   :  { %v6471_v40 = vpop.f32.mrf.mxu0  ;;  %v9289_v21 = vadd.f32 %v6613_v44, %v6612_v33 }
 0x687   :  { %v9292_v27 = vadd.f32 %v4470_v53, %v9239_v0  ;;  %v6472_v60 = vadd.f32 %v6471_v40, %v6470_v56  ;;  %v6615_v43 = vpop.f32.mrf.mxu1 }
 0x688   :  { %v6473_v17 = vpop.f32.mrf.mxu0 }
 0x689   :  { %v4473_v35 = vadd.f32 %v9190_v28, %v6472_v60  ;;  %v6616_v47 = vpop.f32.mrf.mxu1 }
 0x68a   :  { %v6474_v16 = vpop.f32.mrf.mxu0  ;;  %v9295_v5 = vadd.f32 %v6616_v47, %v6615_v43 }
 0x68b   :  { %v9298_v63 = vadd.f32 %v4473_v35, %v9244_v48  ;;  %v6475_v58 = vadd.f32 %v6474_v16, %v6473_v17  ;;  %v6618_v26 = vpop.f32.mrf.mxu1 }
 0x68c   :  { %v6476_v7 = vpop.f32.mrf.mxu0 }
 0x68d   :  { %v4478_v25 = vadd.f32 %v9196_v22, %v6475_v58  ;;  %v6619_v14 = vpop.f32.mrf.mxu1 }
 0x68e   :  { %v6477_v0 = vpop.f32.mrf.mxu0  ;;  %v9301_v30 = vadd.f32 %v6619_v14, %v6618_v26 }
 0x68f   :  { %v9304_v6 = vadd.f32 %v4478_v25, %v9249_v51  ;;  %v6478_v28 = vadd.f32 %v6477_v0, %v6476_v7  ;;  %v6621_v33 = vpop.f32.mrf.mxu1 }
 0x690   :  { %v6479_v56 = vpop.f32.mrf.mxu0 }
 0x691   :  { %v4481_v53 = vadd.f32 %v9202_v55, %v6478_v28  ;;  %v6622_v44 = vpop.f32.mrf.mxu1 }
 0x692   :  { %v6480_v48 = vpop.f32.mrf.mxu0  ;;  %v9307_v40 = vadd.f32 %v6622_v44, %v6621_v33 }
 0x693   :  { %v9310_v60 = vadd.f32 %v4481_v53, %v9254_v50  ;;  %v6481_v22 = vadd.f32 %v6480_v48, %v6479_v56  ;;  %v6624_v43 = vpop.f32.mrf.mxu1 }
 0x694   :  { %v6482_v17 = vpop.f32.mrf.mxu0 }
 0x695   :  { %v4486_v35 = vadd.f32 %v9208_v38, %v6481_v22  ;;  %v6625_v47 = vpop.f32.mrf.mxu1 }
 0x696   :  { %v6483_v51 = vpop.f32.mrf.mxu0  ;;  %v9313_v16 = vadd.f32 %v6625_v47, %v6624_v43 }
 0x697   :  { %v9316_v58 = vadd.f32 %v4486_v35, %v9259_v57  ;;  %v6484_v55 = vadd.f32 %v6483_v51, %v6482_v17 }
 0x698   :  { %v6485_v26 = vpop.f32.mrf.mxu0  ;;  %v9318_v7 = vpop.f32.mrf.mxu1 }
 0x699   :  { %v4489_v25 = vadd.f32 %v9214_v49, %v6484_v55 }
 0x69a   :  { %v6486_v50 = vpop.f32.mrf.mxu0  ;;  %v9321_v14 = vpop.f32.mrf.mxu1 }
 0x69b   :  { %v9324_v0 = vadd.f32 %v4489_v25, %v9264_v23  ;;  %v6487_v38 = vadd.f32 %v6486_v50, %v6485_v26 }
 0x69c   :  { %v6488_v28 = vpop.f32.mrf.mxu0  ;;  %v9326_v33 = vpop.f32.mrf.mxu1 }
 0x69d   :  { %v4494_v56 = vadd.f32 %v9220_v20, %v6487_v38 }
 0x69e   :  { %v6489_v57 = vpop.f32.mrf.mxu0  ;;  %v9329_v53 = vpop.f32.mrf.mxu1 }
 0x69f   :  { %v9332_v44 = vadd.f32 %v4494_v56, %v9269_v61  ;;  %v6490_v48 = vadd.f32 %v6489_v57, %v6488_v28 }
 0x6a0   :  { %v6491_v49 = vpop.f32.mrf.mxu0  ;;  %v9334_v22 = vpop.f32.mrf.mxu1 }
 0x6a1   :  { %v4497_v43 = vadd.f32 %v9226_v52, %v6490_v48 }
 0x6a2   :  { %v6492_v23 = vpop.f32.mrf.mxu0  ;;  %v9337_v17 = vpop.f32.mrf.mxu1 }
 0x6a3   :  { %v9340_v35 = vadd.f32 %v4497_v43, %v9274_v34  ;;  %v6493_v47 = vadd.f32 %v6492_v23, %v6491_v49 }
 0x6a4   :  { %v6494_v20 = vpop.f32.mrf.mxu0  ;;  %v9342_v51 = vpop.f32.mrf.mxu1 }
 0x6a5   :  { %v4502_v55 = vadd.f32 %v9234_v31, %v6493_v47 }
 0x6a6   :  { %v6495_v61 = vpop.f32.mrf.mxu0  ;;  %v9345_v26 = vpop.f32.mrf.mxu1 }
 0x6a7   :  { %v9348_v25 = vadd.f32 %v4502_v55, %v9279_v37  ;;  %v6496_v50 = vadd.f32 %v6495_v61, %v6494_v20 }
 0x6a8   :  { %v6497_v52 = vpop.f32.mrf.mxu0  ;;  %v9350_v38 = vpop.f32.mrf.mxu1 }
 0x6a9   :  { %v4505_v28 = vadd.f32 %v9241_v29, %v6496_v50 }
 0x6aa   :  { %v6498_v34 = vpop.f32.mrf.mxu0  ;;  %v9353_v56 = vpop.f32.mrf.mxu1 }
 0x6ab   :  { %v9356_v57 = vadd.f32 %v4505_v28, %v9284_v9  ;;  %v6499_v48 = vadd.f32 %v6498_v34, %v6497_v52 }
 0x6ac   :  { %v6500_v31 = vpop.f32.mrf.mxu0  ;;  %v9358_v49 = vpop.f32.mrf.mxu1 }
 0x6ad   :  { %v4510_v43 = vadd.f32 %v9246_v24, %v6499_v48 }
 0x6ae   :  { %v6501_v37 = vpop.f32.mrf.mxu0  ;;  %v9361_v23 = vpop.f32.mrf.mxu1 }
 0x6af   :  { %v9364_v47 = vadd.f32 %v4510_v43, %v9158_v45  ;;  %v6502_v20 = vadd.f32 %v6501_v37, %v6500_v31 }
 0x6b0   :  { %v6503_v29 = vpop.f32.mrf.mxu0  ;;  %v9366_v55 = vpop.f32.mrf.mxu1 }
 0x6b1   :  { %v4513_v61 = vadd.f32 %v9251_v11, %v6502_v20 }
 0x6b2   :  { %v6504_v9 = vpop.f32.mrf.mxu0  ;;  %v9372_v34 = vpop.f32.mrf.mxu1 }
 0x6b3   :  { %v9370_v50 = vadd.f32 %v4513_v61, %v9163_v32  ;;  %v6505_v52 = vadd.f32 %v6504_v9, %v6503_v29 }
 0x6b4   :  { %v6506_v28 = vpop.f32.mrf.mxu0  ;;  %v9378_v37 = vpop.f32.mrf.mxu1 }
 0x6b5   :  { %v4518_v24 = vadd.f32 %v9256_v1, %v6505_v52 }
 0x6b6   :  { %v6507_v48 = vpop.f32.mrf.mxu0  ;;  %v9384_v9 = vpop.f32.mrf.mxu1 }
 0x6b7   :  { %v9376_v45 = vadd.f32 %v4518_v24, %v9167_v10  ;;  %v6508_v31 = vadd.f32 %v6507_v48, %v6506_v28 }
 0x6b8   :  { %v6509_v43 = vpop.f32.mrf.mxu0  ;;  %v9390_v48 = vpop.f32.mrf.mxu1 }
 0x6b9   :  { %v4521_v11 = vadd.f32 %v9261_v39, %v6508_v31 }
 0x6ba   :  { %v6510_v20 = vpop.f32.mrf.mxu0 }
 0x6bb   :  { %v9382_v32 = vadd.f32 %v4521_v11, %v9174_v2  ;;  %v6511_v29 = vadd.f32 %v6510_v20, %v6509_v43  ;;  %v9396_v20 = vpop.f32.mrf.mxu1 }
 0x6bc   :  { %v6512_v61 = vpop.f32.mrf.mxu0 }
 0x6bd   :  { %v4526_v1 = vadd.f32 %v9266_v12, %v6511_v29 }
 0x6be   :  { %v6513_v52 = vpop.f32.mrf.mxu0 }
 0x6bf   :  { %v9388_v10 = vadd.f32 %v4526_v1, %v9180_v19  ;;  %v6514_v28 = vadd.f32 %v6513_v52, %v6512_v61  ;;  %v9402_v52 = vpop.f32.mrf.mxu1 }
 0x6c0   :  { %v6515_v24 = vpop.f32.mrf.mxu0 }
 0x6c1   :  { %v4529_v39 = vadd.f32 %v9271_v46, %v6514_v28 }
 0x6c2   :  { %v6516_v31 = vpop.f32.mrf.mxu0 }
 0x6c3   :  { %v9394_v2 = vadd.f32 %v4529_v39, %v9187_v36  ;;  %v6517_v43 = vadd.f32 %v6516_v31, %v6515_v24  ;;  %v9408_v31 = vpop.f32.mrf.mxu1 }
 0x6c4   :  { %v6518_v11 = vpop.f32.mrf.mxu0 }
 0x6c5   :  { %v4534_v12 = vadd.f32 %v9276_v42, %v6517_v43 }
 0x6c6   :  { %v6519_v29 = vpop.f32.mrf.mxu0 }
 0x6c7   :  { %v9400_v19 = vadd.f32 %v4534_v12, %v9193_v3  ;;  %v6520_v61 = vadd.f32 %v6519_v29, %v6518_v11  ;;  %v9414_v29 = vpop.f32.mrf.mxu1 }
 0x6c8   :  { %v6521_v1 = vpop.f32.mrf.mxu0 }
 0x6c9   :  { %v4537_v46 = vadd.f32 %v9281_v41, %v6520_v61 }
 0x6ca   :  { %v6522_v28 = vpop.f32.mrf.mxu0 }
 0x6cb   :  { %v9406_v36 = vadd.f32 %v4537_v46, %v9199_v4  ;;  %v6523_v24 = vadd.f32 %v6522_v28, %v6521_v1  ;;  %v9420_v28 = vpop.f32.mrf.mxu1 }
 0x6cc   :  { %v6524_v39 = vpop.f32.mrf.mxu0 }
 0x6cd   :  { %v4542_v42 = vadd.f32 %v9286_v15, %v6523_v24 }
 0x6ce   :  { %v6525_v43 = vpop.f32.mrf.mxu0 }
 0x6cf   :  { %v9412_v3 = vadd.f32 %v4542_v42, %v9205_v8  ;;  %v6526_v11 = vadd.f32 %v6525_v43, %v6524_v39  ;;  %v9426_v43 = vpop.f32.mrf.mxu1 }
 0x6d0   :  { %v6527_v12 = vpop.f32.mrf.mxu0 }
 0x6d1   :  { %v4545_v41 = vadd.f32 %v9289_v21, %v6526_v11 }
 0x6d2   :  { %v6528_v61 = vpop.f32.mrf.mxu0 }
 0x6d3   :  { %v9418_v4 = vadd.f32 %v4545_v41, %v9211_v18  ;;  %v6529_v1 = vadd.f32 %v6528_v61, %v6527_v12  ;;  %v9432_v61 = vpop.f32.mrf.mxu1 }
 0x6d4   :  { %v6530_v46 = vpop.f32.mrf.mxu0 }
 0x6d5   :  { %v4550_v15 = vadd.f32 %v9295_v5, %v6529_v1 }
 0x6d6   :  { %v6531_v24 = vpop.f32.mrf.mxu0 }
 0x6d7   :  { %v9424_v8 = vadd.f32 %v4550_v15, %v9217_v54  ;;  %v6532_v39 = vadd.f32 %v6531_v24, %v6530_v46  ;;  %v9438_v24 = vpop.f32.mrf.mxu1 }
 0x6d8   :  { %v6533_v42 = vpop.f32.mrf.mxu0 }
 0x6d9   :  { %v4553_v21 = vadd.f32 %v9301_v30, %v6532_v39 }
 0x6da   :  { %v6534_v11 = vpop.f32.mrf.mxu0 }
 0x6db   :  { %v9430_v18 = vadd.f32 %v4553_v21, %v9223_v59  ;;  %v6535_v12 = vadd.f32 %v6534_v11, %v6533_v42  ;;  %v6733_v21 = vadd.f32 %v9321_v14, %v9318_v7 }
 0x6dc   :  { %v6536_v41 = vpop.f32.mrf.mxu0 }
 0x6dd   :  { %v4558_v5 = vadd.f32 %v9307_v40, %v6535_v12  ;;  %v9446_v40 = vpop.f32.mrf.mxu1 }
 0x6de   :  { %v6537_v1 = vpop.f32.mrf.mxu0 }
 0x6df   :  { %v9436_v54 = vadd.f32 %v4558_v5, %v9229_v13  ;;  %v6538_v46 = vadd.f32 %v6537_v1, %v6536_v41  ;;  %v5377_v5 = vpop.permute.xlu1 %5376 }
 0x6e0   :  { %v6643_v15 = vpop.f32.mrf.mxu0 }
 0x6e1   :  { %9774 = vst [vmem:[#allocation27_spill] sm:$0xff] %v9436_v54  ;;  %v4561_v30 = vadd.f32 %v9313_v16, %v6538_v46  ;;  %v6736_v16 = vadd.f32 %v9329_v53, %v9326_v33  ;;  %v9451_v54 = vpop.f32.mrf.mxu1 }
 0x6e2   :  { %v6644_v39 = vpop.f32.mrf.mxu0 }
 0x6e3   :  { %v9442_v59 = vadd.f32 %v4561_v30, %v9236_v62  ;;  %v6645_v42 = vadd.f32 %v6644_v39, %v6643_v15  ;;  %v5382_v39 = vpop.permute.xlu0 %5381 }
 0x6e4   :  { %v6646_v11 = vpop.f32.mrf.mxu0 }
 0x6e5   :  { %9775 = vst [vmem:[#allocation49_spill] sm:$0xff] %v9442_v59  ;;  %v5232_v12 = vadd.f32 %v6733_v21, %v6645_v42  ;;  %v6739_v42 = vadd.f32 %v9337_v17, %v9334_v22 }
 0x6e6   :  { %v6647_v13 = vpop.f32.mrf.mxu0 }
 0x6e7   :  { %v5326_v41 = vadd.f32 %v5232_v12, %v9292_v27  ;;  %v6648_v1 = vadd.f32 %v6647_v13, %v6646_v11  ;;  %v9456_v27 = vpop.f32.mrf.mxu1  ;;  %v5387_v12 = vpop.permute.xlu1 %5386 }
 0x6e8   :  { %v6649_v46 = vpop.f32.mrf.mxu0 }
 0x6e9   :  { %v5494_v62 = vadd.f32 %v5377_v5, %v5326_v41  ;;  %v5235_v15 = vadd.f32 %v6736_v16, %v6648_v1  ;;  %v9464_v22 = vpop.f32.mrf.mxu1 }
 0x6ea   :  { %v6650_v30 = vpop.f32.mrf.mxu0 }
 0x6eb   :  { %v5518_v7 = vmax.f32 %v5494_v62, 0.0  ;;  %v5327_v14 = vadd.f32 %v5235_v15, %v9298_v63  ;;  %v6651_v59 = vadd.f32 %v6650_v30, %v6649_v46  ;;  %v6742_v63 = vadd.f32 %v9345_v26, %v9342_v51  ;;  %v9472_v51 = vpop.f32.mrf.mxu1 }
 0x6ec   :  { %v6652_v21 = vpop.f32.mrf.mxu0 }
 0x6ed   :  { %5542 = vst [vmem:[%s9614_s7] sm:$0xff] %v5518_v7  ;;  %v5495_v33 = vadd.f32 %v5382_v39, %v5327_v14  ;;  %v5240_v53 = vadd.f32 %v6739_v42, %v6651_v59  ;;  %v5392_v59 = vpop.permute.xlu0 %5391  ;;  %v5397_v42 = vpop.permute.xlu1 %5396 }
 0x6ee   :  { %v6653_v11 = vpop.f32.mrf.mxu0 }
 0x6ef   :  { %v5519_v13 = vmax.f32 %v5495_v33, 0.0  ;;  %v5328_v5 = vadd.f32 %v5240_v53, %v9304_v6  ;;  %v6654_v41 = vadd.f32 %v6653_v11, %v6652_v21  ;;  %v6745_v6 = vadd.f32 %v9353_v56, %v9350_v38  ;;  %v9480_v38 = vpop.f32.mrf.mxu1 }
 0x6f0   :  { %v6655_v1 = vpop.f32.mrf.mxu0 }
 0x6f1   :  { %5543 = vst [vmem:[%s9614_s7 + $0x8] sm:$0xff] %v5519_v13  ;;  %v5496_v17 = vadd.f32 %v5387_v12, %v5328_v5  ;;  %v5243_v16 = vadd.f32 %v6742_v63, %v6654_v41  ;;  %v5402_v5 = vpop.permute.xlu0 %5401 }
 0x6f2   :  { %v6656_v46 = vpop.f32.mrf.mxu0 }
 0x6f3   :  { %v5520_v62 = vmax.f32 %v5496_v17, 0.0  ;;  %v5329_v15 = vadd.f32 %v5243_v16, %v9310_v60  ;;  %v6657_v30 = vadd.f32 %v6656_v46, %v6655_v1  ;;  %v6748_v60 = vadd.f32 %v9361_v23, %v9358_v49  ;;  %v9488_v49 = vpop.f32.mrf.mxu1 }
 0x6f4   :  { %v6658_v39 = vpop.f32.mrf.mxu0 }
 0x6f5   :  { %5544 = vst [vmem:[%s9614_s7 + $0x10] sm:$0xff] %v5520_v62  ;;  %v5497_v26 = vadd.f32 %v5392_v59, %v5329_v15  ;;  %v5248_v7 = vadd.f32 %v6745_v6, %v6657_v30  ;;  %v5407_v59 = vpop.permute.xlu1 %5406 }
 0x6f6   :  { %v6659_v14 = vpop.f32.mrf.mxu0 }
 0x6f7   :  { %v5521_v21 = vmax.f32 %v5497_v26, 0.0  ;;  %v5330_v33 = vadd.f32 %v5248_v7, %v9316_v58  ;;  %v6660_v53 = vadd.f32 %v6659_v14, %v6658_v39  ;;  %v6751_v58 = vadd.f32 %v9372_v34, %v9366_v55  ;;  %v9496_v55 = vpop.f32.mrf.mxu1  ;;  %v5412_v7 = vpop.permute.xlu0 %5411 }
 0x6f8   :  { %v6661_v11 = vpop.f32.mrf.mxu0 }
 0x6f9   :  { %5545 = vst [vmem:[%s9614_s7 + $0x18] sm:$0xff] %v5521_v21  ;;  %v5498_v56 = vadd.f32 %v5397_v42, %v5330_v33  ;;  %v5251_v12 = vadd.f32 %v6748_v60, %v6660_v53 }
 0x6fa   :  { %v6662_v13 = vpop.f32.mrf.mxu0 }
 0x6fb   :  { %v5522_v41 = vmax.f32 %v5498_v56, 0.0  ;;  %v5331_v63 = vadd.f32 %v5251_v12, %v9324_v0  ;;  %v6663_v1 = vadd.f32 %v6662_v13, %v6661_v11  ;;  %v6754_v0 = vadd.f32 %v9384_v9, %v9378_v37  ;;  %v9504_v37 = vpop.f32.mrf.mxu1  ;;  %v5417_v11 = vpop.permute.xlu1 %5416 }
 0x6fc   :  { %v6664_v17 = vpop.f32.mrf.mxu0 }
 0x6fd   :  { %5546 = vst [vmem:[%s9614_s7 + $0x20] sm:$0xff] %v5522_v41  ;;  %v5499_v23 = vadd.f32 %v5402_v5, %v5331_v63  ;;  %v5256_v16 = vadd.f32 %v6751_v58, %v6663_v1  ;;  %v5422_v1 = vpop.permute.xlu0 %5421 }
 0x6fe   :  { %v6665_v46 = vpop.f32.mrf.mxu0 }
 0x6ff   :  { %v5523_v62 = vmax.f32 %v5499_v23, 0.0  ;;  %v5332_v15 = vadd.f32 %v5256_v16, %v9332_v44  ;;  %v6666_v30 = vadd.f32 %v6665_v46, %v6664_v17  ;;  %v6757_v44 = vadd.f32 %v9396_v20, %v9390_v48  ;;  %v9512_v48 = vpop.f32.mrf.mxu1 }
 0x700   :  { %v6667_v6 = vpop.f32.mrf.mxu0 }
 0x701   :  { %5547 = vst [vmem:[%s9614_s7 + $0x28] sm:$0xff] %v5523_v62  ;;  %v5500_v34 = vadd.f32 %v5407_v59, %v5332_v15  ;;  %v5259_v39 = vadd.f32 %v6754_v0, %v6666_v30  ;;  %v5427_v62 = vpop.permute.xlu1 %5426 }
 0x702   :  { %v6668_v26 = vpop.f32.mrf.mxu0 }
 0x703   :  { %v5524_v14 = vmax.f32 %v5500_v34, 0.0  ;;  %v5333_v42 = vadd.f32 %v5259_v39, %v9340_v35  ;;  %v6669_v21 = vadd.f32 %v6668_v26, %v6667_v6  ;;  %v6760_v35 = vadd.f32 %v9408_v31, %v9402_v52  ;;  %v9520_v52 = vpop.f32.mrf.mxu1  ;;  %v5432_v26 = vpop.permute.xlu0 %5431 }
 0x704   :  { %v6670_v33 = vpop.f32.mrf.mxu0 }
 0x705   :  { %5548 = vst [vmem:[%s9614_s7 + $0x30] sm:$0xff] %v5524_v14  ;;  %v5501_v9 = vadd.f32 %v5412_v7, %v5333_v42  ;;  %v5264_v53 = vadd.f32 %v6757_v44, %v6669_v21 }
 0x706   :  { %v6671_v60 = vpop.f32.mrf.mxu0 }
 0x707   :  { %v5525_v56 = vmax.f32 %v5501_v9, 0.0  ;;  %v5334_v12 = vadd.f32 %v5264_v53, %v9348_v25  ;;  %v6672_v13 = vadd.f32 %v6671_v60, %v6670_v33  ;;  %v6763_v25 = vadd.f32 %v9420_v28, %v9414_v29  ;;  %v9528_v29 = vpop.f32.mrf.mxu1  ;;  %v5437_v9 = vpop.permute.xlu1 %5436 }
 0x708   :  { %v6673_v5 = vpop.f32.mrf.mxu0 }
 0x709   :  { %5549 = vst [vmem:[%s9614_s7 + $0x38] sm:$0xff] %v5525_v56  ;;  %v5502_v20 = vadd.f32 %v5417_v11, %v5334_v12  ;;  %v5267_v41 = vadd.f32 %v6760_v35, %v6672_v13  ;;  %v5442_v35 = vpop.permute.xlu0 %5441 }
 0x70a   :  { %v6674_v63 = vpop.f32.mrf.mxu0 }
 0x70b   :  { %v5526_v58 = vmax.f32 %v5502_v20, 0.0  ;;  %v5335_v17 = vadd.f32 %v5267_v41, %v9356_v57  ;;  %v6675_v23 = vadd.f32 %v6674_v63, %v6673_v5  ;;  %v6766_v57 = vadd.f32 %v9432_v61, %v9426_v43  ;;  %v9536_v43 = vpop.f32.mrf.mxu1 }
 0x70c   :  { %v6676_v16 = vpop.f32.mrf.mxu0 }
 0x70d   :  { %5550 = vst [vmem:[%s9614_s7 + $0x40] sm:$0xff] %v5526_v58  ;;  %v5503_v31 = vadd.f32 %v5422_v1, %v5335_v17  ;;  %v5272_v46 = vadd.f32 %v6763_v25, %v6675_v23  ;;  %v5447_v17 = vpop.permute.xlu1 %5446 }
 0x70e   :  { %v6677_v59 = vpop.f32.mrf.mxu0 }
 0x70f   :  { %v5527_v15 = vmax.f32 %v5503_v31, 0.0  ;;  %v5336_v30 = vadd.f32 %v5272_v46, %v9364_v47  ;;  %v6678_v0 = vadd.f32 %v6677_v59, %v6676_v16  ;;  %v6769_v47 = vadd.f32 %v9446_v40, %v9438_v24  ;;  %v9544_v24 = vpop.f32.mrf.mxu1 }
 0x710   :  { %v6679_v6 = vpop.f32.mrf.mxu0 }
 0x711   :  { %5551 = vst [vmem:[%s9614_s7 + $0x48] sm:$0xff] %v5527_v15  ;;  %v5504_v28 = vadd.f32 %v5427_v62, %v5336_v30  ;;  %v5275_v34 = vadd.f32 %v6766_v57, %v6678_v0  ;;  %v5452_v62 = vpop.permute.xlu0 %5451 }
 0x712   :  { %v6680_v39 = vpop.f32.mrf.mxu0 }
 0x713   :  { %v5528_v7 = vmax.f32 %v5504_v28, 0.0  ;;  %v5337_v14 = vadd.f32 %v5275_v34, %v9370_v50  ;;  %v6681_v42 = vadd.f32 %v6680_v39, %v6679_v6  ;;  %v6772_v50 = vadd.f32 %v9456_v27, %v9451_v54  ;;  %v6789_v54 = vpop.f32.mrf.mxu1  ;;  %v5457_v34 = vpop.permute.xlu1 %5456 }
 0x714   :  { %v6682_v21 = vpop.f32.mrf.mxu0 }
 0x715   :  { %5552 = vst [vmem:[%s9614_s7 + $0x50] sm:$0xff] %v5528_v7  ;;  %v5505_v61 = vadd.f32 %v5432_v26, %v5337_v14  ;;  %v5280_v44 = vadd.f32 %v6769_v47, %v6681_v42  ;;  %v6791_v46 = vpop.f32.mrf.mxu1 }
 0x716   :  { %v6683_v33 = vpop.f32.mrf.mxu0 }
 0x717   :  { %v5529_v53 = vmax.f32 %v5505_v61, 0.0  ;;  %v5338_v60 = vadd.f32 %v5280_v44, %v9376_v45  ;;  %v6684_v11 = vadd.f32 %v6683_v33, %v6682_v21  ;;  %v6775_v45 = vadd.f32 %v9472_v51, %v9464_v22  ;;  %v6792_v6 = vpop.f32.mrf.mxu1  ;;  %v5462_v21 = vpop.permute.xlu0 %5461 }
 0x718   :  { %v6685_v56 = vpop.f32.mrf.mxu0 }
 0x719   :  { %5553 = vst [vmem:[%s9614_s7 + $0x58] sm:$0xff] %v5529_v53  ;;  %v5506_v40 = vadd.f32 %v5437_v9, %v5338_v60  ;;  %v5283_v12 = vadd.f32 %v6772_v50, %v6684_v11  ;;  %v6794_v42 = vpop.f32.mrf.mxu1  ;;  %v5467_v11 = vpop.permute.xlu1 %5466 }
 0x71a   :  { %v6686_v13 = vpop.f32.mrf.mxu0 }
 0x71b   :  { %v5530_v5 = vmax.f32 %v5506_v40, 0.0  ;;  %v5339_v20 = vadd.f32 %v5283_v12, %v9382_v32  ;;  %v6687_v41 = vadd.f32 %v6686_v13, %v6685_v56  ;;  %v6778_v32 = vadd.f32 %v9488_v49, %v9480_v38  ;;  %v6795_v53 = vpop.f32.mrf.mxu1 }
 0x71c   :  { %v6688_v63 = vpop.f32.mrf.mxu0 }
 0x71d   :  { %5554 = vst [vmem:[%s9614_s7 + $0x60] sm:$0xff] %v5530_v5  ;;  %v5507_v27 = vadd.f32 %v5442_v35, %v5339_v20  ;;  %v5288_v1 = vadd.f32 %v6775_v45, %v6687_v41  ;;  %v6797_v13 = vpop.f32.mrf.mxu1  ;;  %v5472_v5 = vpop.permute.xlu0 %5471 }
 0x71e   :  { %v6689_v58 = vpop.f32.mrf.mxu0 }
 0x71f   :  { %v5531_v23 = vmax.f32 %v5507_v27, 0.0  ;;  %v5340_v25 = vadd.f32 %v5288_v1, %v9388_v10  ;;  %v6690_v16 = vadd.f32 %v6689_v58, %v6688_v63  ;;  %v6781_v10 = vadd.f32 %v9504_v37, %v9496_v55  ;;  %v5477_v58 = vpop.permute.xlu1 %5476 }
 0x720   :  { %v6691_v31 = vpop.f32.mrf.mxu0  ;;  %v6793_v63 = vadd.f32 %v6792_v6, %v6791_v46 }
 0x721   :  { %5555 = vst [vmem:[%s9614_s7 + $0x68] sm:$0xff] %v5531_v23  ;;  %v5508_v22 = vadd.f32 %v5447_v17, %v5340_v25  ;;  %v5291_v51 = vadd.f32 %v6778_v32, %v6690_v16  ;;  %v6796_v16 = vadd.f32 %v6795_v53, %v6794_v42 }
 0x722   :  { %v6692_v59 = vpop.f32.mrf.mxu0 }
 0x723   :  { %v5532_v15 = vmax.f32 %v5508_v22, 0.0  ;;  %v5341_v30 = vadd.f32 %v5291_v51, %v9394_v2  ;;  %v6693_v0 = vadd.f32 %v6692_v59, %v6691_v31  ;;  %v6784_v2 = vadd.f32 %v9520_v52, %v9512_v48  ;;  %v5482_v51 = vpop.permute.xlu0 %5481 }
 0x724   :  { %v6694_v57 = vpop.f32.mrf.mxu0 }
 0x725   :  { %5556 = vst [vmem:[%s9614_s7 + $0x70] sm:$0xff] %v5532_v15  ;;  %v5509_v38 = vadd.f32 %v5452_v62, %v5341_v30  ;;  %v5296_v49 = vadd.f32 %v6781_v10, %v6693_v0 }
 0x726   :  { %v6695_v28 = vpop.f32.mrf.mxu0 }
 0x727   :  { %v5533_v39 = vmax.f32 %v5509_v38, 0.0  ;;  %v5342_v26 = vadd.f32 %v5296_v49, %v9400_v19  ;;  %v6696_v7 = vadd.f32 %v6695_v28, %v6694_v57  ;;  %v6787_v19 = vadd.f32 %v9536_v43, %v9528_v29  ;;  %v9776_v49 = vld [vmem:[#allocation27_spill] sm:$0xff] }
 0x728   :  { %v6697_v14 = vpop.f32.mrf.mxu0 }
 0x729   :  { %5557 = vst [vmem:[%s9614_s7 + $0x78] sm:$0xff] %v5533_v39  ;;  %v5510_v55 = vadd.f32 %v5457_v34, %v5342_v26  ;;  %v5299_v37 = vadd.f32 %v6784_v2, %v6696_v7  ;;  %v5487_v26 = vpop.permute.xlu1 %5486 }
 0x72a   :  { %v6698_v47 = vpop.f32.mrf.mxu0 }
 0x72b   :  { %v5534_v61 = vmax.f32 %v5510_v55, 0.0  ;;  %v5343_v44 = vadd.f32 %v5299_v37, %v9406_v36  ;;  %v6699_v33 = vadd.f32 %v6698_v47, %v6697_v14  ;;  %v6790_v36 = vadd.f32 %v6789_v54, %v9544_v24  ;;  %v9777_v14 = vld [vmem:[#allocation49_spill] sm:$0xff]  ;;  %v5492_v55 = vpop.permute.xlu0 %5491 }
 0x72c   :  { %v6700_v9 = vpop.f32.mrf.mxu0 }
 0x72d   :  { %5558 = vst [vmem:[%s9614_s7 + $0x80] sm:$0xff] %v5534_v61  ;;  %v5511_v48 = vadd.f32 %v5462_v21, %v5343_v44  ;;  %v5304_v52 = vadd.f32 %v6787_v19, %v6699_v33 }
 0x72e   :  { %v6701_v60 = vpop.f32.mrf.mxu0 }
 0x72f   :  { %v5535_v50 = vmax.f32 %v5511_v48, 0.0  ;;  %v5344_v56 = vadd.f32 %v5304_v52, %v9412_v3  ;;  %v6702_v40 = vadd.f32 %v6701_v60, %v6700_v9  ;;  %v6798_v3 = vpop.f32.mrf.mxu1 }
 0x730   :  { %v6703_v12 = vpop.f32.mrf.mxu0  ;;  %v6799_v30 = vadd.f32 %v6798_v3, %v6797_v13 }
 0x731   :  { %5559 = vst [vmem:[%s9614_s7 + $0x88] sm:$0xff] %v5535_v50  ;;  %v5512_v29 = vadd.f32 %v5467_v11, %v5344_v56  ;;  %v5307_v43 = vadd.f32 %v6790_v36, %v6702_v40  ;;  %v6800_v31 = vpop.f32.mrf.mxu1 }
 0x732   :  { %v6704_v35 = vpop.f32.mrf.mxu0 }
 0x733   :  { %v5536_v20 = vmax.f32 %v5512_v29, 0.0  ;;  %v5345_v41 = vadd.f32 %v5307_v43, %v9418_v4  ;;  %v6705_v45 = vadd.f32 %v6704_v35, %v6703_v12  ;;  %v6801_v10 = vpop.f32.mrf.mxu1 }
 0x734   :  { %v6706_v27 = vpop.f32.mrf.mxu0  ;;  %v6802_v39 = vadd.f32 %v6801_v10, %v6800_v31 }
 0x735   :  { %5560 = vst [vmem:[%s9614_s7 + $0x90] sm:$0xff] %v5536_v20  ;;  %v5513_v24 = vadd.f32 %v5472_v5, %v5345_v41  ;;  %v5312_v54 = vadd.f32 %v6793_v63, %v6705_v45 }
 0x736   :  { %v6707_v1 = vpop.f32.mrf.mxu0 }
 0x737   :  { %v5537_v17 = vmax.f32 %v5513_v24, 0.0  ;;  %v5346_v23 = vadd.f32 %v5312_v54, %v9424_v8  ;;  %v6708_v25 = vadd.f32 %v6707_v1, %v6706_v27 }
 0x738   :  { %v6709_v32 = vpop.f32.mrf.mxu0 }
 0x739   :  { %5561 = vst [vmem:[%s9614_s7 + $0x98] sm:$0xff] %v5537_v17  ;;  %v5514_v4 = vadd.f32 %v5477_v58, %v5346_v23  ;;  %v5315_v46 = vadd.f32 %v6796_v16, %v6708_v25 }
 0x73a   :  { %v6710_v22 = vpop.f32.mrf.mxu0 }
 0x73b   :  { %v5538_v59 = vmax.f32 %v5514_v4, 0.0  ;;  %v5347_v62 = vadd.f32 %v5315_v46, %v9430_v18  ;;  %v6711_v15 = vadd.f32 %v6710_v22, %v6709_v32 }
 0x73c   :  { %v6712_v0 = vpop.f32.mrf.mxu0 }
 0x73d   :  { %5562 = vst [vmem:[%s9614_s7 + $0xa0] sm:$0xff] %v5538_v59  ;;  %v5515_v8 = vadd.f32 %v5482_v51, %v5347_v62  ;;  %v5320_v57 = vadd.f32 %v6799_v30, %v6711_v15 }
 0x73e   :  { %v6713_v6 = vpop.f32.mrf.mxu0 }
 0x73f   :  { %v5539_v38 = vmax.f32 %v5515_v8, 0.0  ;;  %v5348_v28 = vadd.f32 %v5320_v57, %v9776_v49  ;;  %v6714_v34 = vadd.f32 %v6713_v6, %v6712_v0 }
 0x741   :  { %5563 = vst [vmem:[%s9614_s7 + $0xa8] sm:$0xff] %v5539_v38  ;;  %v5516_v18 = vadd.f32 %v5487_v26, %v5348_v28  ;;  %v5323_v7 = vadd.f32 %v6802_v39, %v6714_v34 }
 0x743   :  { %v5540_v2 = vmax.f32 %v5516_v18, 0.0  ;;  %v5349_v42 = vadd.f32 %v5323_v7, %v9777_v14 }
 0x745   :  { %5564 = vst [vmem:[%s9614_s7 + $0xb0] sm:$0xff] %v5540_v2  ;;  %v5517_v37 = vadd.f32 %v5492_v55, %v5349_v42 }
 0x747   :  { %v5541_v47 = vmax.f32 %v5517_v37, 0.0 }
 0x749   :  { %5565 = vst [vmem:[%s9614_s7 + $0xb8] sm:$0xff] %v5541_v47 }
 0x74a   :  { %5570 = vsyncpa [#allocation5], 1 }
 0x74b   :  { %5571 = vsyncpa [#allocation7], 1 }

</bundles_post_ra>
